<compile_context>
chip_gen: v7x
topology: tpu7x:2x2x1
jax: 0.10.0
libtpu: 0.0.40
codegen_flags: <defaults>
</compile_context>

<pallas_src>
import numpy as np
import jax
import jax.numpy as jnp
from jax import lax
from jax.experimental import pallas as pl
from jax.experimental.pallas import tpu as pltpu

MEL_PRE = 10      # MEL_PRE_DONSAMPLING (time stride before the conv)
CONV_K = 10       # Conv2d kernel width over time
HIDDEN = 100      # HIDDEN_CHANNELS
POOL = 10         # MEL_POST_DONSAMPLING (MaxPool1d kernel & stride)
HP = 128          # HIDDEN padded to a full 128-lane width
OUT_PAD = 128     # fc output padded to a full 128-lane width

# Gate bookkeeping: PyTorch LSTM row-block order is [i, f, g, o]; our packed
# column-block order is gate-type-major [i_f|i_b|f_f|f_b|o_f|o_b|g_f|g_b]
# (all sigmoid gates contiguous in cols 0:6*HP, both tanh 'g' gates in 6*HP:8*HP).
GATE_ROW = {"i": 0, "f": 1, "g": 2, "o": 3}
GATE_COL = {"i": 0, "f": 2, "o": 4, "g": 6}     # fwd block; bwd block = +1


# ----------------------------------------------------------------------------
# Fused kernel: conv+maxpool -> bidirectional LSTM (final h) -> fc
# ----------------------------------------------------------------------------
def _make_fused_kernel(S, BP):
    NROW = S * BP  # rows per pooling-offset block; BP is a multiple of 8

    def kernel(patch_ref, wc_ref, bc_ref, win_ref, bin_ref, whh_ref,
               wfc_ref, bfc_ref, o_ref):
        # --- Conv2d(1, H, (Cin, K)) as ONE im2col matmul ---------------------
        # patch rows ordered (p, t, b); columns ordered (k, cin).
        conv = jnp.dot(patch_ref[...], wc_ref[...],
                       preferred_element_type=jnp.float32)       # (POOL*S*BP, HP)

        # --- MaxPool1d(POOL): tree max over POOL aligned row blocks ----------
        blocks = [conv[p * NROW:(p + 1) * NROW, :] for p in range(POOL)]
        while len(blocks) > 1:
            nxt = [jnp.maximum(blocks[i], blocks[i + 1])
                   for i in range(0, len(blocks) - 1, 2)]
            if len(blocks) % 2:
                nxt.append(blocks[-1])
            blocks = nxt
        # bias commutes with max -> added once, after pooling
        feats = blocks[0] + bc_ref[...]                           # (S*BP, HP), time-major

        # --- LSTM input projections (both directions), hoisted out of loop ---
        # gate-type-major columns: [i_f|i_b|f_f|f_b|o_f|o_b|g_f|g_b]
        gall = (jnp.dot(feats, win_ref[...],
                        preferred_element_type=jnp.float32)
                + bin_ref[...])                                   # (S*BP, 8*HP)
        # Time-reverse the backward-direction columns ONCE so every recurrence
        # step consumes a single sublane-aligned 8-row block (no per-step
        # sublane shifts / double slices).
        gall_rev = jnp.concatenate(
            [gall[(S - 1 - t) * BP:(S - t) * BP, :] for t in range(S)], axis=0)
        col = lax.broadcasted_iota(jnp.int32, (NROW, 8 * HP), 1)
        is_fwd_col = (col & HP) == 0          # column blocks 0,2,4,6 are fwd
        gall_c = jnp.where(is_fwd_col, gall, gall_rev)            # (S*BP, 8*HP)

        # --- Fused bidirectional recurrence ----------------------------------
        # h/c carried as concat([fwd, bwd]) -> ONE block-diagonal matmul per
        # step produces both directions' gates; one sigmoid slab (6*HP) and
        # one tanh slab (2*HP) per step.
        #
        # Zero-padding invariant: lanes HIDDEN..HP-1 of each half stay exactly
        # zero because the padded gate pre-activations are 0, so g=tanh(0)=0
        # keeps c (and hence h=o*tanh(c)) at 0 even though i/f/o evaluate to
        # 0.5 there.  This relies on zero initial h/c and zero-padded weight
        # rows/cols in w_in / w_hh / b_in — keep it that way.
        h = jnp.zeros((BP, 2 * HP), jnp.float32)
        c = jnp.zeros((BP, 2 * HP), jnp.float32)
        whh = whh_ref[...]                                        # (2*HP, 8*HP)

        # TODO(synk): switch to lax.fori_loop(..., unroll=2) if S grows large
        # (static unroll is fine at S=4).
        for t in range(S):
            gates = gall_c[t * BP:(t + 1) * BP, :] + jnp.dot(
                h, whh, preferred_element_type=jnp.float32)       # (BP, 8*HP)
            sig = jax.nn.sigmoid(gates[:, :6 * HP])               # i|f|o, both dirs
            g = jnp.tanh(gates[:, 6 * HP:])                       # g, both dirs
            i_g = sig[:, 0:2 * HP]
            f_g = sig[:, 2 * HP:4 * HP]
            o_g = sig[:, 4 * HP:6 * HP]
            c = f_g * c + i_g * g
            h = o_g * jnp.tanh(c)

        # --- fc on concat([h_f, h_b]) == h: ONE matmul, 128-lane output ------
        o_ref[...] = (jnp.dot(h, wfc_ref[...],
                              preferred_element_type=jnp.float32)
                      + bfc_ref[...])                             # (BP, OUT_PAD)

    return kernel


# ----------------------------------------------------------------------------
# One-time weight packing (OUTSIDE the per-call jitted path)
# ----------------------------------------------------------------------------
def pack_params(params):
    H = HIDDEN

    # conv weight as (K*Cin, HP): w_conv[k*Cin + c, h] = conv_w[h, 0, c, k]
    w_conv = jnp.transpose(params["conv_w"][:, 0], (2, 1, 0)).reshape(-1, H)
    w_conv = jnp.pad(w_conv, ((0, 0), (0, HP - H)))
    b_conv = jnp.pad(params["conv_b"], (0, HP - H))[None, :]           # (1, HP)

    # input projection (HP, 8*HP): rows = conv feature lanes; both directions
    # read the same features (bwd columns get time-reversed in-kernel).
    w_in = jnp.zeros((HP, 8 * HP), jnp.float32)
    b_in = jnp.zeros((1, 8 * HP), jnp.float32)
    # recurrence (2*HP, 8*HP), block-diagonal: rows 0:HP (h_f) drive only the
    # fwd gate columns, rows HP:2*HP (h_b) only the bwd gate columns.
    w_hh = jnp.zeros((2 * HP, 8 * HP), jnp.float32)

    for name, gr in GATE_ROW.items():
        rs, re = gr * H, (gr + 1) * H
        cf = GATE_COL[name] * HP           # fwd column block
        cb = cf + HP                       # bwd column block
        w_in = w_in.at[0:H, cf:cf + H].set(params["w_ih_f"][rs:re, :].T)
        w_in = w_in.at[0:H, cb:cb + H].set(params["w_ih_b"][rs:re, :].T)
        w_hh = w_hh.at[0:H, cf:cf + H].set(params["w_hh_f"][rs:re, :].T)
        w_hh = w_hh.at[HP:HP + H, cb:cb + H].set(params["w_hh_b"][rs:re, :].T)
        b_in = b_in.at[0, cf:cf + H].set(params["b_ih_f"][rs:re]
                                         + params["b_hh_f"][rs:re])
        b_in = b_in.at[0, cb:cb + H].set(params["b_ih_b"][rs:re]
                                         + params["b_hh_b"][rs:re])

    out_ch = params["fc_w"].shape[0]
    w_fc = jnp.zeros((2 * HP, OUT_PAD), jnp.float32)
    w_fc = w_fc.at[0:H, 0:out_ch].set(params["fc_w"][:, 0:H].T)
    w_fc = w_fc.at[HP:HP + H, 0:out_ch].set(params["fc_w"][:, H:2 * H].T)
    b_fc = jnp.zeros((1, OUT_PAD), jnp.float32).at[0, 0:out_ch].set(params["fc_b"])

    return dict(w_conv=w_conv, b_conv=b_conv, w_in=w_in, b_in=b_in,
                w_hh=w_hh, w_fc=w_fc, b_fc=b_fc)


# ----------------------------------------------------------------------------
# Per-call forward (jitted): im2col via static slices + one pallas_call
# ----------------------------------------------------------------------------
def mel2word_forward(x, packed, out_ch):
    B, Cin, T = x.shape
    BP = ((B + 7) // 8) * 8                         # batch padded to sublane block
    x_ds = x[:, :, ::MEL_PRE]                       # (B, Cin, Tp)
    Tp = x_ds.shape[2]
    L = Tp - CONV_K + 1                             # valid conv positions
    S = L // POOL                                   # pooled sequence length
    SP = S * POOL
    CK = CONV_K * Cin

    # im2col with static slices + concat (no gather / dynamic-slice HLOs).
    # patches[p*(S*BP) + t*BP + b, k*Cin + c] = x_ds[b, c, t*POOL + p + k]
    x_t = jnp.transpose(x_ds, (0, 2, 1))            # (B, Tp, Cin)
    cols = [x_t[:, k:k + SP, :] for k in range(CONV_K)]
    pat = jnp.concatenate(cols, axis=2)             # (B, SP, K*Cin)
    pat = pat.reshape(B, S, POOL, CK)
    pat = jnp.transpose(pat, (2, 1, 0, 3))          # (POOL, S, B, CK)
    pat = jnp.pad(pat, ((0, 0), (0, 0), (0, BP - B), (0, 0)))
    patches = pat.reshape(POOL * S * BP, CK)

    vmem = pl.BlockSpec(memory_space=pltpu.MemorySpace.VMEM)
    out = pl.pallas_call(
        _make_fused_kernel(S, BP),
        out_shape=jax.ShapeDtypeStruct((BP, OUT_PAD), jnp.float32),
        in_specs=[vmem] * 8,
        out_specs=vmem,
    )(patches, packed["w_conv"], packed["b_conv"], packed["w_in"],
      packed["b_in"], packed["w_hh"], packed["w_fc"], packed["b_fc"])
    return out[:B, :out_ch]


# ----------------------------------------------------------------------------
# Pure-JAX reference (mirrors the PyTorch forward), full f32 precision
# ----------------------------------------------------------------------------
def mel2word_reference(x, params):
    B, Cin, T = x.shape
    hp = lax.Precision.HIGHEST
    x_ds = x[:, :, ::MEL_PRE]
    xc = x_ds[:, None]                              # (B, 1, Cin, Tp)
    conv = lax.conv_general_dilated(
        xc, params["conv_w"], window_strides=(1, 1), padding="VALID",
        dimension_numbers=("NCHW", "OIHW", "NCHW"), precision=hp)
    conv = conv + params["conv_b"][None, :, None, None]
    feats = conv[:, :, 0, :]                        # (B, HIDDEN, L)
    L = feats.shape[2]
    S = L // POOL
    feats = feats[:, :, :S * POOL].reshape(B, HIDDEN, S, POOL).max(axis=-1)
    seq = jnp.transpose(feats, (0, 2, 1))           # (B, S, HIDDEN)

    def run_dir(w_ih, w_hh, b_ih, b_hh, reverse):
        def cell(carry, x_t):
            h, c = carry
            gates = (jnp.dot(x_t, w_ih.T, precision=hp) + b_ih
                     + jnp.dot(h, w_hh.T, precision=hp) + b_hh)
            H = HIDDEN
            i = jax.nn.sigmoid(gates[:, :H])
            f = jax.nn.sigmoid(gates[:, H:2 * H])
            g = jnp.tanh(gates[:, 2 * H:3 * H])
            o = jax.nn.sigmoid(gates[:, 3 * H:])
            c = f * c + i * g
            h = o * jnp.tanh(c)
            return (h, c), h
        xs = jnp.transpose(seq, (1, 0, 2))
        if reverse:
            xs = xs[::-1]
        (h, _), _ = lax.scan(
            cell, (jnp.zeros((B, HIDDEN)), jnp.zeros((B, HIDDEN))), xs)
        return h

    h_f = run_dir(params["w_ih_f"], params["w_hh_f"],
                  params["b_ih_f"], params["b_hh_f"], False)
    h_b = run_dir(params["w_ih_b"], params["w_hh_b"],
                  params["b_ih_b"], params["b_hh_b"], True)
    feat = jnp.concatenate([h_f, h_b], axis=1)      # (B, 200)
    return jnp.dot(feat, params["fc_w"].T, precision=hp) + params["fc_b"]


def init_params(key, in_channels, out_channels):
    keys = jax.random.split(key, 12)
    s = 0.05
    return {
        "conv_w": s * jax.random.normal(keys[0], (HIDDEN, 1, in_channels, CONV_K), jnp.float32),
        "conv_b": s * jax.random.normal(keys[1], (HIDDEN,), jnp.float32),
        "w_ih_f": s * jax.random.normal(keys[2], (4 * HIDDEN, HIDDEN), jnp.float32),
        "w_hh_f": s * jax.random.normal(keys[3], (4 * HIDDEN, HIDDEN), jnp.float32),
        "b_ih_f": s * jax.random.normal(keys[4], (4 * HIDDEN,), jnp.float32),
        "b_hh_f": s * jax.random.normal(keys[5], (4 * HIDDEN,), jnp.float32),
        "w_ih_b": s * jax.random.normal(keys[6], (4 * HIDDEN, HIDDEN), jnp.float32),
        "w_hh_b": s * jax.random.normal(keys[7], (4 * HIDDEN, HIDDEN), jnp.float32),
        "b_ih_b": s * jax.random.normal(keys[8], (4 * HIDDEN,), jnp.float32),
        "b_hh_b": s * jax.random.normal(keys[9], (4 * HIDDEN,), jnp.float32),
        "fc_w": s * jax.random.normal(keys[10], (out_channels, 2 * HIDDEN), jnp.float32),
        "fc_b": s * jax.random.normal(keys[11], (out_channels,), jnp.float32),
    }


if __name__ == "__main__":
    B, IN_CHANNELS, T = 2, 16, 500   # -> Tp=50, conv L=41, pooled seq len S=4
    OUT_CHANNELS = 8

    key = jax.random.PRNGKey(0)
    k_x, k_p = jax.random.split(key)
    x = jax.random.normal(k_x, (B, IN_CHANNELS, T), jnp.float32)
    params = init_params(k_p, IN_CHANNELS, OUT_CHANNELS)

    # One-time weight packing, kept OUT of the jitted per-call path.
    packed = jax.block_until_ready(pack_params(params))

    fwd = jax.jit(mel2word_forward, static_argnums=(2,))
    out = jax.block_until_ready(fwd(x, packed, OUT_CHANNELS))
    ref = jax.block_until_ready(mel2word_reference(x, params))

    assert out.shape == (B, OUT_CHANNELS), out.shape
    np.testing.assert_allclose(np.asarray(out), np.asarray(ref),
                               rtol=1e-4, atol=1e-4)
    print("KERNEL_OK")
</pallas_src>

<mosaic_0001>
module attributes {stable_mosaic.version = 11 : i64} {
  func.func @kernel(%arg0: memref<320x160xf32, #tpu.memory_space<vmem>>, %arg1: memref<160x128xf32, #tpu.memory_space<vmem>>, %arg2: memref<1x128xf32, #tpu.memory_space<vmem>>, %arg3: memref<128x1024xf32, #tpu.memory_space<vmem>>, %arg4: memref<1x1024xf32, #tpu.memory_space<vmem>>, %arg5: memref<256x1024xf32, #tpu.memory_space<vmem>>, %arg6: memref<256x128xf32, #tpu.memory_space<vmem>>, %arg7: memref<1x128xf32, #tpu.memory_space<vmem>>, %arg8: memref<8x128xf32, #tpu.memory_space<vmem>>) attributes {dimension_semantics = [], scalar_prefetch = 0 : i64, scratch_operands = 0 : i64, tpu.core_type = #tpu.core_type<tc>} {
    %c0 = arith.constant 0 : index
    %c0_0 = arith.constant 0 : index
    %0 = vector.load %arg0[%c0, %c0_0] : memref<320x160xf32, #tpu.memory_space<vmem>>, vector<320x160xf32>
    %c0_1 = arith.constant 0 : index
    %c0_2 = arith.constant 0 : index
    %1 = vector.load %arg1[%c0_1, %c0_2] : memref<160x128xf32, #tpu.memory_space<vmem>>, vector<160x128xf32>
    %cst = arith.constant dense<0.000000e+00> : vector<320x128xf32>
    %2 = tpu.matmul %0, %1, %cst {dimension_numbers = #tpu.dot_dimension_numbers<[1], [0], [0], [1], [0, 0, 1, 1], [], []>} : vector<320x160xf32>, vector<160x128xf32>, vector<320x128xf32> -> vector<320x128xf32>
    %3 = vector.extract_strided_slice %2 {offsets = [0, 0], sizes = [32, 128], strides = [1, 1]} : vector<320x128xf32> to vector<32x128xf32>
    %4 = vector.extract_strided_slice %2 {offsets = [32, 0], sizes = [32, 128], strides = [1, 1]} : vector<320x128xf32> to vector<32x128xf32>
    %5 = vector.extract_strided_slice %2 {offsets = [64, 0], sizes = [32, 128], strides = [1, 1]} : vector<320x128xf32> to vector<32x128xf32>
    %6 = vector.extract_strided_slice %2 {offsets = [96, 0], sizes = [32, 128], strides = [1, 1]} : vector<320x128xf32> to vector<32x128xf32>
    %7 = vector.extract_strided_slice %2 {offsets = [128, 0], sizes = [32, 128], strides = [1, 1]} : vector<320x128xf32> to vector<32x128xf32>
    %8 = vector.extract_strided_slice %2 {offsets = [160, 0], sizes = [32, 128], strides = [1, 1]} : vector<320x128xf32> to vector<32x128xf32>
    %9 = vector.extract_strided_slice %2 {offsets = [192, 0], sizes = [32, 128], strides = [1, 1]} : vector<320x128xf32> to vector<32x128xf32>
    %10 = vector.extract_strided_slice %2 {offsets = [224, 0], sizes = [32, 128], strides = [1, 1]} : vector<320x128xf32> to vector<32x128xf32>
    %11 = vector.extract_strided_slice %2 {offsets = [256, 0], sizes = [32, 128], strides = [1, 1]} : vector<320x128xf32> to vector<32x128xf32>
    %12 = vector.extract_strided_slice %2 {offsets = [288, 0], sizes = [32, 128], strides = [1, 1]} : vector<320x128xf32> to vector<32x128xf32>
    %13 = arith.maximumf %3, %4 : vector<32x128xf32>
    %14 = arith.maximumf %5, %6 : vector<32x128xf32>
    %15 = arith.maximumf %7, %8 : vector<32x128xf32>
    %16 = arith.maximumf %9, %10 : vector<32x128xf32>
    %17 = arith.maximumf %11, %12 : vector<32x128xf32>
    %18 = arith.maximumf %13, %14 : vector<32x128xf32>
    %19 = arith.maximumf %15, %16 : vector<32x128xf32>
    %20 = arith.maximumf %18, %19 : vector<32x128xf32>
    %21 = arith.maximumf %20, %17 : vector<32x128xf32>
    %c0_3 = arith.constant 0 : index
    %c0_4 = arith.constant 0 : index
    %22 = vector.load %arg2[%c0_3, %c0_4] : memref<1x128xf32, #tpu.memory_space<vmem>>, vector<1x128xf32>
    %23 = vector.broadcast %22 : vector<1x128xf32> to vector<32x128xf32>
    %24 = arith.addf %21, %23 : vector<32x128xf32>
    %c0_5 = arith.constant 0 : index
    %c0_6 = arith.constant 0 : index
    %25 = vector.load %arg3[%c0_5, %c0_6] : memref<128x1024xf32, #tpu.memory_space<vmem>>, vector<128x1024xf32>
    %cst_7 = arith.constant dense<0.000000e+00> : vector<32x1024xf32>
    %26 = tpu.matmul %24, %25, %cst_7 {dimension_numbers = #tpu.dot_dimension_numbers<[1], [0], [0], [1], [0, 0, 1, 1], [], []>} : vector<32x128xf32>, vector<128x1024xf32>, vector<32x1024xf32> -> vector<32x1024xf32>
    %c0_8 = arith.constant 0 : index
    %c0_9 = arith.constant 0 : index
    %27 = vector.load %arg4[%c0_8, %c0_9] : memref<1x1024xf32, #tpu.memory_space<vmem>>, vector<1x1024xf32>
    %28 = vector.broadcast %27 : vector<1x1024xf32> to vector<32x1024xf32>
    %29 = arith.addf %26, %28 : vector<32x1024xf32>
    %30 = vector.extract_strided_slice %29 {offsets = [24, 0], sizes = [8, 1024], strides = [1, 1]} : vector<32x1024xf32> to vector<8x1024xf32>
    %31 = vector.extract_strided_slice %29 {offsets = [16, 0], sizes = [8, 1024], strides = [1, 1]} : vector<32x1024xf32> to vector<8x1024xf32>
    %32 = vector.extract_strided_slice %29 {offsets = [8, 0], sizes = [8, 1024], strides = [1, 1]} : vector<32x1024xf32> to vector<8x1024xf32>
    %33 = vector.extract_strided_slice %29 {offsets = [0, 0], sizes = [8, 1024], strides = [1, 1]} : vector<32x1024xf32> to vector<8x1024xf32>
    %34 = tpu.concatenate %30, %31, %32, %33 in 0 : vector<8x1024xf32>, vector<8x1024xf32>, vector<8x1024xf32>, vector<8x1024xf32> -> vector<32x1024xf32>
    %35 = tpu.iota {dimensions = array<i32: 1>} : vector<32x1024xi32>
    %c128_i32 = arith.constant 128 : i32
    %36 = vector.broadcast %c128_i32 : i32 to vector<32x1024xi32>
    %37 = arith.andi %35, %36 : vector<32x1024xi32>
    %c0_i32 = arith.constant 0 : i32
    %38 = vector.broadcast %c0_i32 : i32 to vector<32x1024xi32>
    %39 = arith.cmpi eq, %37, %38 : vector<32x1024xi32>
    %40 = arith.select %39, %29, %34 : vector<32x1024xi1>, vector<32x1024xf32>
    %cst_10 = arith.constant 0.000000e+00 : f32
    %41 = vector.broadcast %cst_10 : f32 to vector<8x256xf32>
    %cst_11 = arith.constant 0.000000e+00 : f32
    %42 = vector.broadcast %cst_11 : f32 to vector<8x256xf32>
    %c0_12 = arith.constant 0 : index
    %c0_13 = arith.constant 0 : index
    %43 = vector.load %arg5[%c0_12, %c0_13] : memref<256x1024xf32, #tpu.memory_space<vmem>>, vector<256x1024xf32>
    %44 = vector.extract_strided_slice %40 {offsets = [0, 0], sizes = [8, 1024], strides = [1, 1]} : vector<32x1024xf32> to vector<8x1024xf32>
    %cst_14 = arith.constant dense<0.000000e+00> : vector<8x1024xf32>
    %45 = tpu.matmul %41, %43, %cst_14 {dimension_numbers = #tpu.dot_dimension_numbers<[1], [0], [0], [1], [0, 0, 1, 1], [], []>} : vector<8x256xf32>, vector<256x1024xf32>, vector<8x1024xf32> -> vector<8x1024xf32>
    %46 = arith.addf %44, %45 : vector<8x1024xf32>
    %47 = vector.extract_strided_slice %46 {offsets = [0, 0], sizes = [8, 768], strides = [1, 1]} : vector<8x1024xf32> to vector<8x768xf32>
    %48 = arith.negf %47 : vector<8x768xf32>
    %49 = math.exp %48 : vector<8x768xf32>
    %cst_15 = arith.constant 1.000000e+00 : f32
    %50 = vector.broadcast %cst_15 : f32 to vector<8x768xf32>
    %51 = arith.addf %50, %49 : vector<8x768xf32>
    %52 = arith.divf %50, %51 : vector<8x768xf32>
    %53 = vector.extract_strided_slice %46 {offsets = [0, 768], sizes = [8, 256], strides = [1, 1]} : vector<8x1024xf32> to vector<8x256xf32>
    %54 = math.tanh %53 : vector<8x256xf32>
    %55 = vector.extract_strided_slice %52 {offsets = [0, 0], sizes = [8, 256], strides = [1, 1]} : vector<8x768xf32> to vector<8x256xf32>
    %56 = vector.extract_strided_slice %52 {offsets = [0, 256], sizes = [8, 256], strides = [1, 1]} : vector<8x768xf32> to vector<8x256xf32>
    %57 = vector.extract_strided_slice %52 {offsets = [0, 512], sizes = [8, 256], strides = [1, 1]} : vector<8x768xf32> to vector<8x256xf32>
    %58 = arith.mulf %56, %42 : vector<8x256xf32>
    %59 = arith.mulf %55, %54 : vector<8x256xf32>
    %60 = arith.addf %58, %59 : vector<8x256xf32>
    %61 = math.tanh %60 : vector<8x256xf32>
    %62 = arith.mulf %57, %61 : vector<8x256xf32>
    %63 = vector.extract_strided_slice %40 {offsets = [8, 0], sizes = [8, 1024], strides = [1, 1]} : vector<32x1024xf32> to vector<8x1024xf32>
    %cst_16 = arith.constant dense<0.000000e+00> : vector<8x1024xf32>
    %64 = tpu.matmul %62, %43, %cst_16 {dimension_numbers = #tpu.dot_dimension_numbers<[1], [0], [0], [1], [0, 0, 1, 1], [], []>} : vector<8x256xf32>, vector<256x1024xf32>, vector<8x1024xf32> -> vector<8x1024xf32>
    %65 = arith.addf %63, %64 : vector<8x1024xf32>
    %66 = vector.extract_strided_slice %65 {offsets = [0, 0], sizes = [8, 768], strides = [1, 1]} : vector<8x1024xf32> to vector<8x768xf32>
    %67 = arith.negf %66 : vector<8x768xf32>
    %68 = math.exp %67 : vector<8x768xf32>
    %cst_17 = arith.constant 1.000000e+00 : f32
    %69 = vector.broadcast %cst_17 : f32 to vector<8x768xf32>
    %70 = arith.addf %69, %68 : vector<8x768xf32>
    %71 = arith.divf %69, %70 : vector<8x768xf32>
    %72 = vector.extract_strided_slice %65 {offsets = [0, 768], sizes = [8, 256], strides = [1, 1]} : vector<8x1024xf32> to vector<8x256xf32>
    %73 = math.tanh %72 : vector<8x256xf32>
    %74 = vector.extract_strided_slice %71 {offsets = [0, 0], sizes = [8, 256], strides = [1, 1]} : vector<8x768xf32> to vector<8x256xf32>
    %75 = vector.extract_strided_slice %71 {offsets = [0, 256], sizes = [8, 256], strides = [1, 1]} : vector<8x768xf32> to vector<8x256xf32>
    %76 = vector.extract_strided_slice %71 {offsets = [0, 512], sizes = [8, 256], strides = [1, 1]} : vector<8x768xf32> to vector<8x256xf32>
    %77 = arith.mulf %75, %60 : vector<8x256xf32>
    %78 = arith.mulf %74, %73 : vector<8x256xf32>
    %79 = arith.addf %77, %78 : vector<8x256xf32>
    %80 = math.tanh %79 : vector<8x256xf32>
    %81 = arith.mulf %76, %80 : vector<8x256xf32>
    %82 = vector.extract_strided_slice %40 {offsets = [16, 0], sizes = [8, 1024], strides = [1, 1]} : vector<32x1024xf32> to vector<8x1024xf32>
    %cst_18 = arith.constant dense<0.000000e+00> : vector<8x1024xf32>
    %83 = tpu.matmul %81, %43, %cst_18 {dimension_numbers = #tpu.dot_dimension_numbers<[1], [0], [0], [1], [0, 0, 1, 1], [], []>} : vector<8x256xf32>, vector<256x1024xf32>, vector<8x1024xf32> -> vector<8x1024xf32>
    %84 = arith.addf %82, %83 : vector<8x1024xf32>
    %85 = vector.extract_strided_slice %84 {offsets = [0, 0], sizes = [8, 768], strides = [1, 1]} : vector<8x1024xf32> to vector<8x768xf32>
    %86 = arith.negf %85 : vector<8x768xf32>
    %87 = math.exp %86 : vector<8x768xf32>
    %cst_19 = arith.constant 1.000000e+00 : f32
    %88 = vector.broadcast %cst_19 : f32 to vector<8x768xf32>
    %89 = arith.addf %88, %87 : vector<8x768xf32>
    %90 = arith.divf %88, %89 : vector<8x768xf32>
    %91 = vector.extract_strided_slice %84 {offsets = [0, 768], sizes = [8, 256], strides = [1, 1]} : vector<8x1024xf32> to vector<8x256xf32>
    %92 = math.tanh %91 : vector<8x256xf32>
    %93 = vector.extract_strided_slice %90 {offsets = [0, 0], sizes = [8, 256], strides = [1, 1]} : vector<8x768xf32> to vector<8x256xf32>
    %94 = vector.extract_strided_slice %90 {offsets = [0, 256], sizes = [8, 256], strides = [1, 1]} : vector<8x768xf32> to vector<8x256xf32>
    %95 = vector.extract_strided_slice %90 {offsets = [0, 512], sizes = [8, 256], strides = [1, 1]} : vector<8x768xf32> to vector<8x256xf32>
    %96 = arith.mulf %94, %79 : vector<8x256xf32>
    %97 = arith.mulf %93, %92 : vector<8x256xf32>
    %98 = arith.addf %96, %97 : vector<8x256xf32>
    %99 = math.tanh %98 : vector<8x256xf32>
    %100 = arith.mulf %95, %99 : vector<8x256xf32>
    %101 = vector.extract_strided_slice %40 {offsets = [24, 0], sizes = [8, 1024], strides = [1, 1]} : vector<32x1024xf32> to vector<8x1024xf32>
    %cst_20 = arith.constant dense<0.000000e+00> : vector<8x1024xf32>
    %102 = tpu.matmul %100, %43, %cst_20 {dimension_numbers = #tpu.dot_dimension_numbers<[1], [0], [0], [1], [0, 0, 1, 1], [], []>} : vector<8x256xf32>, vector<256x1024xf32>, vector<8x1024xf32> -> vector<8x1024xf32>
    %103 = arith.addf %101, %102 : vector<8x1024xf32>
    %104 = vector.extract_strided_slice %103 {offsets = [0, 0], sizes = [8, 768], strides = [1, 1]} : vector<8x1024xf32> to vector<8x768xf32>
    %105 = arith.negf %104 : vector<8x768xf32>
    %106 = math.exp %105 : vector<8x768xf32>
    %cst_21 = arith.constant 1.000000e+00 : f32
    %107 = vector.broadcast %cst_21 : f32 to vector<8x768xf32>
    %108 = arith.addf %107, %106 : vector<8x768xf32>
    %109 = arith.divf %107, %108 : vector<8x768xf32>
    %110 = vector.extract_strided_slice %103 {offsets = [0, 768], sizes = [8, 256], strides = [1, 1]} : vector<8x1024xf32> to vector<8x256xf32>
    %111 = math.tanh %110 : vector<8x256xf32>
    %112 = vector.extract_strided_slice %109 {offsets = [0, 0], sizes = [8, 256], strides = [1, 1]} : vector<8x768xf32> to vector<8x256xf32>
    %113 = vector.extract_strided_slice %109 {offsets = [0, 256], sizes = [8, 256], strides = [1, 1]} : vector<8x768xf32> to vector<8x256xf32>
    %114 = vector.extract_strided_slice %109 {offsets = [0, 512], sizes = [8, 256], strides = [1, 1]} : vector<8x768xf32> to vector<8x256xf32>
    %115 = arith.mulf %113, %98 : vector<8x256xf32>
    %116 = arith.mulf %112, %111 : vector<8x256xf32>
    %117 = arith.addf %115, %116 : vector<8x256xf32>
    %118 = math.tanh %117 : vector<8x256xf32>
    %119 = arith.mulf %114, %118 : vector<8x256xf32>
    %c0_22 = arith.constant 0 : index
    %c0_23 = arith.constant 0 : index
    %120 = vector.load %arg6[%c0_22, %c0_23] : memref<256x128xf32, #tpu.memory_space<vmem>>, vector<256x128xf32>
    %cst_24 = arith.constant dense<0.000000e+00> : vector<8x128xf32>
    %121 = tpu.matmul %119, %120, %cst_24 {dimension_numbers = #tpu.dot_dimension_numbers<[1], [0], [0], [1], [0, 0, 1, 1], [], []>} : vector<8x256xf32>, vector<256x128xf32>, vector<8x128xf32> -> vector<8x128xf32>
    %c0_25 = arith.constant 0 : index
    %c0_26 = arith.constant 0 : index
    %122 = vector.load %arg7[%c0_25, %c0_26] : memref<1x128xf32, #tpu.memory_space<vmem>>, vector<1x128xf32>
    %123 = vector.broadcast %122 : vector<1x128xf32> to vector<8x128xf32>
    %124 = arith.addf %121, %123 : vector<8x128xf32>
    %c0_27 = arith.constant 0 : index
    %c0_28 = arith.constant 0 : index
    %125 = vector.load %arg8[%c0_27, %c0_28] : memref<8x128xf32, #tpu.memory_space<vmem>>, vector<8x128xf32>
    tpu.vector_store %arg8[%c0_27, %c0_28], %124 {strides = array<i32>} : memref<8x128xf32, #tpu.memory_space<vmem>>, vector<8x128xf32>,
    return
  }
}

</mosaic_0001>

<bundles_post_ra>
// kernel: mel2word_forward.1
= control target key start
LH: loop header
LB: loop body
LE: loop exit
PB: predicated region body
PF: predicated region fallthrough
CT: control target
= control target key end

     0   :  { %13 = vsyncpa [#allocation3], 0  ;;  %s6731_s0 = inlined_call_operand.vmem [shape: f32[320,160], index: 0, kind: input, shape index: {}]   ;;  %s6732_s1 = inlined_call_operand.hbm [shape: f32[160,128], index: 1, kind: input, shape index: {}]   ;;  %s6733_s2 = inlined_call_operand.vmem [shape: f32[1,128], index: 2, kind: input, shape index: {}]   ;;  %s6734_s3 = inlined_call_operand.hbm [shape: f32[128,1024], index: 3, kind: input, shape index: {}]   ;;  %s6735_s4 = inlined_call_operand.vmem [shape: f32[1,1024], index: 4, kind: input, shape index: {}]   ;;  %s6736_s5 = inlined_call_operand.vmem [shape: f32[256,1024], index: 5, kind: input, shape index: {}]   ;;  %s6737_s6 = inlined_call_operand.vmem [shape: f32[256,128], index: 6, kind: input, shape index: {}]   ;;  %s6738_s7 = inlined_call_operand.vmem [shape: f32[1,128], index: 7, kind: input, shape index: {}]   ;;  %s6739_s8 = inlined_call_operand.vmem [shape: f32[8,128], index: 8, kind: output, shape index: {}]  }
   0x1   :  { %14 = vsyncpa [#allocation5], 0  ;;  %s4404_s27 = smov [#allocation2]   ;;  %s4356_s9 = scalar_lea.hbm %s6732_s1, 2560 }
   0x2   :  { %s22_s28 = sshll.u32 %s4404_s27, 4  ;;  %p4357_p0 = scmp.ne.s32.totalorder %s6732_s1, %s4356_s9  ;;  %s23_s28 = int_to_ptr.vmem [resolvable:$true] %s22_s28 }
   0x3   :  { %p4360_p1 = scmp.lt.u32.totalorder %s4356_s9, %s6732_s1 }
   0x5   :  { %p4362_p2 = pnand %p4360_p1, %p4357_p0 }
   0x7   :  { %4365 = shalt.err (!%p4362_p2)
}
   0x8   :  { %s4366_s14 = scalar_lea.vmem %s23_s28, 2560  ;;  %p4371_p4 = scmp.lt.s32.totalorder %s23_s28, %s23_s28 }
   0x9   :  { %p4367_p3 = scmp.ne.s32.totalorder %s23_s28, %s4366_s14  ;;  %p4372_p5 = scmp.lt.s32.totalorder %s4366_s14, %s4366_s14 }
   0xb   :  { %p4373_p6 = por %p4372_p5, %p4371_p4 }
   0xd   :  { %p4374_p7 = pnand %p4373_p6, %p4367_p3 }
   0xf   :  { %4377 = shalt.err (!%p4374_p7)
}
  0x10   :  { %s4405_s15 = smov 128   ;;  %s4406_s16 = smov 8  }
  0x11   :  { %28 = dma.hbm_to_vmem [thread:$0]  %s6732_s1, 2560, %s23_s28, [#allocation3], %s4405_s15, %s4405_s15, %s4406_s16  }
  0x12   :  { %s4407_s19 = smov [#allocation4]   ;;  %s4378_s23 = scalar_lea.hbm %s6734_s3, 16384 }
  0x13   :  { %s36_s20 = sshll.u32 %s4407_s19, 4  ;;  %p4379_p8 = scmp.ne.s32.totalorder %s6734_s3, %s4378_s23  ;;  %s37_s20 = int_to_ptr.vmem [resolvable:$true] %s36_s20 }
  0x14   :  { %p4382_p9 = scmp.lt.u32.totalorder %s4378_s23, %s6734_s3 }
  0x16   :  { %p4384_p10 = pnand %p4382_p9, %p4379_p8 }
  0x18   :  { %4387 = shalt.err (!%p4384_p10)
}
  0x19   :  { %s4388_s29 = scalar_lea.vmem %s37_s20, 16384  ;;  %p4393_p12 = scmp.lt.s32.totalorder %s37_s20, %s37_s20 }
  0x1a   :  { %p4389_p11 = scmp.ne.s32.totalorder %s37_s20, %s4388_s29  ;;  %p4394_p13 = scmp.lt.s32.totalorder %s4388_s29, %s4388_s29 }
  0x1c   :  { %p4395_p0 = por %p4394_p13, %p4393_p12 }
  0x1e   :  { %p4396_p1 = pnand %p4395_p0, %p4389_p11 }
  0x20   :  { %4399 = shalt.err (!%p4396_p1)
}
  0x21   :  { %s4408_s1 = smov 1024   ;;  %s4409_s28 = smov 64  }
  0x22   :  { %42 = dma.hbm_to_vmem [thread:$0]  %s6734_s3, 16384, %s37_s20, [#allocation5], %s4408_s1, %s4408_s1, %s4409_s28  }
  0x23   :  { %4400 = dma.done.wait [#allocation3], 2560  }
  0x24   :  { %4401 = vsyncadd [#allocation3], 4294964736 }
  0x25   :  { %4402 = dma.done.wait [#allocation5], 16384  }
  0x26   :  { %4403 = vsyncadd [#allocation5], 4294950912  ;;  %v4410_v0 = vmov 0.0|0.0   ;;  %v137_v1 = vld [vmem:[#allocation2] sm:$0xff]  ;;  %v138_v2 = vld [vmem:[#allocation2 + $0x8] sm:$0xff]  ;;  %vm157_vm0 = vcmask 261120  }
  0x27   :  { %3006 = vmatprep.subr.bf16.mxu0 %v4410_v0  ;;  %v139_v3 = vld [vmem:[#allocation2 + $0x10] sm:$0xff]  ;;  %v3007_v4 = vpack.c.bf16 %v138_v2, %v137_v1  ;;  %v140_v5 = vld [vmem:[#allocation2 + $0x18] sm:$0xff]  ;;  %v141_v7 = vld [vmem:[#allocation2 + $0x20] sm:$0xff] }
  0x28   :  { %v3010_v6 = vpack.c.bf16 %v140_v5, %v139_v3  ;;  %v142_v8 = vld [vmem:[#allocation2 + $0x28] sm:$0xff]  ;;  %v143_v11 = vld [vmem:[#allocation2 + $0x30] sm:$0xff]  ;;  %v144_v12 = vld [vmem:[#allocation2 + $0x38] sm:$0xff] }
  0x29   :  { %3008 = vmatpush1.bf16.msra.mxu0 %v3007_v4  ;;  %v58_v9 = vld [vmem:[%s6731_s0 + $0x8] sm:$0xff]  ;;  %v3013_v10 = vpack.c.bf16 %v142_v8, %v141_v7  ;;  %v3016_v13 = vpack.c.bf16 %v144_v12, %v143_v11  ;;  %v145_v14 = vld [vmem:[#allocation2 + $0x40] sm:$0xff]  ;;  %v147_v17 = vld [vmem:[#allocation2 + $0x50] sm:$0xff] }
  0x2a   :  { %3009 = vmatprep.subr.bf16.mxu0 %v4410_v0  ;;  %2905 = vmatprep.mubr.msk.f32.mxu0 %vm157_vm0, %v58_v9  ;;  %v146_v15 = vld [vmem:[#allocation2 + $0x48] sm:$0xff]  ;;  %v148_v18 = vld [vmem:[#allocation2 + $0x58] sm:$0xff]  ;;  %v149_v20 = vld [vmem:[#allocation2 + $0x60] sm:$0xff] }
  0x2b   :  { %v3019_v16 = vpack.c.bf16 %v146_v15, %v145_v14  ;;  %v3022_v19 = vpack.c.bf16 %v148_v18, %v147_v17  ;;  %v150_v21 = vld [vmem:[#allocation2 + $0x68] sm:$0xff]  ;;  %v151_v23 = vld [vmem:[#allocation2 + $0x70] sm:$0xff]  ;;  %v152_v24 = vld [vmem:[#allocation2 + $0x78] sm:$0xff] }
  0x2c   :  { %v3025_v22 = vpack.c.bf16 %v150_v21, %v149_v20  ;;  %v3028_v25 = vpack.c.bf16 %v152_v24, %v151_v23  ;;  %v153_v26 = vld [vmem:[#allocation2 + $0x80] sm:$0xff]  ;;  %v154_v27 = vld [vmem:[#allocation2 + $0x88] sm:$0xff]  ;;  %v155_v29 = vld [vmem:[#allocation2 + $0x90] sm:$0xff] }
  0x2d   :  { %3011 = vmatpush1.bf16.msra.mxu0 %v3010_v6  ;;  %v3031_v28 = vpack.c.bf16 %v154_v27, %v153_v26  ;;  %v156_v30 = vld [vmem:[#allocation2 + $0x98] sm:$0xff]  ;;  %v57_v32 = vld [vmem:[%s6731_s0] sm:$0xff]  ;;  %v59_v34 = vld [vmem:[%s6731_s0 + $0x10] sm:$0xff] }
  0x2e   :  { %3012 = vmatprep.subr.bf16.mxu0 %v4410_v0  ;;  %v3034_v31 = vpack.c.bf16 %v156_v30, %v155_v29  ;;  %v60_v33 = vld [vmem:[%s6731_s0 + $0x18] sm:$0xff]  ;;  %v62_v35 = vld [vmem:[%s6731_s0 + $0x28] sm:$0xff]  ;;  %v61_v36 = vld [vmem:[%s6731_s0 + $0x20] sm:$0xff] }
  0x2f   :  { %v64_v37 = vld [vmem:[%s6731_s0 + $0x38] sm:$0xff]  ;;  %v63_v38 = vld [vmem:[%s6731_s0 + $0x30] sm:$0xff]  ;;  %v66_v39 = vld [vmem:[%s6731_s0 + $0x48] sm:$0xff] }
  0x30   :  { %v65_v40 = vld [vmem:[%s6731_s0 + $0x40] sm:$0xff]  ;;  %v68_v41 = vld [vmem:[%s6731_s0 + $0x58] sm:$0xff]  ;;  %v67_v42 = vld [vmem:[%s6731_s0 + $0x50] sm:$0xff] }
  0x31   :  { %3014 = vmatpush1.bf16.msra.mxu0 %v3013_v10  ;;  %v70_v43 = vld [vmem:[%s6731_s0 + $0x68] sm:$0xff]  ;;  %v69_v44 = vld [vmem:[%s6731_s0 + $0x60] sm:$0xff]  ;;  %v72_v45 = vld [vmem:[%s6731_s0 + $0x78] sm:$0xff] }
  0x32   :  { %3015 = vmatprep.subr.bf16.mxu0 %v4410_v0  ;;  %v71_v46 = vld [vmem:[%s6731_s0 + $0x70] sm:$0xff]  ;;  %v74_v47 = vld [vmem:[%s6731_s0 + $0x88] sm:$0xff]  ;;  %v73_v48 = vld [vmem:[%s6731_s0 + $0x80] sm:$0xff] }
  0x33   :  { %v76_v49 = vld [vmem:[%s6731_s0 + $0x98] sm:$0xff]  ;;  %v75_v50 = vld [vmem:[%s6731_s0 + $0x90] sm:$0xff]  ;;  %v78_v51 = vld [vmem:[%s6731_s0 + $0xa8] sm:$0xff] }
  0x34   :  { %v77_v52 = vld [vmem:[%s6731_s0 + $0xa0] sm:$0xff]  ;;  %v80_v53 = vld [vmem:[%s6731_s0 + $0xb8] sm:$0xff]  ;;  %v79_v54 = vld [vmem:[%s6731_s0 + $0xb0] sm:$0xff] }
  0x35   :  { %3017 = vmatpush1.bf16.msra.mxu0 %v3016_v13  ;;  %v82_v55 = vld [vmem:[%s6731_s0 + $0xc8] sm:$0xff]  ;;  %v81_v56 = vld [vmem:[%s6731_s0 + $0xc0] sm:$0xff]  ;;  %v84_v57 = vld [vmem:[%s6731_s0 + $0xd8] sm:$0xff] }
  0x36   :  { %3018 = vmatprep.subr.bf16.mxu0 %v4410_v0  ;;  %v83_v58 = vld [vmem:[%s6731_s0 + $0xd0] sm:$0xff]  ;;  %v86_v59 = vld [vmem:[%s6731_s0 + $0xe8] sm:$0xff]  ;;  %v85_v60 = vld [vmem:[%s6731_s0 + $0xe0] sm:$0xff] }
  0x37   :  { %v88_v61 = vld [vmem:[%s6731_s0 + $0xf8] sm:$0xff]  ;;  %v87_v62 = vld [vmem:[%s6731_s0 + $0xf0] sm:$0xff]  ;;  %v90_v63 = vld [vmem:[%s6731_s0 + $0x108] sm:$0xff] }
  0x38   :  { %v92_v1 = vld [vmem:[%s6731_s0 + $0x118] sm:$0xff]  ;;  %v91_v2 = vld [vmem:[%s6731_s0 + $0x110] sm:$0xff]  ;;  %v94_v3 = vld [vmem:[%s6731_s0 + $0x128] sm:$0xff] }
  0x39   :  { %3020 = vmatpush1.bf16.msra.mxu0 %v3019_v16  ;;  %v93_v4 = vld [vmem:[%s6731_s0 + $0x120] sm:$0xff]  ;;  %v96_v5 = vld [vmem:[%s6731_s0 + $0x138] sm:$0xff]  ;;  %v95_v6 = vld [vmem:[%s6731_s0 + $0x130] sm:$0xff] }
  0x3a   :  { %3021 = vmatprep.subr.bf16.mxu0 %v4410_v0  ;;  %v98_v7 = vld [vmem:[%s6731_s0 + $0x148] sm:$0xff]  ;;  %v97_v8 = vld [vmem:[%s6731_s0 + $0x140] sm:$0xff]  ;;  %v100_v9 = vld [vmem:[%s6731_s0 + $0x158] sm:$0xff] }
  0x3b   :  { %v99_v10 = vld [vmem:[%s6731_s0 + $0x150] sm:$0xff]  ;;  %v102_v11 = vld [vmem:[%s6731_s0 + $0x168] sm:$0xff]  ;;  %v101_v12 = vld [vmem:[%s6731_s0 + $0x160] sm:$0xff] }
  0x3c   :  { %v104_v13 = vld [vmem:[%s6731_s0 + $0x178] sm:$0xff]  ;;  %v103_v14 = vld [vmem:[%s6731_s0 + $0x170] sm:$0xff]  ;;  %v106_v15 = vld [vmem:[%s6731_s0 + $0x188] sm:$0xff] }
  0x3d   :  { %3023 = vmatpush1.bf16.msra.mxu0 %v3022_v19  ;;  %v105_v16 = vld [vmem:[%s6731_s0 + $0x180] sm:$0xff]  ;;  %v108_v17 = vld [vmem:[%s6731_s0 + $0x198] sm:$0xff]  ;;  %v107_v18 = vld [vmem:[%s6731_s0 + $0x190] sm:$0xff] }
  0x3e   :  { %3024 = vmatprep.subr.bf16.mxu0 %v4410_v0  ;;  %v110_v19 = vld [vmem:[%s6731_s0 + $0x1a8] sm:$0xff]  ;;  %v109_v20 = vld [vmem:[%s6731_s0 + $0x1a0] sm:$0xff]  ;;  %v112_v21 = vld [vmem:[%s6731_s0 + $0x1b8] sm:$0xff] }
  0x3f   :  { %v114_v23 = vld [vmem:[%s6731_s0 + $0x1c8] sm:$0xff]  ;;  %v113_v24 = vld [vmem:[%s6731_s0 + $0x1c0] sm:$0xff]  ;;  %v115_v26 = vld [vmem:[%s6731_s0 + $0x1d0] sm:$0xff] }
  0x40   :  { %v118_v27 = vld [vmem:[%s6731_s0 + $0x1e8] sm:$0xff]  ;;  %v120_v29 = vld [vmem:[%s6731_s0 + $0x1f8] sm:$0xff]  ;;  %v119_v30 = vld [vmem:[%s6731_s0 + $0x1f0] sm:$0xff] }
  0x41   :  { %3026 = vmatpush1.bf16.msra.mxu0 %v3025_v22  ;;  %v111_v22 = vld [vmem:[%s6731_s0 + $0x1b0] sm:$0xff] }
  0x42   :  { %3027 = vmatprep.subr.bf16.mxu0 %v4410_v0 }
  0x45   :  { %3029 = vmatpush1.bf16.msra.mxu0 %v3028_v25  ;;  %v116_v25 = vld [vmem:[%s6731_s0 + $0x1d8] sm:$0xff] }
  0x46   :  { %3030 = vmatprep.subr.bf16.mxu0 %v4410_v0 }
  0x49   :  { %3032 = vmatpush1.bf16.msra.mxu0 %v3031_v28  ;;  %v117_v28 = vld [vmem:[%s6731_s0 + $0x1e0] sm:$0xff] }
  0x4a   :  { %3033 = vmatprep.subr.bf16.mxu0 %v4410_v0  ;;  %v89_v0 = vld [vmem:[%s6731_s0 + $0x100] sm:$0xff] }
  0x4d   :  { %3035 = vmatpush1.bf16.msra.mxu0 %v3034_v31  ;;  %v122_v31 = vld [vmem:[%s6731_s0 + $0x208] sm:$0xff] }
  0x50   :  { %343 = vmatmul.mubr.f32.vlgmr.msra.gmra.mrb[0].mxu0 %v57_v32  ;;  %v121_v32 = vld [vmem:[%s6731_s0 + $0x200] sm:$0xff] }
  0x51   :  { %2906 = vmatprep.mubr.msk.f32.mxu0 %vm157_vm0, %v60_v33  ;;  %v124_v33 = vld [vmem:[%s6731_s0 + $0x218] sm:$0xff] }
  0x54   :  { %348 = vmatmul.mubr.f32.gmra.mrb[2].mxu0 %v59_v34  ;;  %v123_v34 = vld [vmem:[%s6731_s0 + $0x210] sm:$0xff] }
  0x55   :  { %2907 = vmatprep.mubr.msk.f32.mxu0 %vm157_vm0, %v62_v35  ;;  %v126_v35 = vld [vmem:[%s6731_s0 + $0x228] sm:$0xff] }
  0x58   :  { %353 = vmatmul.mubr.f32.gmra.mrb[4].mxu0 %v61_v36  ;;  %v125_v36 = vld [vmem:[%s6731_s0 + $0x220] sm:$0xff] }
  0x59   :  { %2908 = vmatprep.mubr.msk.f32.mxu0 %vm157_vm0, %v64_v37  ;;  %v128_v37 = vld [vmem:[%s6731_s0 + $0x238] sm:$0xff] }
  0x5c   :  { %358 = vmatmul.mubr.f32.gmra.mrb[6].mxu0 %v63_v38  ;;  %v127_v38 = vld [vmem:[%s6731_s0 + $0x230] sm:$0xff] }
  0x5d   :  { %2909 = vmatprep.mubr.msk.f32.mxu0 %vm157_vm0, %v66_v39  ;;  %v130_v39 = vld [vmem:[%s6731_s0 + $0x248] sm:$0xff] }
  0x60   :  { %363 = vmatmul.mubr.f32.gmra.mrb[8].mxu0 %v65_v40  ;;  %v129_v40 = vld [vmem:[%s6731_s0 + $0x240] sm:$0xff] }
  0x61   :  { %2910 = vmatprep.mubr.msk.f32.mxu0 %vm157_vm0, %v68_v41  ;;  %v132_v41 = vld [vmem:[%s6731_s0 + $0x258] sm:$0xff] }
  0x64   :  { %368 = vmatmul.mubr.f32.gmra.mrb[10].mxu0 %v67_v42  ;;  %v131_v42 = vld [vmem:[%s6731_s0 + $0x250] sm:$0xff] }
  0x65   :  { %2911 = vmatprep.mubr.msk.f32.mxu0 %vm157_vm0, %v70_v43  ;;  %v134_v43 = vld [vmem:[%s6731_s0 + $0x268] sm:$0xff] }
  0x68   :  { %373 = vmatmul.mubr.f32.gmra.mrb[12].mxu0 %v69_v44  ;;  %v133_v44 = vld [vmem:[%s6731_s0 + $0x260] sm:$0xff] }
  0x69   :  { %2912 = vmatprep.mubr.msk.f32.mxu0 %vm157_vm0, %v72_v45  ;;  %v136_v45 = vld [vmem:[%s6731_s0 + $0x278] sm:$0xff] }
  0x6c   :  { %378 = vmatmul.mubr.f32.gmra.mrb[14].mxu0 %v71_v46  ;;  %v135_v46 = vld [vmem:[%s6731_s0 + $0x270] sm:$0xff] }
  0x6d   :  { %2913 = vmatprep.mubr.msk.f32.mxu0 %vm157_vm0, %v74_v47  ;;  %v591_v47 = vld [vmem:[#allocation4 + $0x8] sm:$0xff] }
  0x70   :  { %383 = vmatmul.mubr.f32.gmra.mrb[16].mxu0 %v73_v48  ;;  %v599_v48 = vld [vmem:[#allocation4 + $0x48] sm:$0xff] }
  0x71   :  { %2914 = vmatprep.mubr.msk.f32.mxu0 %vm157_vm0, %v76_v49  ;;  %v3036_v49 = vpack.c.bf16 %v599_v48, %v591_v47  ;;  %v671_v47 = vld [vmem:[#allocation4 + $0x288] sm:$0xff] }
  0x72   :  { %v679_v48 = vld [vmem:[#allocation4 + $0x2c8] sm:$0xff] }
  0x73   :  { %3037 = vmatprep.subr.bf16.mxu1 %v3036_v49 }
  0x74   :  { %388 = vmatmul.mubr.f32.gmra.mrb[18].mxu0 %v75_v50  ;;  %v590_v50 = vld [vmem:[#allocation4] sm:$0xff] }
  0x75   :  { %2915 = vmatprep.mubr.msk.f32.mxu0 %vm157_vm0, %v78_v51  ;;  %v598_v51 = vld [vmem:[#allocation4 + $0x40] sm:$0xff] }
  0x78   :  { %393 = vmatmul.mubr.f32.gmra.mrb[20].mxu0 %v77_v52  ;;  %v3038_v52 = vpack.c.bf16 %v598_v51, %v590_v50  ;;  %v3056_v50 = vpack.c.bf16 %v679_v48, %v671_v47  ;;  %v670_v51 = vld [vmem:[#allocation4 + $0x280] sm:$0xff]  ;;  %v1303_v48 = vld [vmem:[%s6736_s5 + $0x410] sm:$0xff] }
  0x79   :  { %2916 = vmatprep.mubr.msk.f32.mxu0 %vm157_vm0, %v80_v53  ;;  %v1176_v53 = vld [vmem:[%s6736_s5 + $0x18] sm:$0xff] }
  0x7a   :  { %3039 = vmatpush1.bf16.msra.mxu1 %v3038_v52  ;;  %v678_v52 = vld [vmem:[#allocation4 + $0x2c0] sm:$0xff] }
  0x7c   :  { %398 = vmatmul.mubr.f32.gmra.mrb[22].mxu0 %v79_v54  ;;  %v1184_v54 = vld [vmem:[%s6736_s5 + $0x58] sm:$0xff] }
  0x7d   :  { %2917 = vmatprep.mubr.msk.f32.mxu0 %vm157_vm0, %v82_v55  ;;  %v4767_v55 = vpack.c.bf16 %v1184_v54, %v1176_v53  ;;  %v3058_v54 = vpack.c.bf16 %v678_v52, %v670_v51 }
  0x7f   :  { %6966 = vst [vmem:[#allocation8_spill] sm:$0xff] %v4767_v55  ;;  %3229 = vmatprep.subr.bf16.mxu0 %v4767_v55 }
  0x80   :  { %403 = vmatmul.mubr.f32.gmra.mrb[24].mxu0 %v81_v56  ;;  %v1175_v56 = vld [vmem:[%s6736_s5 + $0x10] sm:$0xff] }
  0x81   :  { %2918 = vmatprep.mubr.msk.f32.mxu0 %vm157_vm0, %v84_v57  ;;  %v1183_v57 = vld [vmem:[%s6736_s5 + $0x50] sm:$0xff] }
  0x84   :  { %408 = vmatmul.mubr.f32.gmra.mrb[26].mxu0 %v83_v58  ;;  %v4775_v58 = vpack.c.bf16 %v1183_v57, %v1175_v56  ;;  %v1256_v56 = vld [vmem:[%s6736_s5 + $0x298] sm:$0xff] }
  0x85   :  { %2919 = vmatprep.mubr.msk.f32.mxu0 %vm157_vm0, %v86_v59  ;;  %v607_v59 = vld [vmem:[#allocation4 + $0x88] sm:$0xff]  ;;  %v1264_v57 = vld [vmem:[%s6736_s5 + $0x2d8] sm:$0xff] }
  0x86   :  { %6967 = vst [vmem:[#allocation9_spill] sm:$0xff] %v4775_v58  ;;  %3231 = vmatpush1.bf16.msra.mxu0 %v4775_v58 }
  0x88   :  { %413 = vmatmul.mubr.f32.gmra.mrb[28].mxu0 %v85_v60  ;;  %v615_v60 = vld [vmem:[#allocation4 + $0xc8] sm:$0xff] }
  0x89   :  { %2920 = vmatprep.mubr.msk.f32.mxu0 %vm157_vm0, %v88_v61  ;;  %v3040_v61 = vpack.c.bf16 %v615_v60, %v607_v59  ;;  %v4863_v59 = vpack.c.bf16 %v1264_v57, %v1256_v56  ;;  %v1255_v60 = vld [vmem:[%s6736_s5 + $0x290] sm:$0xff]  ;;  %v1320_v56 = vld [vmem:[%s6736_s5 + $0x498] sm:$0xff] }
  0x8a   :  { %v1328_v57 = vld [vmem:[%s6736_s5 + $0x4d8] sm:$0xff] }
  0x8b   :  { %3041 = vmatprep.subr.bf16.mxu1 %v3040_v61  ;;  %6976 = vst [vmem:[#allocation18_spill] sm:$0xff] %v4863_v59  ;;  %v1263_v61 = vld [vmem:[%s6736_s5 + $0x2d0] sm:$0xff] }
  0x8c   :  { %418 = vmatmul.mubr.f32.gmra.mrb[30].mxu0 %v87_v62  ;;  %v606_v62 = vld [vmem:[#allocation4 + $0x80] sm:$0xff] }
  0x8d   :  { %2921 = vmatprep.mubr.msk.f32.mxu0 %vm157_vm0, %v90_v63  ;;  %v614_v63 = vld [vmem:[#allocation4 + $0xc0] sm:$0xff] }
  0x90   :  { %423 = vmatmul.mubr.f32.gmra.mrb[32].mxu0 %v89_v0  ;;  %v3042_v0 = vpack.c.bf16 %v614_v63, %v606_v62  ;;  %v4871_v62 = vpack.c.bf16 %v1263_v61, %v1255_v60  ;;  %v687_v63 = vld [vmem:[#allocation4 + $0x308] sm:$0xff]  ;;  %v4951_v60 = vpack.c.bf16 %v1328_v57, %v1320_v56  ;;  %v1319_v61 = vld [vmem:[%s6736_s5 + $0x490] sm:$0xff] }
  0x91   :  { %2922 = vmatprep.mubr.msk.f32.mxu0 %vm157_vm0, %v92_v1  ;;  %v1192_v1 = vld [vmem:[%s6736_s5 + $0x98] sm:$0xff]  ;;  %v1383_v57 = vld [vmem:[%s6736_s5 + $0x690] sm:$0xff] }
  0x92   :  { %3043 = vmatpush1.bf16.msra.mxu1 %v3042_v0  ;;  %6977 = vst [vmem:[#allocation19_spill] sm:$0xff] %v4871_v62  ;;  %v695_v0 = vld [vmem:[#allocation4 + $0x348] sm:$0xff]  ;;  %6984 = vst [vmem:[#allocation26_spill] sm:$0xff] %v4951_v60 }
  0x94   :  { %428 = vmatmul.mubr.f32.gmra.mrb[34].mxu0 %v91_v2  ;;  %v1200_v2 = vld [vmem:[%s6736_s5 + $0xd8] sm:$0xff] }
  0x95   :  { %2923 = vmatprep.mubr.msk.f32.mxu0 %vm157_vm0, %v94_v3  ;;  %v4785_v3 = vpack.c.bf16 %v1200_v2, %v1192_v1  ;;  %v3060_v2 = vpack.c.bf16 %v695_v0, %v687_v63  ;;  %v1327_v63 = vld [vmem:[%s6736_s5 + $0x4d0] sm:$0xff] }
  0x97   :  { %6968 = vst [vmem:[#allocation10_spill] sm:$0xff] %v4785_v3  ;;  %3233 = vmatprep.subr.bf16.mxu0 %v4785_v3 }
  0x98   :  { %433 = vmatmul.mubr.f32.gmra.mrb[36].mxu0 %v93_v4  ;;  %v1191_v4 = vld [vmem:[%s6736_s5 + $0x90] sm:$0xff] }
  0x99   :  { %2924 = vmatprep.mubr.msk.f32.mxu0 %vm157_vm0, %v96_v5  ;;  %v1199_v5 = vld [vmem:[%s6736_s5 + $0xd0] sm:$0xff] }
  0x9c   :  { %438 = vmatmul.mubr.f32.gmra.mrb[38].mxu0 %v95_v6  ;;  %v4793_v6 = vpack.c.bf16 %v1199_v5, %v1191_v4  ;;  %v686_v4 = vld [vmem:[#allocation4 + $0x300] sm:$0xff] }
  0x9d   :  { %2925 = vmatprep.mubr.msk.f32.mxu0 %vm157_vm0, %v98_v7  ;;  %v623_v7 = vld [vmem:[#allocation4 + $0x108] sm:$0xff]  ;;  %v694_v5 = vld [vmem:[#allocation4 + $0x340] sm:$0xff] }
  0x9e   :  { %6969 = vst [vmem:[#allocation11_spill] sm:$0xff] %v4793_v6  ;;  %3235 = vmatpush1.bf16.msra.mxu0 %v4793_v6 }
  0xa0   :  { %443 = vmatmul.mubr.f32.gmra.mrb[40].mxu0 %v97_v8  ;;  %v631_v8 = vld [vmem:[#allocation4 + $0x148] sm:$0xff] }
  0xa1   :  { %2926 = vmatprep.mubr.msk.f32.mxu0 %vm157_vm0, %v100_v9  ;;  %v3044_v9 = vpack.c.bf16 %v631_v8, %v623_v7  ;;  %v3062_v8 = vpack.c.bf16 %v694_v5, %v686_v4 }
  0xa3   :  { %3045 = vmatprep.subr.bf16.mxu1 %v3044_v9  ;;  %v1272_v9 = vld [vmem:[%s6736_s5 + $0x318] sm:$0xff] }
  0xa4   :  { %448 = vmatmul.mubr.f32.gmra.mrb[42].mxu0 %v99_v10  ;;  %v622_v10 = vld [vmem:[#allocation4 + $0x100] sm:$0xff] }
  0xa5   :  { %2927 = vmatprep.mubr.msk.f32.mxu0 %vm157_vm0, %v102_v11  ;;  %v630_v11 = vld [vmem:[#allocation4 + $0x140] sm:$0xff] }
  0xa8   :  { %453 = vmatmul.mubr.f32.gmra.mrb[44].mxu0 %v101_v12  ;;  %v3046_v12 = vpack.c.bf16 %v630_v11, %v622_v10  ;;  %v1280_v10 = vld [vmem:[%s6736_s5 + $0x358] sm:$0xff] }
  0xa9   :  { %2928 = vmatprep.mubr.msk.f32.mxu0 %vm157_vm0, %v104_v13  ;;  %v1208_v13 = vld [vmem:[%s6736_s5 + $0x118] sm:$0xff]  ;;  %v4883_v11 = vpack.c.bf16 %v1280_v10, %v1272_v9  ;;  %v1335_v10 = vld [vmem:[%s6736_s5 + $0x510] sm:$0xff] }
  0xaa   :  { %3047 = vmatpush1.bf16.msra.mxu1 %v3046_v12  ;;  %v1271_v12 = vld [vmem:[%s6736_s5 + $0x310] sm:$0xff] }
  0xab   :  { %6978 = vst [vmem:[#allocation20_spill] sm:$0xff] %v4883_v11 }
  0xac   :  { %458 = vmatmul.mubr.f32.gmra.mrb[46].mxu0 %v103_v14  ;;  %v1216_v14 = vld [vmem:[%s6736_s5 + $0x158] sm:$0xff] }
  0xad   :  { %2929 = vmatprep.mubr.msk.f32.mxu0 %vm157_vm0, %v106_v15  ;;  %v4803_v15 = vpack.c.bf16 %v1216_v14, %v1208_v13  ;;  %v1279_v13 = vld [vmem:[%s6736_s5 + $0x350] sm:$0xff] }
  0xae   :  { %v4891_v14 = vpack.c.bf16 %v1279_v13, %v1271_v12  ;;  %v1343_v12 = vld [vmem:[%s6736_s5 + $0x550] sm:$0xff] }
  0xaf   :  { %6970 = vst [vmem:[#allocation12_spill] sm:$0xff] %v4803_v15  ;;  %3237 = vmatprep.subr.bf16.mxu0 %v4803_v15 }
  0xb0   :  { %463 = vmatmul.mubr.f32.gmra.mrb[48].mxu0 %v105_v16  ;;  %v1207_v16 = vld [vmem:[%s6736_s5 + $0x110] sm:$0xff]  ;;  %6979 = vst [vmem:[#allocation21_spill] sm:$0xff] %v4891_v14 }
  0xb1   :  { %2930 = vmatprep.mubr.msk.f32.mxu0 %vm157_vm0, %v108_v17  ;;  %v1215_v17 = vld [vmem:[%s6736_s5 + $0x150] sm:$0xff] }
  0xb4   :  { %468 = vmatmul.mubr.f32.gmra.mrb[50].mxu0 %v107_v18  ;;  %v4811_v18 = vpack.c.bf16 %v1215_v17, %v1207_v16  ;;  %v703_v16 = vld [vmem:[#allocation4 + $0x388] sm:$0xff] }
  0xb5   :  { %2931 = vmatprep.mubr.msk.f32.mxu0 %vm157_vm0, %v110_v19  ;;  %v639_v19 = vld [vmem:[#allocation4 + $0x188] sm:$0xff] }
  0xb6   :  { %6971 = vst [vmem:[#allocation13_spill] sm:$0xff] %v4811_v18  ;;  %3239 = vmatpush1.bf16.msra.mxu0 %v4811_v18  ;;  %v711_v17 = vld [vmem:[#allocation4 + $0x3c8] sm:$0xff] }
  0xb8   :  { %473 = vmatmul.mubr.f32.gmra.mrb[52].mxu0 %v109_v20  ;;  %v647_v20 = vld [vmem:[#allocation4 + $0x1c8] sm:$0xff] }
  0xb9   :  { %2932 = vmatprep.mubr.msk.f32.mxu0 %vm157_vm0, %v112_v21 }
  0xbc   :  { %478 = vmatmul.mubr.f32.gmra.mrb[54].mxu0 %v111_v22  ;;  %v3048_v22 = vpack.c.bf16 %v647_v20, %v639_v19  ;;  %v3064_v20 = vpack.c.bf16 %v711_v17, %v703_v16  ;;  %v4981_v16 = vpack.c.bf16 %v1343_v12, %v1335_v10  ;;  %v1408_v10 = vld [vmem:[%s6736_s5 + $0x758] sm:$0xff] }
  0xbd   :  { %2933 = vmatprep.mubr.msk.f32.mxu0 %vm157_vm0, %v114_v23  ;;  %v638_v23 = vld [vmem:[#allocation4 + $0x180] sm:$0xff] }
  0xbe   :  { %3049 = vmatprep.subr.bf16.mxu1 %v3048_v22  ;;  %v702_v22 = vld [vmem:[#allocation4 + $0x380] sm:$0xff]  ;;  %6987 = vst [vmem:[#allocation29_spill] sm:$0xff] %v4981_v16 }
  0xc0   :  { %483 = vmatmul.mubr.f32.gmra.mrb[56].mxu0 %v113_v24  ;;  %v646_v24 = vld [vmem:[#allocation4 + $0x1c0] sm:$0xff] }
  0xc1   :  { %2934 = vmatprep.mubr.msk.f32.mxu0 %vm157_vm0, %v116_v25 }
  0xc4   :  { %488 = vmatmul.mubr.f32.gmra.mrb[58].mxu0 %v115_v26  ;;  %v3050_v26 = vpack.c.bf16 %v646_v24, %v638_v23  ;;  %v710_v23 = vld [vmem:[#allocation4 + $0x3c0] sm:$0xff] }
  0xc5   :  { %2935 = vmatprep.mubr.msk.f32.mxu0 %vm157_vm0, %v118_v27  ;;  %v1224_v27 = vld [vmem:[%s6736_s5 + $0x198] sm:$0xff] }
  0xc6   :  { %3051 = vmatpush1.bf16.msra.mxu1 %v3050_v26  ;;  %v3066_v26 = vpack.c.bf16 %v710_v23, %v702_v22  ;;  %v1360_v22 = vld [vmem:[%s6736_s5 + $0x5d8] sm:$0xff] }
  0xc8   :  { %493 = vmatmul.mubr.f32.gmra.mrb[60].mxu0 %v117_v28  ;;  %v1232_v28 = vld [vmem:[%s6736_s5 + $0x1d8] sm:$0xff] }
  0xc9   :  { %2936 = vmatprep.mubr.msk.f32.mxu0 %vm157_vm0, %v120_v29  ;;  %v4823_v29 = vpack.c.bf16 %v1232_v28, %v1224_v27  ;;  %v1288_v27 = vld [vmem:[%s6736_s5 + $0x398] sm:$0xff] }
  0xca   :  { %v1296_v28 = vld [vmem:[%s6736_s5 + $0x3d8] sm:$0xff] }
  0xcb   :  { %6972 = vst [vmem:[#allocation14_spill] sm:$0xff] %v4823_v29  ;;  %3241 = vmatprep.subr.bf16.mxu0 %v4823_v29 }
  0xcc   :  { %498 = vmatmul.mubr.f32.gmra.mrb[62].mxu0 %v119_v30  ;;  %v1223_v30 = vld [vmem:[%s6736_s5 + $0x190] sm:$0xff] }
  0xcd   :  { %2937 = vmatprep.mubr.msk.f32.mxu0 %vm157_vm0, %v122_v31  ;;  %v1231_v31 = vld [vmem:[%s6736_s5 + $0x1d0] sm:$0xff] }
  0xd0   :  { %503 = vmatmul.mubr.f32.gmra.mrb[64].mxu0 %v121_v32  ;;  %v4831_v32 = vpack.c.bf16 %v1231_v31, %v1223_v30  ;;  %v4905_v30 = vpack.c.bf16 %v1296_v28, %v1288_v27  ;;  %v1287_v31 = vld [vmem:[%s6736_s5 + $0x390] sm:$0xff] }
  0xd1   :  { %2938 = vmatprep.mubr.msk.f32.mxu0 %vm157_vm0, %v124_v33  ;;  %v655_v33 = vld [vmem:[#allocation4 + $0x208] sm:$0xff] }
  0xd2   :  { %6973 = vst [vmem:[#allocation15_spill] sm:$0xff] %v4831_v32  ;;  %3243 = vmatpush1.bf16.msra.mxu0 %v4831_v32  ;;  %6980 = vst [vmem:[#allocation22_spill] sm:$0xff] %v4905_v30 }
  0xd4   :  { %508 = vmatmul.mubr.f32.gmra.mrb[66].mxu0 %v123_v34  ;;  %v663_v34 = vld [vmem:[#allocation4 + $0x248] sm:$0xff] }
  0xd5   :  { %2939 = vmatprep.mubr.msk.f32.mxu0 %vm157_vm0, %v126_v35 }
  0xd8   :  { %513 = vmatmul.mubr.f32.gmra.mrb[68].mxu0 %v125_v36  ;;  %v3052_v36 = vpack.c.bf16 %v663_v34, %v655_v33  ;;  %v1295_v33 = vld [vmem:[%s6736_s5 + $0x3d0] sm:$0xff] }
  0xd9   :  { %2940 = vmatprep.mubr.msk.f32.mxu0 %vm157_vm0, %v128_v37  ;;  %v654_v37 = vld [vmem:[#allocation4 + $0x200] sm:$0xff]  ;;  %v4913_v34 = vpack.c.bf16 %v1295_v33, %v1287_v31  ;;  %v1368_v33 = vld [vmem:[%s6736_s5 + $0x618] sm:$0xff] }
  0xda   :  { %3053 = vmatprep.subr.bf16.mxu1 %v3052_v36  ;;  %v593_v36 = vld [vmem:[#allocation4 + $0x18] sm:$0xff] }
  0xdb   :  { %6981 = vst [vmem:[#allocation23_spill] sm:$0xff] %v4913_v34 }
  0xdc   :  { %518 = vmatmul.mubr.f32.gmra.mrb[70].mxu0 %v127_v38  ;;  %v662_v38 = vld [vmem:[#allocation4 + $0x240] sm:$0xff] }
  0xdd   :  { %2941 = vmatprep.mubr.msk.f32.mxu0 %vm157_vm0, %v130_v39 }
  0xe0   :  { %523 = vmatmul.mubr.f32.gmra.mrb[72].mxu0 %v129_v40  ;;  %v3054_v40 = vpack.c.bf16 %v662_v38, %v654_v37  ;;  %v601_v37 = vld [vmem:[#allocation4 + $0x58] sm:$0xff] }
  0xe1   :  { %2942 = vmatprep.mubr.msk.f32.mxu0 %vm157_vm0, %v132_v41  ;;  %v1240_v41 = vld [vmem:[%s6736_s5 + $0x218] sm:$0xff] }
  0xe2   :  { %3055 = vmatpush1.bf16.msra.mxu1 %v3054_v40 }
  0xe3   :  { %3057 = vmatprep.subr.bf16.mxu1 %v3056_v50  ;;  %v1311_v50 = vld [vmem:[%s6736_s5 + $0x450] sm:$0xff] }
  0xe4   :  { %528 = vmatmul.mubr.f32.gmra.mrb[74].mxu0 %v131_v42  ;;  %v1248_v42 = vld [vmem:[%s6736_s5 + $0x258] sm:$0xff]  ;;  %v4939_v52 = vpack.c.bf16 %v1311_v50, %v1303_v48 }
  0xe5   :  { %2943 = vmatprep.mubr.msk.f32.mxu0 %vm157_vm0, %v134_v43  ;;  %v4843_v43 = vpack.c.bf16 %v1248_v42, %v1240_v41  ;;  %v6740_v42 = vmov 0.0   ;;  %v1384_v50 = vld [vmem:[%s6736_s5 + $0x698] sm:$0xff] }
  0xe6   :  { %3059 = vmatpush1.bf16.msra.mxu1 %v3058_v54  ;;  %824 = vmatprep.mubr.f32.mxu1 %v6740_v42  ;;  %6983 = vst [vmem:[#allocation25_spill] sm:$0xff] %v4939_v52 }
  0xe7   :  { %6974 = vst [vmem:[#allocation16_spill] sm:$0xff] %v4843_v43  ;;  %3245 = vmatprep.subr.bf16.mxu0 %v4843_v43  ;;  %3061 = vmatprep.subr.bf16.mxu1 %v3060_v2  ;;  %v4961_v2 = vpack.c.bf16 %v1327_v63, %v1319_v61  ;;  %v1391_v61 = vld [vmem:[%s6736_s5 + $0x6d0] sm:$0xff] }
  0xe8   :  { %533 = vmatmul.mubr.f32.gmra.mrb[76].mxu0 %v133_v44  ;;  %v1239_v44 = vld [vmem:[%s6736_s5 + $0x210] sm:$0xff] }
  0xe9   :  { %2944 = vmatprep.mubr.msk.f32.mxu0 %vm157_vm0, %v136_v45  ;;  %v1247_v45 = vld [vmem:[%s6736_s5 + $0x250] sm:$0xff]  ;;  %6985 = vst [vmem:[#allocation27_spill] sm:$0xff] %v4961_v2 }
  0xea   :  { %3063 = vmatpush1.bf16.msra.mxu1 %v3062_v8  ;;  %v1344_v8 = vld [vmem:[%s6736_s5 + $0x558] sm:$0xff] }
  0xeb   :  { %3065 = vmatprep.subr.bf16.mxu1 %v3064_v20  ;;  %v1352_v20 = vld [vmem:[%s6736_s5 + $0x598] sm:$0xff] }
  0xec   :  { %538 = vmatmul.mubr.f32.gmra.mrb[78].mxu0 %v135_v46  ;;  %v4851_v46 = vpack.c.bf16 %v1247_v45, %v1239_v44  ;;  %v1304_v44 = vld [vmem:[%s6736_s5 + $0x418] sm:$0xff]  ;;  %v4991_v23 = vpack.c.bf16 %v1360_v22, %v1352_v20  ;;  %v1407_v20 = vld [vmem:[%s6736_s5 + $0x750] sm:$0xff] }
  0xed   :  { %v1312_v45 = vld [vmem:[%s6736_s5 + $0x458] sm:$0xff]  ;;  %1564 = vmatprep.mubr.f32.mxu0 %v6740_v42 }
  0xee   :  { %6975 = vst [vmem:[#allocation17_spill] sm:$0xff] %v4851_v46  ;;  %3247 = vmatpush1.bf16.msra.mxu0 %v4851_v46  ;;  %3067 = vmatpush1.bf16.msra.mxu1 %v3066_v26  ;;  %v4928_v47 = vpack.c.bf16 %v1312_v45, %v1304_v44  ;;  %6988 = vst [vmem:[#allocation30_spill] sm:$0xff] %v4991_v23  ;;  %v1359_v26 = vld [vmem:[%s6736_s5 + $0x5d0] sm:$0xff] }
  0xef   :  { %3249 = vmatprep.subr.bf16.mxu0 %v4863_v59 }
  0xf0   :  { %6982 = vst [vmem:[#allocation24_spill] sm:$0xff] %v4928_v47 }
  0xf2   :  { %3251 = vmatpush1.bf16.msra.mxu0 %v4871_v62 }
  0xf3   :  { %3253 = vmatprep.subr.bf16.mxu0 %v4883_v11 }
  0xf6   :  { %3255 = vmatpush1.bf16.msra.mxu0 %v4891_v14 }
  0xf7   :  { %3257 = vmatprep.subr.bf16.mxu0 %v4905_v30 }
  0xfa   :  { %3259 = vmatpush1.bf16.msra.mxu0 %v4913_v34 }
  0xfb   :  { %3261 = vmatprep.subr.bf16.mxu0 %v4928_v47 }
  0xfe   :  { %3263 = vmatpush1.bf16.msra.mxu0 %v4939_v52 }
  0xff   :  { %3265 = vmatprep.subr.bf16.mxu0 %v4951_v60 }
 0x102   :  { %3267 = vmatpush1.bf16.msra.mxu0 %v4961_v2 }
 0x123   :  { %v4813_v21 = vpop.f32.mrb[0].mxu0 }
 0x124   :  { %v346_v25 = vpop.f32.mrb[1].mxu0 }
 0x127   :  { %v4833_v35 = vpop.f32.mrb[2].mxu0 }
 0x128   :  { %v351_v39 = vpop.f32.mrb[3].mxu0 }
 0x129   :  { %v3068_v39 = vpack.c.bf16 %v601_v37, %v593_v36  ;;  %v1376_v36 = vld [vmem:[%s6736_s5 + $0x658] sm:$0xff] }
 0x12a   :  { %v5009_v37 = vpack.c.bf16 %v1376_v36, %v1368_v33  ;;  %v1416_v33 = vld [vmem:[%s6736_s5 + $0x798] sm:$0xff] }
 0x12b   :  { %v4853_v49 = vpop.f32.mrb[4].mxu0  ;;  %3069 = vmatprep.subr.bf16.mxu1 %v3068_v39  ;;  %v1367_v39 = vld [vmem:[%s6736_s5 + $0x610] sm:$0xff]  ;;  %v1424_v36 = vld [vmem:[%s6736_s5 + $0x7d8] sm:$0xff] }
 0x12c   :  { %v356_v53 = vpop.f32.mrb[5].mxu0  ;;  %6990 = vst [vmem:[#allocation32_spill] sm:$0xff] %v5009_v37 }
 0x12f   :  { %v4873_v1 = vpop.f32.mrb[6].mxu0 }
 0x130   :  { %v361_v7 = vpop.f32.mrb[7].mxu0 }
 0x131   :  { %v1336_v7 = vld [vmem:[%s6736_s5 + $0x518] sm:$0xff] }
 0x132   :  { %v4973_v9 = vpack.c.bf16 %v1344_v8, %v1336_v7  ;;  %v1400_v8 = vld [vmem:[%s6736_s5 + $0x718] sm:$0xff] }
 0x133   :  { %v4893_v19 = vpop.f32.mrb[8].mxu0  ;;  %v5045_v12 = vpack.c.bf16 %v1408_v10, %v1400_v8  ;;  %v1187_v8 = vld [vmem:[%s6736_s5 + $0x70] sm:$0xff] }
 0x134   :  { %v543_v24 = vmax.f32 %v4813_v21, %v4893_v19  ;;  %v366_v25 = vpop.f32.mrb[9].mxu0  ;;  %6986 = vst [vmem:[#allocation28_spill] sm:$0xff] %v4973_v9  ;;  %3269 = vmatprep.subr.bf16.mxu0 %v4973_v9  ;;  %v1180_v21 = vld [vmem:[%s6736_s5 + $0x38] sm:$0xff] }
 0x135   :  { %3271 = vmatpush1.bf16.msra.mxu0 %v4981_v16  ;;  %v1351_v25 = vld [vmem:[%s6736_s5 + $0x590] sm:$0xff]  ;;  %6994 = vst [vmem:[#allocation36_spill] sm:$0xff] %v5045_v12  ;;  %v1188_v19 = vld [vmem:[%s6736_s5 + $0x78] sm:$0xff] }
 0x136   :  { %v4999_v28 = vpack.c.bf16 %v1359_v26, %v1351_v25  ;;  %3273 = vmatprep.subr.bf16.mxu0 %v4991_v23 }
 0x137   :  { %v4915_v38 = vpop.f32.mrb[10].mxu0 }
 0x138   :  { %v544_v40 = vmax.f32 %v4833_v35, %v4915_v38  ;;  %v371_v41 = vpop.f32.mrb[11].mxu0  ;;  %6989 = vst [vmem:[#allocation31_spill] sm:$0xff] %v4999_v28  ;;  %v1196_v35 = vld [vmem:[%s6736_s5 + $0xb8] sm:$0xff] }
 0x139   :  { %3275 = vmatpush1.bf16.msra.mxu0 %v4999_v28  ;;  %v1375_v41 = vld [vmem:[%s6736_s5 + $0x650] sm:$0xff]  ;;  %v1204_v38 = vld [vmem:[%s6736_s5 + $0xf8] sm:$0xff] }
 0x13a   :  { %v5017_v45 = vpack.c.bf16 %v1375_v41, %v1367_v39  ;;  %3277 = vmatprep.subr.bf16.mxu0 %v5009_v37  ;;  %v5068_v41 = vpack.c.bf16 %v1424_v36, %v1416_v33 }
 0x13b   :  { %v4937_v51 = vpop.f32.mrb[12].mxu0 }
 0x13c   :  { %v545_v53 = vmax.f32 %v4853_v49, %v4937_v51  ;;  %v376_v54 = vpop.f32.mrb[13].mxu0  ;;  %6991 = vst [vmem:[#allocation33_spill] sm:$0xff] %v5017_v45  ;;  %6996 = vst [vmem:[#allocation38_spill] sm:$0xff] %v5068_v41  ;;  %v1212_v49 = vld [vmem:[%s6736_s5 + $0x138] sm:$0xff] }
 0x13d   :  { %3279 = vmatpush1.bf16.msra.mxu0 %v5017_v45  ;;  %v1392_v54 = vld [vmem:[%s6736_s5 + $0x6d8] sm:$0xff] }
 0x13e   :  { %v5027_v56 = vpack.c.bf16 %v1392_v54, %v1384_v50  ;;  %v1220_v51 = vld [vmem:[%s6736_s5 + $0x178] sm:$0xff] }
 0x13f   :  { %v4959_v0 = vpop.f32.mrb[14].mxu0 }
 0x140   :  { %v546_v4 = vmax.f32 %v4873_v1, %v4959_v0  ;;  %v381_v5 = vpop.f32.mrb[15].mxu0  ;;  %6992 = vst [vmem:[#allocation34_spill] sm:$0xff] %v5027_v56  ;;  %3281 = vmatprep.subr.bf16.mxu0 %v5027_v56  ;;  %v1228_v1 = vld [vmem:[%s6736_s5 + $0x1b8] sm:$0xff] }
 0x141   :  { %v5035_v5 = vpack.c.bf16 %v1391_v61, %v1383_v57  ;;  %v1236_v0 = vld [vmem:[%s6736_s5 + $0x1f8] sm:$0xff] }
 0x143   :  { %v384_v13 = vpop.f32.mrb[16].mxu0  ;;  %6993 = vst [vmem:[#allocation35_spill] sm:$0xff] %v5035_v5  ;;  %3283 = vmatpush1.bf16.msra.mxu0 %v5035_v5 }
 0x144   :  { %v386_v17 = vpop.f32.mrb[17].mxu0  ;;  %3285 = vmatprep.subr.bf16.mxu0 %v5045_v12 }
 0x145   :  { %v1399_v17 = vld [vmem:[%s6736_s5 + $0x710] sm:$0xff] }
 0x146   :  { %v5053_v25 = vpack.c.bf16 %v1407_v20, %v1399_v17 }
 0x147   :  { %v389_v27 = vpop.f32.mrb[18].mxu0 }
 0x148   :  { %v391_v31 = vpop.f32.mrb[19].mxu0  ;;  %6995 = vst [vmem:[#allocation37_spill] sm:$0xff] %v5053_v25  ;;  %3287 = vmatpush1.bf16.msra.mxu0 %v5053_v25 }
 0x149   :  { %3289 = vmatprep.subr.bf16.mxu0 %v5068_v41 }
 0x14b   :  { %v394_v44 = vpop.f32.mrb[20].mxu0 }
 0x14c   :  { %v396_v48 = vpop.f32.mrb[21].mxu0 }
 0x14d   :  { %v1423_v48 = vld [vmem:[%s6736_s5 + $0x7d0] sm:$0xff] }
 0x14f   :  { %v399_v63 = vpop.f32.mrb[22].mxu0 }
 0x150   :  { %v401_v7 = vpop.f32.mrb[23].mxu0 }
 0x151   :  { %v5091_v7 = vpack.c.bf16 %v1188_v19, %v1180_v21 }
 0x153   :  { %v404_v22 = vpop.f32.mrb[24].mxu0  ;;  %6998 = vst [vmem:[#allocation40_spill] sm:$0xff] %v5091_v7 }
 0x154   :  { %v547_v26 = vmax.f32 %v384_v13, %v404_v22  ;;  %v406_v31 = vpop.f32.mrb[25].mxu0  ;;  %v1415_v13 = vld [vmem:[%s6736_s5 + $0x790] sm:$0xff] }
 0x155   :  { %v5076_v54 = vpack.c.bf16 %v1423_v48, %v1415_v13  ;;  %v1203_v31 = vld [vmem:[%s6736_s5 + $0xf0] sm:$0xff] }
 0x156   :  { %v5066_v39 = vmax.f32 %v543_v24, %v547_v26  ;;  %v1195_v26 = vld [vmem:[%s6736_s5 + $0xb0] sm:$0xff] }
 0x157   :  { %v409_v50 = vpop.f32.mrb[26].mxu0  ;;  %6997 = vst [vmem:[#allocation39_spill] sm:$0xff] %v5076_v54  ;;  %3291 = vmatpush1.bf16.msra.mxu0 %v5076_v54  ;;  %v5124_v36 = vpack.c.bf16 %v1203_v31, %v1195_v26  ;;  %v1243_v31 = vld [vmem:[%s6736_s5 + $0x230] sm:$0xff] }
 0x158   :  { %v548_v57 = vmax.f32 %v389_v27, %v409_v50  ;;  %v411_v61 = vpop.f32.mrb[27].mxu0  ;;  %v1179_v27 = vld [vmem:[%s6736_s5 + $0x30] sm:$0xff]  ;;  %3357 = vmatprep.subr.bf16.mxu0 %v5091_v7  ;;  %v5139_v50 = vpack.c.bf16 %v1220_v51, %v1212_v49  ;;  %v1260_v51 = vld [vmem:[%s6736_s5 + $0x2b8] sm:$0xff] }
 0x159   :  { %v5099_v17 = vpack.c.bf16 %v1187_v8, %v1179_v27  ;;  %v1227_v27 = vld [vmem:[%s6736_s5 + $0x1b0] sm:$0xff] }
 0x15a   :  { %v5089_v24 = vmax.f32 %v544_v40, %v548_v57  ;;  %1565 = vmatmul.mubr.f32.vlgmr.msra.gmra.mrb[80].mxu0 %v6740_v42  ;;  %6999 = vst [vmem:[#allocation41_spill] sm:$0xff] %v5139_v50  ;;  %v1219_v57 = vld [vmem:[%s6736_s5 + $0x170] sm:$0xff] }
 0x15b   :  { %v414_v10 = vpop.f32.mrb[28].mxu0  ;;  %3359 = vmatpush1.bf16.msra.mxu0 %v5099_v17  ;;  %1706 = vmatprep.mubr.f32.mxu0 %v6740_v42  ;;  %v1235_v8 = vld [vmem:[%s6736_s5 + $0x1f0] sm:$0xff] }
 0x15c   :  { %v549_v20 = vmax.f32 %v394_v44, %v414_v10  ;;  %v416_v22 = vpop.f32.mrb[29].mxu0  ;;  %v5116_v44 = vpack.c.bf16 %v1204_v38, %v1196_v35  ;;  %v1244_v35 = vld [vmem:[%s6736_s5 + $0x238] sm:$0xff] }
 0x15d   :  { %v1252_v38 = vld [vmem:[%s6736_s5 + $0x278] sm:$0xff] }
 0x15e   :  { %v5114_v40 = vmax.f32 %v545_v53, %v549_v20  ;;  %3361 = vmatprep.subr.bf16.mxu0 %v5116_v44  ;;  %v5169_v20 = vpack.c.bf16 %v1235_v8, %v1227_v27  ;;  %v5179_v26 = vpack.c.bf16 %v1252_v38, %v1244_v35  ;;  %v1284_v35 = vld [vmem:[%s6736_s5 + $0x378] sm:$0xff] }
 0x15f   :  { %v419_v33 = vpop.f32.mrb[30].mxu0  ;;  %3363 = vmatpush1.bf16.msra.mxu0 %v5124_v36 }
 0x160   :  { %v550_v13 = vmax.f32 %v399_v63, %v419_v33  ;;  %v421_v48 = vpop.f32.mrb[31].mxu0  ;;  %v1211_v63 = vld [vmem:[%s6736_s5 + $0x130] sm:$0xff]  ;;  %3365 = vmatprep.subr.bf16.mxu0 %v5139_v50  ;;  %7002 = vst [vmem:[#allocation44_spill] sm:$0xff] %v5169_v20  ;;  %7003 = vst [vmem:[#allocation45_spill] sm:$0xff] %v5179_v26 }
 0x161   :  { %v5149_v21 = vpack.c.bf16 %v1219_v57, %v1211_v63  ;;  %v1251_v33 = vld [vmem:[%s6736_s5 + $0x270] sm:$0xff]  ;;  %v1268_v63 = vld [vmem:[%s6736_s5 + $0x2f8] sm:$0xff] }
 0x162   :  { %v5137_v53 = vmax.f32 %v546_v4, %v550_v13  ;;  %v5159_v4 = vpack.c.bf16 %v1236_v0, %v1228_v1  ;;  %v5189_v48 = vpack.c.bf16 %v1251_v33, %v1243_v31  ;;  %v5199_v57 = vpack.c.bf16 %v1268_v63, %v1260_v51  ;;  %v1267_v1 = vld [vmem:[%s6736_s5 + $0x2f0] sm:$0xff] }
 0x163   :  { %v5147_v61 = vpop.f32.mrb[32].mxu0  ;;  %7000 = vst [vmem:[#allocation42_spill] sm:$0xff] %v5149_v21  ;;  %3367 = vmatpush1.bf16.msra.mxu0 %v5149_v21  ;;  %v1275_v31 = vld [vmem:[%s6736_s5 + $0x330] sm:$0xff] }
 0x164   :  { %v426_v19 = vpop.f32.mrb[33].mxu0  ;;  %7001 = vst [vmem:[#allocation43_spill] sm:$0xff] %v5159_v4  ;;  %3369 = vmatprep.subr.bf16.mxu0 %v5159_v4  ;;  %7004 = vst [vmem:[#allocation46_spill] sm:$0xff] %v5189_v48  ;;  %v1283_v33 = vld [vmem:[%s6736_s5 + $0x370] sm:$0xff] }
 0x165   :  { %7005 = vst [vmem:[#allocation47_spill] sm:$0xff] %v5199_v57  ;;  %v1259_v19 = vld [vmem:[%s6736_s5 + $0x2b0] sm:$0xff]  ;;  %v5229_v51 = vpack.c.bf16 %v1283_v33, %v1275_v31 }
 0x166   :  { %v5209_v27 = vpack.c.bf16 %v1267_v1, %v1259_v19  ;;  %v1292_v1 = vld [vmem:[%s6736_s5 + $0x3b8] sm:$0xff]  ;;  %v1299_v31 = vld [vmem:[%s6736_s5 + $0x3f0] sm:$0xff] }
 0x167   :  { %v5167_v10 = vpop.f32.mrb[34].mxu0  ;;  %3371 = vmatpush1.bf16.msra.mxu0 %v5169_v20  ;;  %7008 = vst [vmem:[#allocation50_spill] sm:$0xff] %v5229_v51 }
 0x168   :  { %v431_v22 = vpop.f32.mrb[35].mxu0  ;;  %3373 = vmatprep.subr.bf16.mxu0 %v5179_v26  ;;  %7006 = vst [vmem:[#allocation48_spill] sm:$0xff] %v5209_v27 }
 0x169   :  { %v1276_v22 = vld [vmem:[%s6736_s5 + $0x338] sm:$0xff] }
 0x16a   :  { %v5219_v38 = vpack.c.bf16 %v1284_v35, %v1276_v22  ;;  %v1291_v35 = vld [vmem:[%s6736_s5 + $0x3b0] sm:$0xff] }
 0x16b   :  { %v5187_v13 = vpop.f32.mrb[36].mxu0  ;;  %3375 = vmatpush1.bf16.msra.mxu0 %v5189_v48 }
 0x16c   :  { %v436_v49 = vpop.f32.mrb[37].mxu0  ;;  %3377 = vmatprep.subr.bf16.mxu0 %v5199_v57  ;;  %7007 = vst [vmem:[#allocation49_spill] sm:$0xff] %v5219_v38 }
 0x16f   :  { %v5207_v0 = vpop.f32.mrb[38].mxu0  ;;  %3379 = vmatpush1.bf16.msra.mxu0 %v5209_v27 }
 0x170   :  { %v441_v8 = vpop.f32.mrb[39].mxu0  ;;  %3381 = vmatprep.subr.bf16.mxu0 %v5219_v38 }
 0x171   :  { %v1300_v8 = vld [vmem:[%s6736_s5 + $0x3f8] sm:$0xff] }
 0x172   :  { %v5241_v22 = vpack.c.bf16 %v1300_v8, %v1292_v1  ;;  %v1308_v1 = vld [vmem:[%s6736_s5 + $0x438] sm:$0xff] }
 0x173   :  { %v5227_v49 = vpop.f32.mrb[40].mxu0  ;;  %3383 = vmatpush1.bf16.msra.mxu0 %v5229_v51  ;;  %v1316_v8 = vld [vmem:[%s6736_s5 + $0x478] sm:$0xff] }
 0x174   :  { %v446_v19 = vpop.f32.mrb[41].mxu0  ;;  %7009 = vst [vmem:[#allocation51_spill] sm:$0xff] %v5241_v22  ;;  %3385 = vmatprep.subr.bf16.mxu0 %v5241_v22  ;;  %v5263_v51 = vpack.c.bf16 %v1316_v8, %v1308_v1  ;;  %v1324_v1 = vld [vmem:[%s6736_s5 + $0x4b8] sm:$0xff]  ;;  %v7025_v4 = vmax.f32 %v5147_v61, %v5227_v49 }
 0x175   :  { %v5251_v19 = vpack.c.bf16 %v1299_v31, %v1291_v35  ;;  %v1307_v35 = vld [vmem:[%s6736_s5 + $0x430] sm:$0xff]  ;;  %v1332_v8 = vld [vmem:[%s6736_s5 + $0x4f8] sm:$0xff] }
 0x176   :  { %7011 = vst [vmem:[#allocation53_spill] sm:$0xff] %v5263_v51  ;;  %v5285_v38 = vpack.c.bf16 %v1332_v8, %v1324_v1  ;;  %v1340_v1 = vld [vmem:[%s6736_s5 + $0x538] sm:$0xff] }
 0x177   :  { %v5249_v33 = vpop.f32.mrb[42].mxu0  ;;  %7010 = vst [vmem:[#allocation52_spill] sm:$0xff] %v5251_v19  ;;  %3387 = vmatpush1.bf16.msra.mxu0 %v5251_v19  ;;  %v1348_v8 = vld [vmem:[%s6736_s5 + $0x578] sm:$0xff] }
 0x178   :  { %v451_v63 = vpop.f32.mrb[43].mxu0  ;;  %3389 = vmatprep.subr.bf16.mxu0 %v5263_v51  ;;  %7013 = vst [vmem:[#allocation55_spill] sm:$0xff] %v5285_v38  ;;  %v5307_v27 = vpack.c.bf16 %v1348_v8, %v1340_v1  ;;  %v1356_v1 = vld [vmem:[%s6736_s5 + $0x5b8] sm:$0xff]  ;;  %v7028_v61 = vmax.f32 %v5167_v10, %v5249_v33 }
 0x179   :  { %v1315_v63 = vld [vmem:[%s6736_s5 + $0x470] sm:$0xff]  ;;  %v1364_v8 = vld [vmem:[%s6736_s5 + $0x5f8] sm:$0xff] }
 0x17a   :  { %v5273_v42 = vpack.c.bf16 %v1315_v63, %v1307_v35  ;;  %v1323_v35 = vld [vmem:[%s6736_s5 + $0x4b0] sm:$0xff]  ;;  %7015 = vst [vmem:[#allocation57_spill] sm:$0xff] %v5307_v27 }
 0x17b   :  { %v5271_v31 = vpop.f32.mrb[44].mxu0 }
 0x17c   :  { %7012 = vst [vmem:[#allocation54_spill] sm:$0xff] %v5273_v42  ;;  %v456_v22 = vpop.f32.mrb[45].mxu0  ;;  %3391 = vmatpush1.bf16.msra.mxu0 %v5273_v42 }
 0x17d   :  { %v1331_v22 = vld [vmem:[%s6736_s5 + $0x4f0] sm:$0xff]  ;;  %3393 = vmatprep.subr.bf16.mxu0 %v5285_v38  ;;  %v5325_v38 = vpack.c.bf16 %v1364_v8, %v1356_v1  ;;  %v1372_v1 = vld [vmem:[%s6736_s5 + $0x638] sm:$0xff] }
 0x17e   :  { %v5295_v19 = vpack.c.bf16 %v1331_v22, %v1323_v35  ;;  %v1339_v35 = vld [vmem:[%s6736_s5 + $0x530] sm:$0xff]  ;;  %v1380_v8 = vld [vmem:[%s6736_s5 + $0x678] sm:$0xff] }
 0x17f   :  { %v5293_v63 = vpop.f32.mrb[46].mxu0  ;;  %7017 = vst [vmem:[#allocation59_spill] sm:$0xff] %v5325_v38  ;;  %v5343_v57 = vpack.c.bf16 %v1380_v8, %v1372_v1  ;;  %v1388_v1 = vld [vmem:[%s6736_s5 + $0x6b8] sm:$0xff] }
 0x180   :  { %7014 = vst [vmem:[#allocation56_spill] sm:$0xff] %v5295_v19  ;;  %v461_v51 = vpop.f32.mrb[47].mxu0  ;;  %3395 = vmatpush1.bf16.msra.mxu0 %v5295_v19  ;;  %v1396_v8 = vld [vmem:[%s6736_s5 + $0x6f8] sm:$0xff] }
 0x181   :  { %v1347_v51 = vld [vmem:[%s6736_s5 + $0x570] sm:$0xff]  ;;  %3397 = vmatprep.subr.bf16.mxu0 %v5307_v27  ;;  %7019 = vst [vmem:[#allocation61_spill] sm:$0xff] %v5343_v57  ;;  %v5361_v48 = vpack.c.bf16 %v1396_v8, %v1388_v1  ;;  %v1404_v1 = vld [vmem:[%s6736_s5 + $0x738] sm:$0xff] }
 0x182   :  { %v5315_v42 = vpack.c.bf16 %v1347_v51, %v1339_v35  ;;  %v1355_v35 = vld [vmem:[%s6736_s5 + $0x5b0] sm:$0xff]  ;;  %v1412_v8 = vld [vmem:[%s6736_s5 + $0x778] sm:$0xff] }
 0x183   :  { %v464_v22 = vpop.f32.mrb[48].mxu0  ;;  %7021 = vst [vmem:[#allocation63_spill] sm:$0xff] %v5361_v48  ;;  %v5379_v26 = vpack.c.bf16 %v1412_v8, %v1404_v1  ;;  %v1420_v1 = vld [vmem:[%s6736_s5 + $0x7b8] sm:$0xff] }
 0x184   :  { %7016 = vst [vmem:[#allocation58_spill] sm:$0xff] %v5315_v42  ;;  %v466_v19 = vpop.f32.mrb[49].mxu0  ;;  %3399 = vmatpush1.bf16.msra.mxu0 %v5315_v42  ;;  %v1428_v8 = vld [vmem:[%s6736_s5 + $0x7f8] sm:$0xff] }
 0x185   :  { %v1363_v19 = vld [vmem:[%s6736_s5 + $0x5f0] sm:$0xff]  ;;  %3401 = vmatprep.subr.bf16.mxu0 %v5325_v38  ;;  %7023 = vst [vmem:[#allocation65_spill] sm:$0xff] %v5379_v26 }
 0x186   :  { %v5333_v42 = vpack.c.bf16 %v1363_v19, %v1355_v35  ;;  %v1371_v35 = vld [vmem:[%s6736_s5 + $0x630] sm:$0xff] }
 0x187   :  { %v469_v51 = vpop.f32.mrb[50].mxu0 }
 0x188   :  { %7018 = vst [vmem:[#allocation60_spill] sm:$0xff] %v5333_v42  ;;  %v471_v27 = vpop.f32.mrb[51].mxu0  ;;  %3403 = vmatpush1.bf16.msra.mxu0 %v5333_v42 }
 0x189   :  { %v1379_v27 = vld [vmem:[%s6736_s5 + $0x670] sm:$0xff]  ;;  %3405 = vmatprep.subr.bf16.mxu0 %v5343_v57 }
 0x18a   :  { %v5351_v42 = vpack.c.bf16 %v1379_v27, %v1371_v35  ;;  %v1387_v35 = vld [vmem:[%s6736_s5 + $0x6b0] sm:$0xff] }
 0x18b   :  { %v474_v19 = vpop.f32.mrb[52].mxu0 }
 0x18c   :  { %7020 = vst [vmem:[#allocation62_spill] sm:$0xff] %v5351_v42  ;;  %v476_v38 = vpop.f32.mrb[53].mxu0  ;;  %3407 = vmatpush1.bf16.msra.mxu0 %v5351_v42 }
 0x18d   :  { %v1395_v38 = vld [vmem:[%s6736_s5 + $0x6f0] sm:$0xff]  ;;  %3409 = vmatprep.subr.bf16.mxu0 %v5361_v48 }
 0x18e   :  { %v5369_v42 = vpack.c.bf16 %v1395_v38, %v1387_v35  ;;  %v1403_v35 = vld [vmem:[%s6736_s5 + $0x730] sm:$0xff] }
 0x18f   :  { %v479_v27 = vpop.f32.mrb[54].mxu0 }
 0x190   :  { %7022 = vst [vmem:[#allocation64_spill] sm:$0xff] %v5369_v42  ;;  %v481_v57 = vpop.f32.mrb[55].mxu0  ;;  %3411 = vmatpush1.bf16.msra.mxu0 %v5369_v42 }
 0x191   :  { %v1411_v57 = vld [vmem:[%s6736_s5 + $0x770] sm:$0xff]  ;;  %3413 = vmatprep.subr.bf16.mxu0 %v5379_v26 }
 0x192   :  { %v5387_v42 = vpack.c.bf16 %v1411_v57, %v1403_v35  ;;  %v5400_v35 = vpack.c.bf16 %v1428_v8, %v1420_v1 }
 0x193   :  { %v484_v38 = vpop.f32.mrb[56].mxu0 }
 0x194   :  { %7024 = vst [vmem:[#allocation66_spill] sm:$0xff] %v5387_v42  ;;  %v555_v48 = vmax.f32 %v464_v22, %v484_v38  ;;  %v486_v20 = vpop.f32.mrb[57].mxu0  ;;  %3415 = vmatpush1.bf16.msra.mxu0 %v5387_v42  ;;  %7026 = vst [vmem:[#allocation67_spill] sm:$0xff] %v5400_v35  ;;  %v1427_v22 = vld [vmem:[%s6736_s5 + $0x7f0] sm:$0xff] }
 0x195   :  { %v1419_v20 = vld [vmem:[%s6736_s5 + $0x7b0] sm:$0xff]  ;;  %3417 = vmatprep.subr.bf16.mxu0 %v5400_v35  ;;  %v1329_v35 = vld [vmem:[%s6736_s5 + $0x4e0] sm:$0xff] }
 0x196   :  { %v567_v21 = vmax.f32 %v7025_v4, %v555_v48  ;;  %v5408_v38 = vpack.c.bf16 %v1427_v22, %v1419_v20  ;;  %v7029_v20 = vmov 0.0  }
 0x197   :  { %v489_v57 = vpop.f32.mrb[58].mxu0 }
 0x198   :  { %7027 = vst [vmem:[#allocation68_spill] sm:$0xff] %v5408_v38  ;;  %v556_v42 = vmax.f32 %v469_v51, %v489_v57  ;;  %v491_v26 = vpop.f32.mrb[59].mxu0  ;;  %v571_v50 = vmax.f32 %v5066_v39, %v567_v21  ;;  %3419 = vmatpush1.bf16.msra.mxu0 %v5408_v38  ;;  %v7030_v39 = vmax.f32 %v5187_v13, %v5271_v31  ;;  %v1322_v38 = vld [vmem:[%s6736_s5 + $0x4a8] sm:$0xff] }
 0x199   :  { %3485 = vmatprep.subr.bf16.mxu0 %v4767_v55  ;;  %v1313_v55 = vld [vmem:[%s6736_s5 + $0x460] sm:$0xff] }
 0x19a   :  { %v568_v4 = vmax.f32 %v7028_v61, %v556_v42 }
 0x19b   :  { %v494_v48 = vpop.f32.mrb[60].mxu0  ;;  %1707 = vmatmul.mubr.f32.vlgmr.msra.gmra.mrb[82].mxu0 %v7029_v20 }
 0x19c   :  { %v557_v49 = vmax.f32 %v474_v19, %v494_v48  ;;  %v496_v1 = vpop.f32.mrb[61].mxu0  ;;  %v572_v8 = vmax.f32 %v5089_v24, %v568_v4  ;;  %3487 = vmatpush1.bf16.msra.mxu0 %v4775_v58  ;;  %v7031_v24 = vmax.f32 %v5207_v0, %v5293_v63  ;;  %v633_v19 = vld [vmem:[#allocation4 + $0x158] sm:$0xff]  ;;  %v1306_v58 = vld [vmem:[%s6736_s5 + $0x428] sm:$0xff] }
 0x19d   :  { %3489 = vmatprep.subr.bf16.mxu0 %v4785_v3  ;;  %v600_v1 = vld [vmem:[#allocation4 + $0x50] sm:$0xff]  ;;  %v1297_v3 = vld [vmem:[%s6736_s5 + $0x3e0] sm:$0xff] }
 0x19e   :  { %v5423_v21 = vmax.f32 %v7030_v39, %v557_v49  ;;  %v592_v49 = vld [vmem:[#allocation4 + $0x10] sm:$0xff]  ;;  %v2945_v39 = vld [vmem:[%s6733_s2] ss:$0 sm:$0xff] }
 0x19f   :  { %v499_v10 = vpop.f32.mrb[62].mxu0 }
 0x1a0   :  { %v558_v42 = vmax.f32 %v479_v27, %v499_v10  ;;  %v501_v26 = vpop.f32.mrb[63].mxu0  ;;  %v573_v33 = vmax.f32 %v5114_v40, %v5423_v21  ;;  %3491 = vmatpush1.bf16.msra.mxu0 %v4793_v6  ;;  %v609_v21 = vld [vmem:[#allocation4 + $0x98] sm:$0xff]  ;;  %v1289_v6 = vld [vmem:[%s6736_s5 + $0x3a0] sm:$0xff] }
 0x1a1   :  { %3493 = vmatprep.subr.bf16.mxu0 %v4803_v15  ;;  %v617_v10 = vld [vmem:[#allocation4 + $0xd8] sm:$0xff]  ;;  %v1290_v15 = vld [vmem:[%s6736_s5 + $0x3a8] sm:$0xff] }
 0x1a2   :  { %v5432_v51 = vmax.f32 %v7031_v24, %v558_v42  ;;  %v3070_v24 = vpack.c.bf16 %v600_v1, %v592_v49 }
 0x1a3   :  { %v504_v13 = vpop.f32.mrb[64].mxu0 }
 0x1a4   :  { %v506_v31 = vpop.f32.mrb[65].mxu0  ;;  %3495 = vmatpush1.bf16.msra.mxu0 %v4811_v18  ;;  %v1281_v18 = vld [vmem:[%s6736_s5 + $0x360] sm:$0xff] }
 0x1a5   :  { %3497 = vmatprep.subr.bf16.mxu0 %v4823_v29  ;;  %v1274_v29 = vld [vmem:[%s6736_s5 + $0x328] sm:$0xff] }
 0x1a7   :  { %v509_v27 = vpop.f32.mrb[66].mxu0 }
 0x1a8   :  { %v511_v40 = vpop.f32.mrb[67].mxu0  ;;  %3499 = vmatpush1.bf16.msra.mxu0 %v4831_v32  ;;  %v1265_v32 = vld [vmem:[%s6736_s5 + $0x2e0] sm:$0xff] }
 0x1a9   :  { %3501 = vmatprep.subr.bf16.mxu0 %v4843_v43  ;;  %v1258_v43 = vld [vmem:[%s6736_s5 + $0x2a8] sm:$0xff] }
 0x1ab   :  { %v514_v0 = vpop.f32.mrb[68].mxu0 }
 0x1ac   :  { %v516_v63 = vpop.f32.mrb[69].mxu0  ;;  %3503 = vmatpush1.bf16.msra.mxu0 %v4851_v46  ;;  %v1249_v46 = vld [vmem:[%s6736_s5 + $0x260] sm:$0xff] }
 0x1ad   :  { %3505 = vmatprep.subr.bf16.mxu0 %v4863_v59  ;;  %v3072_v63 = vpack.c.bf16 %v617_v10, %v609_v21  ;;  %v624_v10 = vld [vmem:[#allocation4 + $0x110] sm:$0xff]  ;;  %v1242_v59 = vld [vmem:[%s6736_s5 + $0x228] sm:$0xff] }
 0x1af   :  { %v519_v22 = vpop.f32.mrb[70].mxu0 }
 0x1b0   :  { %v521_v57 = vpop.f32.mrb[71].mxu0  ;;  %3507 = vmatpush1.bf16.msra.mxu0 %v4871_v62  ;;  %v1233_v62 = vld [vmem:[%s6736_s5 + $0x1e0] sm:$0xff] }
 0x1b1   :  { %3509 = vmatprep.subr.bf16.mxu0 %v4883_v11  ;;  %v608_v57 = vld [vmem:[#allocation4 + $0x90] sm:$0xff] }
 0x1b3   :  { %v524_v61 = vpop.f32.mrb[72].mxu0 }
 0x1b4   :  { %v559_v4 = vmax.f32 %v504_v13, %v524_v61  ;;  %v526_v48 = vpop.f32.mrb[73].mxu0  ;;  %3511 = vmatpush1.bf16.msra.mxu0 %v4891_v14  ;;  %v616_v61 = vld [vmem:[#allocation4 + $0xd0] sm:$0xff]  ;;  %v1226_v14 = vld [vmem:[%s6736_s5 + $0x1a8] sm:$0xff] }
 0x1b5   :  { %3513 = vmatprep.subr.bf16.mxu0 %v4905_v30  ;;  %v625_v48 = vld [vmem:[#allocation4 + $0x118] sm:$0xff]  ;;  %v1217_v30 = vld [vmem:[%s6736_s5 + $0x160] sm:$0xff] }
 0x1b6   :  { %v575_v42 = vmax.f32 %v571_v50, %v559_v4  ;;  %v3074_v4 = vpack.c.bf16 %v616_v61, %v608_v57  ;;  %v3076_v21 = vpack.c.bf16 %v633_v19, %v625_v48  ;;  %v648_v57 = vld [vmem:[#allocation4 + $0x1d0] sm:$0xff]  ;;  %v657_v48 = vld [vmem:[#allocation4 + $0x218] sm:$0xff] }
 0x1b7   :  { %v529_v26 = vpop.f32.mrb[74].mxu0 }
 0x1b8   :  { %v5450_v31 = vadd.f32 %v2945_v39, %v575_v42  ;;  %v560_v40 = vmax.f32 %v509_v27, %v529_v26  ;;  %v531_v13 = vpop.f32.mrb[75].mxu0  ;;  %3515 = vmatpush1.bf16.msra.mxu0 %v4913_v34  ;;  %v632_v42 = vld [vmem:[#allocation4 + $0x150] sm:$0xff]  ;;  %v641_v26 = vld [vmem:[#allocation4 + $0x198] sm:$0xff]  ;;  %v1210_v34 = vld [vmem:[%s6736_s5 + $0x128] sm:$0xff] }
 0x1b9   :  { %3517 = vmatprep.subr.bf16.mxu0 %v4928_v47  ;;  %v649_v13 = vld [vmem:[#allocation4 + $0x1d8] sm:$0xff]  ;;  %v1201_v47 = vld [vmem:[%s6736_s5 + $0xe0] sm:$0xff] }
 0x1ba   :  { %v576_v11 = vmax.f32 %v572_v8, %v560_v40  ;;  %825 = vmatmul.mubr.f32.vlgmr.msra.gmra.mrb[0].mxu1 %v5450_v31  ;;  %v3080_v19 = vpack.c.bf16 %v649_v13, %v641_v26  ;;  %v681_v26 = vld [vmem:[#allocation4 + $0x2d8] sm:$0xff]  ;;  %v680_v13 = vld [vmem:[#allocation4 + $0x2d0] sm:$0xff] }
 0x1bb   :  { %3071 = vmatpush1.bf16.msra.mxu1 %v3070_v24  ;;  %v534_v50 = vpop.f32.mrb[76].mxu0  ;;  %830 = vmatprep.mubr.f32.mxu1 %v7029_v20 }
 0x1bc   :  { %v5456_v49 = vadd.f32 %v2945_v39, %v576_v11  ;;  %v561_v27 = vmax.f32 %v514_v0, %v534_v50  ;;  %3073 = vmatprep.subr.bf16.mxu1 %v3072_v63  ;;  %v536_v1 = vpop.f32.mrb[77].mxu0  ;;  %3519 = vmatpush1.bf16.msra.mxu0 %v4939_v52  ;;  %v3078_v11 = vpack.c.bf16 %v632_v42, %v624_v10  ;;  %v640_v63 = vld [vmem:[#allocation4 + $0x190] sm:$0xff]  ;;  %v665_v50 = vld [vmem:[#allocation4 + $0x258] sm:$0xff]  ;;  %v1194_v52 = vld [vmem:[%s6736_s5 + $0xa8] sm:$0xff] }
 0x1bd   :  { %3521 = vmatprep.subr.bf16.mxu0 %v4951_v60  ;;  %v3084_v1 = vpack.c.bf16 %v665_v50, %v657_v48  ;;  %v664_v10 = vld [vmem:[#allocation4 + $0x250] sm:$0xff]  ;;  %v673_v42 = vld [vmem:[#allocation4 + $0x298] sm:$0xff]  ;;  %v1185_v60 = vld [vmem:[%s6736_s5 + $0x60] sm:$0xff] }
 0x1be   :  { %v577_v8 = vmax.f32 %v573_v33, %v561_v27  ;;  %831 = vmatmul.mubr.f32.gmra.mrb[2].mxu1 %v5456_v49  ;;  %v7032_v33 = vmax.f32 %v5137_v53, %v5432_v51  ;;  %v3088_v51 = vpack.c.bf16 %v681_v26, %v673_v42  ;;  %v594_v42 = vld [vmem:[#allocation4 + $0x20] sm:$0xff] }
 0x1bf   :  { %3075 = vmatpush1.bf16.msra.mxu1 %v3074_v4  ;;  %v539_v24 = vpop.f32.mrb[78].mxu0  ;;  %836 = vmatprep.mubr.f32.mxu1 %v7029_v20  ;;  %v602_v26 = vld [vmem:[#allocation4 + $0x60] sm:$0xff] }
 0x1c0   :  { %v5462_v0 = vadd.f32 %v2945_v39, %v577_v8  ;;  %v562_v40 = vmax.f32 %v519_v22, %v539_v24  ;;  %3077 = vmatprep.subr.bf16.mxu1 %v3076_v21  ;;  %v541_v61 = vpop.f32.mrb[79].mxu0  ;;  %3523 = vmatpush1.bf16.msra.mxu0 %v4961_v2  ;;  %v3082_v22 = vpack.c.bf16 %v648_v57, %v640_v63  ;;  %v656_v21 = vld [vmem:[#allocation4 + $0x210] sm:$0xff]  ;;  %v689_v8 = vld [vmem:[#allocation4 + $0x318] sm:$0xff]  ;;  %v1178_v2 = vld [vmem:[%s6736_s5 + $0x28] sm:$0xff] }
 0x1c1   :  { %3525 = vmatprep.subr.bf16.mxu0 %v4973_v9  ;;  %v3086_v53 = vpack.c.bf16 %v664_v10, %v656_v21  ;;  %v697_v24 = vld [vmem:[#allocation4 + $0x358] sm:$0xff]  ;;  %v696_v63 = vld [vmem:[#allocation4 + $0x350] sm:$0xff]  ;;  %v1421_v9 = vld [vmem:[%s6736_s5 + $0x7c0] sm:$0xff] }
 0x1c2   :  { %v578_v4 = vmax.f32 %v7032_v33, %v562_v40  ;;  %837 = vmatmul.mubr.f32.gmra.mrb[4].mxu1 %v5462_v0  ;;  %v3092_v40 = vpack.c.bf16 %v697_v24, %v689_v8  ;;  %v705_v57 = vld [vmem:[#allocation4 + $0x398] sm:$0xff]  ;;  %v704_v33 = vld [vmem:[#allocation4 + $0x390] sm:$0xff]  ;;  %v610_v8 = vld [vmem:[#allocation4 + $0xa0] sm:$0xff] }
 0x1c3   :  { %3079 = vmatpush1.bf16.msra.mxu1 %v3078_v11  ;;  %842 = vmatprep.mubr.f32.mxu1 %v7029_v20  ;;  %v713_v61 = vld [vmem:[#allocation4 + $0x3d8] sm:$0xff]  ;;  %v618_v24 = vld [vmem:[#allocation4 + $0xe0] sm:$0xff] }
 0x1c4   :  { %v5471_v27 = vadd.f32 %v2945_v39, %v578_v4  ;;  %3081 = vmatprep.subr.bf16.mxu1 %v3080_v19  ;;  %3527 = vmatpush1.bf16.msra.mxu0 %v4981_v16  ;;  %v672_v39 = vld [vmem:[#allocation4 + $0x290] sm:$0xff]  ;;  %v3096_v50 = vpack.c.bf16 %v713_v61, %v705_v57  ;;  %v626_v57 = vld [vmem:[#allocation4 + $0x120] sm:$0xff]  ;;  %v1414_v16 = vld [vmem:[%s6736_s5 + $0x788] sm:$0xff] }
 0x1c5   :  { %3529 = vmatprep.subr.bf16.mxu0 %v4991_v23  ;;  %v3090_v11 = vpack.c.bf16 %v680_v13, %v672_v39  ;;  %v688_v19 = vld [vmem:[#allocation4 + $0x310] sm:$0xff]  ;;  %v3102_v39 = vpack.c.bf16 %v602_v26, %v594_v42  ;;  %v634_v61 = vld [vmem:[#allocation4 + $0x160] sm:$0xff] }
 0x1c6   :  { %843 = vmatmul.mubr.f32.gmra.mrb[6].mxu1 %v5471_v27  ;;  %v3094_v48 = vpack.c.bf16 %v696_v63, %v688_v19  ;;  %v712_v4 = vld [vmem:[#allocation4 + $0x3d0] sm:$0xff]  ;;  %v3106_v19 = vpack.c.bf16 %v618_v24, %v610_v8  ;;  %v1405_v23 = vld [vmem:[%s6736_s5 + $0x740] sm:$0xff] }
 0x1c7   :  { %3083 = vmatpush1.bf16.msra.mxu1 %v3082_v22  ;;  %913 = vmatprep.mubr.f32.mxu1 %v7029_v20  ;;  %v595_v22 = vld [vmem:[#allocation4 + $0x28] sm:$0xff]  ;;  %v3098_v21 = vpack.c.bf16 %v712_v4, %v704_v33  ;;  %v3110_v33 = vpack.c.bf16 %v634_v61, %v626_v57 }
 0x1c8   :  { %3085 = vmatprep.subr.bf16.mxu1 %v3084_v1  ;;  %3531 = vmatpush1.bf16.msra.mxu0 %v4999_v28  ;;  %v603_v1 = vld [vmem:[#allocation4 + $0x68] sm:$0xff] }
 0x1c9   :  { %3533 = vmatprep.subr.bf16.mxu0 %v5009_v37  ;;  %v3100_v10 = vpack.c.bf16 %v603_v1, %v595_v22  ;;  %v642_v22 = vld [vmem:[#allocation4 + $0x1a0] sm:$0xff]  ;;  %v1398_v28 = vld [vmem:[%s6736_s5 + $0x708] sm:$0xff] }
 0x1ca   :  { %v650_v1 = vld [vmem:[#allocation4 + $0x1e0] sm:$0xff] }
 0x1cb   :  { %3087 = vmatpush1.bf16.msra.mxu1 %v3086_v53  ;;  %v611_v53 = vld [vmem:[#allocation4 + $0xa8] sm:$0xff]  ;;  %v3114_v42 = vpack.c.bf16 %v650_v1, %v642_v22  ;;  %v1389_v37 = vld [vmem:[%s6736_s5 + $0x6c0] sm:$0xff] }
 0x1cc   :  { %3089 = vmatprep.subr.bf16.mxu1 %v3088_v51  ;;  %3535 = vmatpush1.bf16.msra.mxu0 %v5017_v45  ;;  %v619_v51 = vld [vmem:[#allocation4 + $0xe8] sm:$0xff] }
 0x1cd   :  { %3537 = vmatprep.subr.bf16.mxu0 %v5027_v56  ;;  %v3104_v13 = vpack.c.bf16 %v619_v51, %v611_v53  ;;  %v658_v53 = vld [vmem:[#allocation4 + $0x220] sm:$0xff]  ;;  %v1382_v45 = vld [vmem:[%s6736_s5 + $0x688] sm:$0xff] }
 0x1ce   :  { %v666_v51 = vld [vmem:[#allocation4 + $0x260] sm:$0xff] }
 0x1cf   :  { %3091 = vmatpush1.bf16.msra.mxu1 %v3090_v11  ;;  %v627_v11 = vld [vmem:[#allocation4 + $0x128] sm:$0xff]  ;;  %v3118_v8 = vpack.c.bf16 %v666_v51, %v658_v53  ;;  %v1373_v56 = vld [vmem:[%s6736_s5 + $0x640] sm:$0xff] }
 0x1d0   :  { %3093 = vmatprep.subr.bf16.mxu1 %v3092_v40  ;;  %3539 = vmatpush1.bf16.msra.mxu0 %v5035_v5  ;;  %v635_v40 = vld [vmem:[#allocation4 + $0x168] sm:$0xff] }
 0x1d1   :  { %3541 = vmatprep.subr.bf16.mxu0 %v5045_v12  ;;  %v3108_v63 = vpack.c.bf16 %v635_v40, %v627_v11  ;;  %v674_v11 = vld [vmem:[#allocation4 + $0x2a0] sm:$0xff]  ;;  %v1366_v5 = vld [vmem:[%s6736_s5 + $0x608] sm:$0xff] }
 0x1d2   :  { %v682_v40 = vld [vmem:[#allocation4 + $0x2e0] sm:$0xff] }
 0x1d3   :  { %3095 = vmatpush1.bf16.msra.mxu1 %v3094_v48  ;;  %v643_v48 = vld [vmem:[#allocation4 + $0x1a8] sm:$0xff]  ;;  %v3122_v57 = vpack.c.bf16 %v682_v40, %v674_v11  ;;  %v1357_v12 = vld [vmem:[%s6736_s5 + $0x5c0] sm:$0xff] }
 0x1d4   :  { %3097 = vmatprep.subr.bf16.mxu1 %v3096_v50  ;;  %3543 = vmatpush1.bf16.msra.mxu0 %v5053_v25  ;;  %v651_v50 = vld [vmem:[#allocation4 + $0x1e8] sm:$0xff] }
 0x1d5   :  { %3545 = vmatprep.subr.bf16.mxu0 %v5068_v41  ;;  %v3112_v4 = vpack.c.bf16 %v651_v50, %v643_v48  ;;  %v690_v48 = vld [vmem:[#allocation4 + $0x320] sm:$0xff]  ;;  %v1350_v25 = vld [vmem:[%s6736_s5 + $0x588] sm:$0xff] }
 0x1d6   :  { %v698_v50 = vld [vmem:[#allocation4 + $0x360] sm:$0xff] }
 0x1d7   :  { %3099 = vmatpush1.bf16.msra.mxu1 %v3098_v21  ;;  %v659_v21 = vld [vmem:[#allocation4 + $0x228] sm:$0xff]  ;;  %v3126_v22 = vpack.c.bf16 %v698_v50, %v690_v48 }
 0x1d8   :  { %3101 = vmatprep.subr.bf16.mxu1 %v3100_v10  ;;  %3547 = vmatpush1.bf16.msra.mxu0 %v5076_v54  ;;  %v667_v10 = vld [vmem:[#allocation4 + $0x268] sm:$0xff]  ;;  %v1341_v54 = vld [vmem:[%s6736_s5 + $0x540] sm:$0xff] }
 0x1d9   :  { %3613 = vmatprep.subr.bf16.mxu0 %v5091_v7  ;;  %v3116_v26 = vpack.c.bf16 %v667_v10, %v659_v21  ;;  %v706_v21 = vld [vmem:[#allocation4 + $0x3a0] sm:$0xff]  ;;  %v1334_v7 = vld [vmem:[%s6736_s5 + $0x508] sm:$0xff] }
 0x1da   :  { %914 = vmatmul.mubr.f32.vlgmr.msra.gmra.mrb[8].mxu1 %v5450_v31  ;;  %v714_v10 = vld [vmem:[#allocation4 + $0x3e0] sm:$0xff] }
 0x1db   :  { %3103 = vmatpush1.bf16.msra.mxu1 %v3102_v39  ;;  %919 = vmatprep.mubr.f32.mxu1 %v7029_v20  ;;  %v675_v39 = vld [vmem:[#allocation4 + $0x2a8] sm:$0xff]  ;;  %v3130_v53 = vpack.c.bf16 %v714_v10, %v706_v21 }
 0x1dc   :  { %3105 = vmatprep.subr.bf16.mxu1 %v3104_v13  ;;  %v683_v13 = vld [vmem:[#allocation4 + $0x2e8] sm:$0xff] }
 0x1dd   :  { %v3120_v24 = vpack.c.bf16 %v683_v13, %v675_v39  ;;  %v596_v39 = vld [vmem:[#allocation4 + $0x30] sm:$0xff] }
 0x1de   :  { %920 = vmatmul.mubr.f32.gmra.mrb[10].mxu1 %v5456_v49  ;;  %v604_v13 = vld [vmem:[#allocation4 + $0x70] sm:$0xff] }
 0x1df   :  { %3107 = vmatpush1.bf16.msra.mxu1 %v3106_v19  ;;  %925 = vmatprep.mubr.f32.mxu1 %v7029_v20  ;;  %v691_v19 = vld [vmem:[#allocation4 + $0x328] sm:$0xff]  ;;  %v3134_v11 = vpack.c.bf16 %v604_v13, %v596_v39 }
 0x1e0   :  { %3109 = vmatprep.subr.bf16.mxu1 %v3108_v63  ;;  %v699_v63 = vld [vmem:[#allocation4 + $0x368] sm:$0xff] }
 0x1e1   :  { %v3124_v61 = vpack.c.bf16 %v699_v63, %v691_v19  ;;  %v612_v19 = vld [vmem:[#allocation4 + $0xb0] sm:$0xff] }
 0x1e2   :  { %926 = vmatmul.mubr.f32.gmra.mrb[12].mxu1 %v5462_v0  ;;  %v620_v63 = vld [vmem:[#allocation4 + $0xf0] sm:$0xff] }
 0x1e3   :  { %3111 = vmatpush1.bf16.msra.mxu1 %v3110_v33  ;;  %931 = vmatprep.mubr.f32.mxu1 %v7029_v20  ;;  %v707_v33 = vld [vmem:[#allocation4 + $0x3a8] sm:$0xff]  ;;  %v3138_v48 = vpack.c.bf16 %v620_v63, %v612_v19 }
 0x1e4   :  { %3113 = vmatprep.subr.bf16.mxu1 %v3112_v4  ;;  %v715_v4 = vld [vmem:[#allocation4 + $0x3e8] sm:$0xff] }
 0x1e5   :  { %v3128_v1 = vpack.c.bf16 %v715_v4, %v707_v33  ;;  %v628_v33 = vld [vmem:[#allocation4 + $0x130] sm:$0xff] }
 0x1e6   :  { %932 = vmatmul.mubr.f32.gmra.mrb[14].mxu1 %v5471_v27  ;;  %v636_v4 = vld [vmem:[#allocation4 + $0x170] sm:$0xff] }
 0x1e7   :  { %3115 = vmatpush1.bf16.msra.mxu1 %v3114_v42  ;;  %1002 = vmatprep.mubr.f32.mxu1 %v7029_v20  ;;  %v597_v42 = vld [vmem:[#allocation4 + $0x38] sm:$0xff]  ;;  %v3142_v21 = vpack.c.bf16 %v636_v4, %v628_v33 }
 0x1e8   :  { %3117 = vmatprep.subr.bf16.mxu1 %v3116_v26  ;;  %v605_v26 = vld [vmem:[#allocation4 + $0x78] sm:$0xff] }
 0x1e9   :  { %v3132_v51 = vpack.c.bf16 %v605_v26, %v597_v42  ;;  %v644_v42 = vld [vmem:[#allocation4 + $0x1b0] sm:$0xff] }
 0x1ea   :  { %v652_v26 = vld [vmem:[#allocation4 + $0x1f0] sm:$0xff] }
 0x1eb   :  { %3119 = vmatpush1.bf16.msra.mxu1 %v3118_v8  ;;  %v613_v8 = vld [vmem:[#allocation4 + $0xb8] sm:$0xff]  ;;  %v3146_v39 = vpack.c.bf16 %v652_v26, %v644_v42 }
 0x1ec   :  { %3121 = vmatprep.subr.bf16.mxu1 %v3120_v24  ;;  %v621_v24 = vld [vmem:[#allocation4 + $0xf8] sm:$0xff] }
 0x1ed   :  { %v3136_v40 = vpack.c.bf16 %v621_v24, %v613_v8  ;;  %v660_v8 = vld [vmem:[#allocation4 + $0x230] sm:$0xff] }
 0x1ee   :  { %v668_v24 = vld [vmem:[#allocation4 + $0x270] sm:$0xff] }
 0x1ef   :  { %3123 = vmatpush1.bf16.msra.mxu1 %v3122_v57  ;;  %v629_v57 = vld [vmem:[#allocation4 + $0x138] sm:$0xff]  ;;  %v3150_v19 = vpack.c.bf16 %v668_v24, %v660_v8 }
 0x1f0   :  { %3125 = vmatprep.subr.bf16.mxu1 %v3124_v61  ;;  %v637_v61 = vld [vmem:[#allocation4 + $0x178] sm:$0xff] }
 0x1f1   :  { %v3140_v50 = vpack.c.bf16 %v637_v61, %v629_v57  ;;  %v676_v57 = vld [vmem:[#allocation4 + $0x2b0] sm:$0xff] }
 0x1f2   :  { %v684_v61 = vld [vmem:[#allocation4 + $0x2f0] sm:$0xff] }
 0x1f3   :  { %3127 = vmatpush1.bf16.msra.mxu1 %v3126_v22  ;;  %v645_v22 = vld [vmem:[#allocation4 + $0x1b8] sm:$0xff]  ;;  %v3154_v33 = vpack.c.bf16 %v684_v61, %v676_v57 }
 0x1f4   :  { %3129 = vmatprep.subr.bf16.mxu1 %v3128_v1  ;;  %v653_v1 = vld [vmem:[#allocation4 + $0x1f8] sm:$0xff] }
 0x1f5   :  { %v3144_v10 = vpack.c.bf16 %v653_v1, %v645_v22  ;;  %v692_v22 = vld [vmem:[#allocation4 + $0x330] sm:$0xff] }
 0x1f6   :  { %v700_v1 = vld [vmem:[#allocation4 + $0x370] sm:$0xff] }
 0x1f7   :  { %3131 = vmatpush1.bf16.msra.mxu1 %v3130_v53  ;;  %v661_v53 = vld [vmem:[#allocation4 + $0x238] sm:$0xff]  ;;  %v3158_v42 = vpack.c.bf16 %v700_v1, %v692_v22 }
 0x1f8   :  { %3133 = vmatprep.subr.bf16.mxu1 %v3132_v51  ;;  %v669_v51 = vld [vmem:[#allocation4 + $0x278] sm:$0xff] }
 0x1f9   :  { %v3148_v13 = vpack.c.bf16 %v669_v51, %v661_v53  ;;  %v708_v53 = vld [vmem:[#allocation4 + $0x3b0] sm:$0xff] }
 0x1fa   :  { %1003 = vmatmul.mubr.f32.vlgmr.msra.gmra.mrb[16].mxu1 %v5450_v31  ;;  %v716_v51 = vld [vmem:[#allocation4 + $0x3f0] sm:$0xff] }
 0x1fb   :  { %3135 = vmatpush1.bf16.msra.mxu1 %v3134_v11  ;;  %1008 = vmatprep.mubr.f32.mxu1 %v7029_v20  ;;  %v677_v11 = vld [vmem:[#allocation4 + $0x2b8] sm:$0xff]  ;;  %v3162_v8 = vpack.c.bf16 %v716_v51, %v708_v53  ;;  %v1221_v51 = vld [vmem:[%s6736_s5 + $0x180] sm:$0xff] }
 0x1fc   :  { %3137 = vmatprep.subr.bf16.mxu1 %v3136_v40  ;;  %v685_v40 = vld [vmem:[#allocation4 + $0x2f8] sm:$0xff] }
 0x1fd   :  { %v3152_v63 = vpack.c.bf16 %v685_v40, %v677_v11  ;;  %v1173_v11 = vld [vmem:[%s6736_s5] sm:$0xff] }
 0x1fe   :  { %1009 = vmatmul.mubr.f32.gmra.mrb[18].mxu1 %v5456_v49  ;;  %v1181_v40 = vld [vmem:[%s6736_s5 + $0x40] sm:$0xff] }
 0x1ff   :  { %3139 = vmatpush1.bf16.msra.mxu1 %v3138_v48  ;;  %1014 = vmatprep.mubr.f32.mxu1 %v7029_v20  ;;  %v693_v48 = vld [vmem:[#allocation4 + $0x338] sm:$0xff]  ;;  %v5523_v57 = vpack.c.bf16 %v1181_v40, %v1173_v11  ;;  %v1237_v40 = vld [vmem:[%s6736_s5 + $0x200] sm:$0xff] }
 0x200   :  { %3141 = vmatprep.subr.bf16.mxu1 %v3140_v50  ;;  %v701_v50 = vld [vmem:[#allocation4 + $0x378] sm:$0xff] }
 0x201   :  { %v3156_v4 = vpack.c.bf16 %v701_v50, %v693_v48  ;;  %v1189_v48 = vld [vmem:[%s6736_s5 + $0x80] sm:$0xff] }
 0x202   :  { %1015 = vmatmul.mubr.f32.gmra.mrb[20].mxu1 %v5462_v0  ;;  %v1197_v50 = vld [vmem:[%s6736_s5 + $0xc0] sm:$0xff] }
 0x203   :  { %3143 = vmatpush1.bf16.msra.mxu1 %v3142_v21  ;;  %1020 = vmatprep.mubr.f32.mxu1 %v7029_v20  ;;  %v709_v21 = vld [vmem:[#allocation4 + $0x3b8] sm:$0xff]  ;;  %v5543_v22 = vpack.c.bf16 %v1197_v50, %v1189_v48 }
 0x204   :  { %3145 = vmatprep.subr.bf16.mxu1 %v3144_v10  ;;  %v717_v10 = vld [vmem:[#allocation4 + $0x3f8] sm:$0xff] }
 0x205   :  { %v3160_v26 = vpack.c.bf16 %v717_v10, %v709_v21  ;;  %7035 = vst [vmem:[#allocation71_spill] sm:$0xff] %v5543_v22  ;;  %v1205_v21 = vld [vmem:[%s6736_s5 + $0x100] sm:$0xff] }
 0x206   :  { %1021 = vmatmul.mubr.f32.gmra.mrb[22].mxu1 %v5471_v27  ;;  %v1213_v10 = vld [vmem:[%s6736_s5 + $0x140] sm:$0xff] }
 0x207   :  { %3147 = vmatpush1.bf16.msra.mxu1 %v3146_v39  ;;  %1091 = vmatprep.mubr.f32.mxu1 %v7029_v20  ;;  %v1174_v39 = vld [vmem:[%s6736_s5 + $0x8] sm:$0xff] }
 0x208   :  { %3149 = vmatprep.subr.bf16.mxu1 %v3148_v13  ;;  %v1182_v13 = vld [vmem:[%s6736_s5 + $0x48] sm:$0xff] }
 0x209   :  { %v5509_v24 = vpack.c.bf16 %v1182_v13, %v1174_v39  ;;  %v1229_v39 = vld [vmem:[%s6736_s5 + $0x1c0] sm:$0xff]  ;;  %v1246_v13 = vld [vmem:[%s6736_s5 + $0x248] sm:$0xff] }
 0x20b   :  { %3151 = vmatpush1.bf16.msra.mxu1 %v3150_v19  ;;  %7033 = vst [vmem:[#allocation69_spill] sm:$0xff] %v5509_v24  ;;  %v1190_v19 = vld [vmem:[%s6736_s5 + $0x88] sm:$0xff] }
 0x20c   :  { %3153 = vmatprep.subr.bf16.mxu1 %v3152_v63  ;;  %v1198_v63 = vld [vmem:[%s6736_s5 + $0xc8] sm:$0xff] }
 0x20d   :  { %v5526_v61 = vpack.c.bf16 %v1198_v63, %v1190_v19  ;;  %v1245_v19 = vld [vmem:[%s6736_s5 + $0x240] sm:$0xff]  ;;  %v1262_v63 = vld [vmem:[%s6736_s5 + $0x2c8] sm:$0xff] }
 0x20e   :  { %v5602_v48 = vpack.c.bf16 %v1245_v19, %v1237_v40 }
 0x20f   :  { %3155 = vmatpush1.bf16.msra.mxu1 %v3154_v33  ;;  %7034 = vst [vmem:[#allocation70_spill] sm:$0xff] %v5526_v61  ;;  %v1206_v33 = vld [vmem:[%s6736_s5 + $0x108] sm:$0xff] }
 0x210   :  { %3157 = vmatprep.subr.bf16.mxu1 %v3156_v4  ;;  %v1214_v4 = vld [vmem:[%s6736_s5 + $0x148] sm:$0xff]  ;;  %7041 = vst [vmem:[#allocation77_spill] sm:$0xff] %v5602_v48 }
 0x211   :  { %v5546_v1 = vpack.c.bf16 %v1214_v4, %v1206_v33  ;;  %v1253_v33 = vld [vmem:[%s6736_s5 + $0x280] sm:$0xff] }
 0x212   :  { %v1261_v4 = vld [vmem:[%s6736_s5 + $0x2c0] sm:$0xff] }
 0x213   :  { %3159 = vmatpush1.bf16.msra.mxu1 %v3158_v42  ;;  %7036 = vst [vmem:[#allocation72_spill] sm:$0xff] %v5546_v1  ;;  %v1230_v42 = vld [vmem:[%s6736_s5 + $0x1c8] sm:$0xff] }
 0x214   :  { %3161 = vmatprep.subr.bf16.mxu1 %v3160_v26  ;;  %v5563_v26 = vpack.c.bf16 %v1213_v10, %v1205_v21  ;;  %v1278_v21 = vld [vmem:[%s6736_s5 + $0x348] sm:$0xff]  ;;  %v5621_v10 = vpack.c.bf16 %v1261_v4, %v1253_v33 }
 0x215   :  { %v1302_v33 = vld [vmem:[%s6736_s5 + $0x408] sm:$0xff] }
 0x216   :  { %7037 = vst [vmem:[#allocation73_spill] sm:$0xff] %v5563_v26  ;;  %7043 = vst [vmem:[#allocation79_spill] sm:$0xff] %v5621_v10  ;;  %v1310_v4 = vld [vmem:[%s6736_s5 + $0x448] sm:$0xff] }
 0x217   :  { %3163 = vmatpush1.bf16.msra.mxu1 %v3162_v8  ;;  %v5583_v8 = vpack.c.bf16 %v1229_v39, %v1221_v51  ;;  %v1277_v51 = vld [vmem:[%s6736_s5 + $0x340] sm:$0xff]  ;;  %v1286_v39 = vld [vmem:[%s6736_s5 + $0x388] sm:$0xff] }
 0x218   :  { %3165 = vmatprep.subr.bf16.mxu1 %v5509_v24 }
 0x219   :  { %7039 = vst [vmem:[#allocation75_spill] sm:$0xff] %v5583_v8 }
 0x21a   :  { %1092 = vmatmul.mubr.f32.vlgmr.msra.gmra.mrb[24].mxu1 %v5450_v31  ;;  %v1222_v31 = vld [vmem:[%s6736_s5 + $0x188] sm:$0xff] }
 0x21b   :  { %3167 = vmatpush1.bf16.msra.mxu1 %v5523_v57  ;;  %1097 = vmatprep.mubr.f32.mxu1 %v7029_v20  ;;  %v5566_v53 = vpack.c.bf16 %v1230_v42, %v1222_v31  ;;  %v1269_v42 = vld [vmem:[%s6736_s5 + $0x300] sm:$0xff] }
 0x21c   :  { %3169 = vmatprep.subr.bf16.mxu1 %v5526_v61 }
 0x21d   :  { %7038 = vst [vmem:[#allocation74_spill] sm:$0xff] %v5566_v53 }
 0x21e   :  { %1098 = vmatmul.mubr.f32.gmra.mrb[26].mxu1 %v5456_v49  ;;  %v1238_v49 = vld [vmem:[%s6736_s5 + $0x208] sm:$0xff] }
 0x21f   :  { %3171 = vmatpush1.bf16.msra.mxu1 %v5543_v22  ;;  %1103 = vmatprep.mubr.f32.mxu1 %v7029_v20  ;;  %v5586_v11 = vpack.c.bf16 %v1246_v13, %v1238_v49  ;;  %v1294_v49 = vld [vmem:[%s6736_s5 + $0x3c8] sm:$0xff]  ;;  %v5639_v13 = vpack.c.bf16 %v1277_v51, %v1269_v42  ;;  %v1301_v42 = vld [vmem:[%s6736_s5 + $0x400] sm:$0xff] }
 0x220   :  { %3173 = vmatprep.subr.bf16.mxu1 %v5546_v1  ;;  %v5644_v19 = vpack.c.bf16 %v1294_v49, %v1286_v39  ;;  %v1309_v51 = vld [vmem:[%s6736_s5 + $0x440] sm:$0xff]  ;;  %v1318_v39 = vld [vmem:[%s6736_s5 + $0x488] sm:$0xff] }
 0x221   :  { %7040 = vst [vmem:[#allocation76_spill] sm:$0xff] %v5586_v11  ;;  %7045 = vst [vmem:[#allocation81_spill] sm:$0xff] %v5639_v13  ;;  %v1326_v49 = vld [vmem:[%s6736_s5 + $0x4c8] sm:$0xff] }
 0x222   :  { %1104 = vmatmul.mubr.f32.gmra.mrb[28].mxu1 %v5462_v0  ;;  %v1254_v0 = vld [vmem:[%s6736_s5 + $0x288] sm:$0xff]  ;;  %7046 = vst [vmem:[#allocation82_spill] sm:$0xff] %v5644_v19 }
 0x223   :  { %3175 = vmatpush1.bf16.msra.mxu1 %v5563_v26  ;;  %1109 = vmatprep.mubr.f32.mxu1 %v7029_v20  ;;  %v5606_v50 = vpack.c.bf16 %v1262_v63, %v1254_v0  ;;  %v1285_v0 = vld [vmem:[%s6736_s5 + $0x380] sm:$0xff] }
 0x224   :  { %3177 = vmatprep.subr.bf16.mxu1 %v5566_v53  ;;  %v1293_v63 = vld [vmem:[%s6736_s5 + $0x3c0] sm:$0xff] }
 0x225   :  { %7042 = vst [vmem:[#allocation78_spill] sm:$0xff] %v5606_v50 }
 0x226   :  { %1110 = vmatmul.mubr.f32.gmra.mrb[30].mxu1 %v5471_v27  ;;  %v1270_v27 = vld [vmem:[%s6736_s5 + $0x308] sm:$0xff] }
 0x227   :  { %3179 = vmatpush1.bf16.msra.mxu1 %v5583_v8  ;;  %1493 = vmatprep.mubr.f32.mxu1 %v7029_v20  ;;  %v5624_v31 = vpack.c.bf16 %v1278_v21, %v1270_v27  ;;  %v5659_v27 = vpack.c.bf16 %v1293_v63, %v1285_v0  ;;  %v5662_v21 = vpack.c.bf16 %v1310_v4, %v1302_v33  ;;  %v1317_v33 = vld [vmem:[%s6736_s5 + $0x480] sm:$0xff] }
 0x228   :  { %3181 = vmatprep.subr.bf16.mxu1 %v5586_v11  ;;  %v5677_v0 = vpack.c.bf16 %v1309_v51, %v1301_v42  ;;  %v5680_v63 = vpack.c.bf16 %v1326_v49, %v1318_v39  ;;  %v1325_v4 = vld [vmem:[%s6736_s5 + $0x4c0] sm:$0xff]  ;;  %v1342_v42 = vld [vmem:[%s6736_s5 + $0x548] sm:$0xff] }
 0x229   :  { %7044 = vst [vmem:[#allocation80_spill] sm:$0xff] %v5624_v31  ;;  %7047 = vst [vmem:[#allocation83_spill] sm:$0xff] %v5659_v27  ;;  %v5695_v51 = vpack.c.bf16 %v1325_v4, %v1317_v33  ;;  %v5698_v39 = vpack.c.bf16 %v1342_v42, %v1334_v7  ;;  %v1333_v49 = vld [vmem:[%s6736_s5 + $0x500] sm:$0xff]  ;;  %v1358_v33 = vld [vmem:[%s6736_s5 + $0x5c8] sm:$0xff] }
 0x22a   :  { %7048 = vst [vmem:[#allocation84_spill] sm:$0xff] %v5662_v21  ;;  %7049 = vst [vmem:[#allocation85_spill] sm:$0xff] %v5677_v0  ;;  %v5715_v7 = vpack.c.bf16 %v1341_v54, %v1333_v49  ;;  %v5718_v4 = vpack.c.bf16 %v1358_v33, %v1350_v25  ;;  %v1349_v42 = vld [vmem:[%s6736_s5 + $0x580] sm:$0xff]  ;;  %v1374_v54 = vld [vmem:[%s6736_s5 + $0x648] sm:$0xff] }
 0x22b   :  { %3183 = vmatpush1.bf16.msra.mxu1 %v5602_v48  ;;  %7050 = vst [vmem:[#allocation86_spill] sm:$0xff] %v5680_v63  ;;  %7051 = vst [vmem:[#allocation87_spill] sm:$0xff] %v5695_v51  ;;  %v5733_v25 = vpack.c.bf16 %v1357_v12, %v1349_v42  ;;  %v5736_v49 = vpack.c.bf16 %v1374_v54, %v1366_v5  ;;  %v1365_v33 = vld [vmem:[%s6736_s5 + $0x600] sm:$0xff]  ;;  %v1390_v12 = vld [vmem:[%s6736_s5 + $0x6c8] sm:$0xff] }
 0x22c   :  { %3185 = vmatprep.subr.bf16.mxu1 %v5606_v50  ;;  %7052 = vst [vmem:[#allocation88_spill] sm:$0xff] %v5698_v39  ;;  %7053 = vst [vmem:[#allocation89_spill] sm:$0xff] %v5715_v7  ;;  %v5751_v5 = vpack.c.bf16 %v1373_v56, %v1365_v33  ;;  %v5754_v42 = vpack.c.bf16 %v1390_v12, %v1382_v45  ;;  %v1381_v54 = vld [vmem:[%s6736_s5 + $0x680] sm:$0xff]  ;;  %v1406_v56 = vld [vmem:[%s6736_s5 + $0x748] sm:$0xff] }
 0x22d   :  { %v5641_v40 = vpop.f32.mrb[80].mxu0  ;;  %7054 = vst [vmem:[#allocation90_spill] sm:$0xff] %v5718_v4  ;;  %7055 = vst [vmem:[#allocation91_spill] sm:$0xff] %v5733_v25  ;;  %v5769_v45 = vpack.c.bf16 %v1389_v37, %v1381_v54  ;;  %v5772_v33 = vpack.c.bf16 %v1406_v56, %v1398_v28  ;;  %v1397_v12 = vld [vmem:[%s6736_s5 + $0x700] sm:$0xff]  ;;  %v1422_v37 = vld [vmem:[%s6736_s5 + $0x7c8] sm:$0xff] }
 0x22e   :  { %v5706_v41 = vpop.f32.mrb[81].mxu0  ;;  %7056 = vst [vmem:[#allocation92_spill] sm:$0xff] %v5736_v49  ;;  %7057 = vst [vmem:[#allocation93_spill] sm:$0xff] %v5751_v5  ;;  %v5787_v28 = vpack.c.bf16 %v1405_v23, %v1397_v12  ;;  %v5790_v54 = vpack.c.bf16 %v1422_v37, %v1414_v16  ;;  %v1413_v56 = vld [vmem:[%s6736_s5 + $0x780] sm:$0xff]  ;;  %v1186_v23 = vld [vmem:[%s6736_s5 + $0x68] sm:$0xff] }
 0x22f   :  { %3187 = vmatpush1.bf16.msra.mxu1 %v5621_v10  ;;  %7058 = vst [vmem:[#allocation94_spill] sm:$0xff] %v5754_v42  ;;  %7059 = vst [vmem:[#allocation95_spill] sm:$0xff] %v5769_v45  ;;  %v5805_v16 = vpack.c.bf16 %v1421_v9, %v1413_v56  ;;  %v5808_v12 = vpack.c.bf16 %v1186_v23, %v1178_v2  ;;  %v1177_v37 = vld [vmem:[%s6736_s5 + $0x20] sm:$0xff]  ;;  %v1202_v9 = vld [vmem:[%s6736_s5 + $0xe8] sm:$0xff] }
 0x230   :  { %3189 = vmatprep.subr.bf16.mxu1 %v5624_v31  ;;  %7060 = vst [vmem:[#allocation96_spill] sm:$0xff] %v5772_v33  ;;  %7061 = vst [vmem:[#allocation97_spill] sm:$0xff] %v5787_v28  ;;  %v5823_v2 = vpack.c.bf16 %v1185_v60, %v1177_v37  ;;  %v5826_v56 = vpack.c.bf16 %v1202_v9, %v1194_v52  ;;  %v1193_v23 = vld [vmem:[%s6736_s5 + $0xa0] sm:$0xff]  ;;  %v1218_v60 = vld [vmem:[%s6736_s5 + $0x168] sm:$0xff] }
 0x231   :  { %7062 = vst [vmem:[#allocation98_spill] sm:$0xff] %v5790_v54  ;;  %7063 = vst [vmem:[#allocation99_spill] sm:$0xff] %v5805_v16  ;;  %v5842_v52 = vpack.c.bf16 %v1201_v47, %v1193_v23  ;;  %v5846_v37 = vpack.c.bf16 %v1218_v60, %v1210_v34  ;;  %v1209_v9 = vld [vmem:[%s6736_s5 + $0x120] sm:$0xff]  ;;  %v1234_v47 = vld [vmem:[%s6736_s5 + $0x1e8] sm:$0xff] }
 0x232   :  { %7064 = vst [vmem:[#allocation100_spill] sm:$0xff] %v5808_v12  ;;  %v5861_v34 = vpack.c.bf16 %v1217_v30, %v1209_v9  ;;  %v5864_v23 = vpack.c.bf16 %v1234_v47, %v1226_v14  ;;  %v1225_v60 = vld [vmem:[%s6736_s5 + $0x1a0] sm:$0xff]  ;;  %v1250_v30 = vld [vmem:[%s6736_s5 + $0x268] sm:$0xff] }
 0x233   :  { %3191 = vmatpush1.bf16.msra.mxu1 %v5639_v13  ;;  %v5879_v14 = vpack.c.bf16 %v1233_v62, %v1225_v60  ;;  %v5882_v9 = vpack.c.bf16 %v1250_v30, %v1242_v59  ;;  %v1241_v47 = vld [vmem:[%s6736_s5 + $0x220] sm:$0xff]  ;;  %v1266_v62 = vld [vmem:[%s6736_s5 + $0x2e8] sm:$0xff] }
 0x234   :  { %3193 = vmatprep.subr.bf16.mxu1 %v5644_v19  ;;  %7065 = vst [vmem:[#allocation101_spill] sm:$0xff] %v5864_v23  ;;  %v5897_v59 = vpack.c.bf16 %v1249_v46, %v1241_v47  ;;  %v5900_v60 = vpack.c.bf16 %v1266_v62, %v1258_v43  ;;  %v1257_v30 = vld [vmem:[%s6736_s5 + $0x2a0] sm:$0xff]  ;;  %v1282_v46 = vld [vmem:[%s6736_s5 + $0x368] sm:$0xff] }
 0x235   :  { %7066 = vst [vmem:[#allocation102_spill] sm:$0xff] %v5879_v14  ;;  %7067 = vst [vmem:[#allocation103_spill] sm:$0xff] %v5882_v9  ;;  %v5915_v43 = vpack.c.bf16 %v1265_v32, %v1257_v30  ;;  %v5918_v47 = vpack.c.bf16 %v1282_v46, %v1274_v29  ;;  %v1273_v62 = vld [vmem:[%s6736_s5 + $0x320] sm:$0xff]  ;;  %v1298_v32 = vld [vmem:[%s6736_s5 + $0x3e8] sm:$0xff] }
 0x236   :  { %7068 = vst [vmem:[#allocation104_spill] sm:$0xff] %v5897_v59  ;;  %7069 = vst [vmem:[#allocation105_spill] sm:$0xff] %v5900_v60  ;;  %v5933_v29 = vpack.c.bf16 %v1281_v18, %v1273_v62  ;;  %v5938_v46 = vpack.c.bf16 %v1298_v32, %v1290_v15  ;;  %v1314_v18 = vld [vmem:[%s6736_s5 + $0x468] sm:$0xff]  ;;  %v5953_v15 = vpack.c.bf16 %v1297_v3, %v1289_v6  ;;  %v1305_v32 = vld [vmem:[%s6736_s5 + $0x420] sm:$0xff] }
 0x237   :  { %3195 = vmatpush1.bf16.msra.mxu1 %v5659_v27  ;;  %7070 = vst [vmem:[#allocation106_spill] sm:$0xff] %v5915_v43  ;;  %7071 = vst [vmem:[#allocation107_spill] sm:$0xff] %v5918_v47  ;;  %v5956_v62 = vpack.c.bf16 %v1314_v18, %v1306_v58  ;;  %v1330_v3 = vld [vmem:[%s6736_s5 + $0x4e8] sm:$0xff]  ;;  %v5971_v58 = vpack.c.bf16 %v1313_v55, %v1305_v32  ;;  %v1321_v18 = vld [vmem:[%s6736_s5 + $0x4a0] sm:$0xff] }
 0x238   :  { %3197 = vmatprep.subr.bf16.mxu1 %v5662_v21  ;;  %7072 = vst [vmem:[#allocation108_spill] sm:$0xff] %v5933_v29  ;;  %7073 = vst [vmem:[#allocation109_spill] sm:$0xff] %v5938_v46  ;;  %v5974_v6 = vpack.c.bf16 %v1330_v3, %v1322_v38  ;;  %v1346_v55 = vld [vmem:[%s6736_s5 + $0x568] sm:$0xff]  ;;  %v5989_v38 = vpack.c.bf16 %v1329_v35, %v1321_v18  ;;  %v720_v18 = vlaneseq }
 0x239   :  { %7074 = vst [vmem:[#allocation110_spill] sm:$0xff] %v5953_v15  ;;  %7075 = vst [vmem:[#allocation111_spill] sm:$0xff] %v5956_v62  ;;  %v1362_v35 = vld [vmem:[%s6736_s5 + $0x5e8] sm:$0xff] }
 0x23a   :  { %7076 = vst [vmem:[#allocation112_spill] sm:$0xff] %v5971_v58  ;;  %7077 = vst [vmem:[#allocation113_spill] sm:$0xff] %v5974_v6 }
 0x23b   :  { %3199 = vmatpush1.bf16.msra.mxu1 %v5677_v0  ;;  %7078 = vst [vmem:[#allocation114_spill] sm:$0xff] %v5989_v38 }
 0x23c   :  { %3201 = vmatprep.subr.bf16.mxu1 %v5680_v63 }
 0x23f   :  { %3203 = vmatpush1.bf16.msra.mxu1 %v5695_v51 }
 0x240   :  { %3205 = vmatprep.subr.bf16.mxu1 %v5698_v39 }
 0x243   :  { %3207 = vmatpush1.bf16.msra.mxu1 %v5715_v7 }
 0x244   :  { %3209 = vmatprep.subr.bf16.mxu1 %v5718_v4 }
 0x247   :  { %3211 = vmatpush1.bf16.msra.mxu1 %v5733_v25 }
 0x248   :  { %3213 = vmatprep.subr.bf16.mxu1 %v5736_v49 }
 0x24b   :  { %3215 = vmatpush1.bf16.msra.mxu1 %v5751_v5 }
 0x24c   :  { %3217 = vmatprep.subr.bf16.mxu1 %v5754_v42 }
 0x24f   :  { %3219 = vmatpush1.bf16.msra.mxu1 %v5769_v45 }
 0x250   :  { %3221 = vmatprep.subr.bf16.mxu1 %v5772_v33 }
 0x253   :  { %3223 = vmatpush1.bf16.msra.mxu1 %v5787_v28 }
 0x254   :  { %3225 = vmatprep.subr.bf16.mxu1 %v5790_v54 }
 0x257   :  { %3227 = vmatpush1.bf16.msra.mxu1 %v5805_v16 }
 0x258   :  { %3293 = vmatprep.subr.bf16.mxu1 %v5808_v12 }
 0x25a   :  { %1494 = vmatmul.mubr.f32.vlgmr.msra.gmra.mrb[32].mxu1 %v7029_v20 }
 0x25b   :  { %3295 = vmatpush1.bf16.msra.mxu1 %v5823_v2  ;;  %1635 = vmatprep.mubr.f32.mxu1 %v7029_v20 }
 0x25c   :  { %3297 = vmatprep.subr.bf16.mxu1 %v5826_v56 }
 0x25f   :  { %3299 = vmatpush1.bf16.msra.mxu1 %v5842_v52 }
 0x260   :  { %3301 = vmatprep.subr.bf16.mxu1 %v5846_v37 }
 0x263   :  { %3303 = vmatpush1.bf16.msra.mxu1 %v5861_v34 }
 0x264   :  { %3305 = vmatprep.subr.bf16.mxu1 %v5864_v23 }
 0x267   :  { %3307 = vmatpush1.bf16.msra.mxu1 %v5879_v14  ;;  %v1417_v14 = vld [vmem:[%s6736_s5 + $0x7a0] sm:$0xff] }
 0x268   :  { %3309 = vmatprep.subr.bf16.mxu1 %v5882_v9 }
 0x26b   :  { %3311 = vmatpush1.bf16.msra.mxu1 %v5897_v59  ;;  %v1409_v59 = vld [vmem:[%s6736_s5 + $0x760] sm:$0xff] }
 0x26c   :  { %3313 = vmatprep.subr.bf16.mxu1 %v5900_v60  ;;  %v1401_v60 = vld [vmem:[%s6736_s5 + $0x720] sm:$0xff] }
 0x26e   :  { %v5935_v30 = vpop.f32.mrb[82].mxu0 }
 0x26f   :  { %3315 = vmatpush1.bf16.msra.mxu1 %v5915_v43  ;;  %v5991_v32 = vpop.f32.mrb[83].mxu0 }
 0x270   :  { %3317 = vmatprep.subr.bf16.mxu1 %v5918_v47  ;;  %v1370_v47 = vld [vmem:[%s6736_s5 + $0x628] sm:$0xff] }
 0x273   :  { %3319 = vmatpush1.bf16.msra.mxu1 %v5933_v29  ;;  %v1361_v29 = vld [vmem:[%s6736_s5 + $0x5e0] sm:$0xff] }
 0x274   :  { %3321 = vmatprep.subr.bf16.mxu1 %v5938_v46  ;;  %v1338_v46 = vld [vmem:[%s6736_s5 + $0x528] sm:$0xff] }
 0x275   :  { %v5994_v3 = vpack.c.bf16 %v1346_v55, %v1338_v46 }
 0x277   :  { %3323 = vmatpush1.bf16.msra.mxu1 %v5953_v15  ;;  %7079 = vst [vmem:[#allocation115_spill] sm:$0xff] %v5994_v3  ;;  %v1345_v15 = vld [vmem:[%s6736_s5 + $0x560] sm:$0xff] }
 0x278   :  { %3325 = vmatprep.subr.bf16.mxu1 %v5956_v62  ;;  %v1337_v62 = vld [vmem:[%s6736_s5 + $0x520] sm:$0xff] }
 0x279   :  { %v6009_v46 = vpack.c.bf16 %v1345_v15, %v1337_v62  ;;  %v1378_v15 = vld [vmem:[%s6736_s5 + $0x668] sm:$0xff] }
 0x27b   :  { %3327 = vmatpush1.bf16.msra.mxu1 %v5971_v58  ;;  %v1354_v58 = vld [vmem:[%s6736_s5 + $0x5a8] sm:$0xff]  ;;  %7080 = vst [vmem:[#allocation116_spill] sm:$0xff] %v6009_v46 }
 0x27c   :  { %3329 = vmatprep.subr.bf16.mxu1 %v5974_v6  ;;  %v6012_v55 = vpack.c.bf16 %v1362_v35, %v1354_v58  ;;  %v1353_v6 = vld [vmem:[%s6736_s5 + $0x5a0] sm:$0xff]  ;;  %v6029_v58 = vshrl.u32 %v720_v18, 7  ;;  %v6032_v35 = vpack.c.bf16 %v1378_v15, %v1370_v47 }
 0x27d   :  { %v6027_v62 = vpack.c.bf16 %v1361_v29, %v1353_v6  ;;  %v1394_v29 = vld [vmem:[%s6736_s5 + $0x6e8] sm:$0xff]  ;;  %v6054_v18 = vld [vmem:[%s6735_s4] sm:$0xff] }
 0x27e   :  { %7081 = vst [vmem:[#allocation117_spill] sm:$0xff] %v6012_v55  ;;  %7083 = vst [vmem:[#allocation119_spill] sm:$0xff] %v6032_v35  ;;  %v726_v6 = vsub.s32 1, %v6029_v58 }
 0x27f   :  { %3331 = vmatpush1.bf16.msra.mxu1 %v5989_v38  ;;  %7082 = vst [vmem:[#allocation118_spill] sm:$0xff] %v6027_v62  ;;  %v1377_v38 = vld [vmem:[%s6736_s5 + $0x660] sm:$0xff] }
 0x280   :  { %3333 = vmatprep.subr.bf16.mxu1 %v5994_v3  ;;  %v1369_v3 = vld [vmem:[%s6736_s5 + $0x620] sm:$0xff] }
 0x281   :  { %v6047_v47 = vpack.c.bf16 %v1377_v38, %v1369_v3  ;;  %v1393_v38 = vld [vmem:[%s6736_s5 + $0x6e0] sm:$0xff]  ;;  %v1402_v3 = vld [vmem:[%s6736_s5 + $0x728] sm:$0xff] }
 0x283   :  { %3335 = vmatpush1.bf16.msra.mxu1 %v6009_v46  ;;  %v1386_v46 = vld [vmem:[%s6736_s5 + $0x6a8] sm:$0xff]  ;;  %7084 = vst [vmem:[#allocation120_spill] sm:$0xff] %v6047_v47 }
 0x284   :  { %3337 = vmatprep.subr.bf16.mxu1 %v6012_v55  ;;  %v6056_v15 = vpack.c.bf16 %v1394_v29, %v1386_v46  ;;  %v1385_v55 = vld [vmem:[%s6736_s5 + $0x6a0] sm:$0xff]  ;;  %v6072_v46 = vrot.slane %v6054_v18, %v726_v6  ;;  %v1426_v6 = vld [vmem:[%s6736_s5 + $0x7e8] sm:$0xff] }
 0x285   :  { %v6074_v29 = vpack.c.bf16 %v1393_v38, %v1385_v55  ;;  %v1418_v55 = vld [vmem:[%s6736_s5 + $0x7a8] sm:$0xff] }
 0x286   :  { %7085 = vst [vmem:[#allocation121_spill] sm:$0xff] %v6056_v15  ;;  %v6104_v9 = vpack.c.bf16 %v1426_v6, %v1418_v55 }
 0x287   :  { %3339 = vmatpush1.bf16.msra.mxu1 %v6027_v62  ;;  %7086 = vst [vmem:[#allocation122_spill] sm:$0xff] %v6074_v29  ;;  %v722_v62 = vsub.s32 0, %v6029_v58 }
 0x288   :  { %3341 = vmatprep.subr.bf16.mxu1 %v6032_v35  ;;  %v1410_v35 = vld [vmem:[%s6736_s5 + $0x768] sm:$0xff]  ;;  %7090 = vst [vmem:[#allocation126_spill] sm:$0xff] %v6104_v9 }
 0x289   :  { %v6078_v43 = vpack.c.bf16 %v1410_v35, %v1402_v3  ;;  %v6098_v3 = vpack.c.bf16 %v1409_v59, %v1401_v60 }
 0x28b   :  { %3343 = vmatpush1.bf16.msra.mxu1 %v6047_v47  ;;  %7087 = vst [vmem:[#allocation123_spill] sm:$0xff] %v6078_v43  ;;  %7089 = vst [vmem:[#allocation125_spill] sm:$0xff] %v6098_v3 }
 0x28c   :  { %3345 = vmatprep.subr.bf16.mxu1 %v6056_v15  ;;  %v6101_v15 = vrot.slane %v6054_v18, %v722_v62 }
 0x28d   :  { %v6086_v47 = vpop.f32.mrb[0].mxu1 }
 0x28e   :  { %v828_v35 = vpop.f32.mrb[1].mxu1 }
 0x28f   :  { %v6095_v38 = vadd.f32 %v828_v35, %v6072_v46  ;;  %3347 = vmatpush1.bf16.msra.mxu1 %v6074_v29  ;;  %v1425_v35 = vld [vmem:[%s6736_s5 + $0x7e0] sm:$0xff] }
 0x290   :  { %3349 = vmatprep.subr.bf16.mxu1 %v6078_v43  ;;  %v6119_v62 = vpack.c.bf16 %v1425_v35, %v1417_v14  ;;  %v734_v35 = vsub.s32 3, %v6029_v58 }
 0x291   :  { %7088 = vst [vmem:[#allocation124_spill] sm:$0xff] %v6095_v38  ;;  %v832_v38 = vpop.f32.mrb[2].mxu1 }
 0x292   :  { %v6113_v29 = vadd.f32 %v832_v38, %v6101_v15  ;;  %v834_v59 = vpop.f32.mrb[3].mxu1  ;;  %7093 = vst [vmem:[#allocation129_spill] sm:$0xff] %v6119_v62 }
 0x293   :  { %v6116_v60 = vadd.f32 %v834_v59, %v6072_v46  ;;  %3351 = vmatpush1.bf16.msra.mxu1 %v6098_v3 }
 0x294   :  { %7091 = vst [vmem:[#allocation127_spill] sm:$0xff] %v6113_v29  ;;  %3353 = vmatprep.subr.bf16.mxu1 %v6104_v9 }
 0x295   :  { %7092 = vst [vmem:[#allocation128_spill] sm:$0xff] %v6116_v60  ;;  %v838_v55 = vpop.f32.mrb[4].mxu1 }
 0x296   :  { %v6123_v6 = vadd.f32 %v838_v55, %v6101_v15  ;;  %v840_v43 = vpop.f32.mrb[5].mxu1  ;;  %v735_v55 = vrot.slane %v6054_v18, %v734_v35 }
 0x297   :  { %v6126_v23 = vadd.f32 %v840_v43, %v6072_v46  ;;  %3355 = vmatpush1.bf16.msra.mxu1 %v6119_v62  ;;  %v730_v43 = vsub.s32 2, %v6029_v58 }
 0x298   :  { %7094 = vst [vmem:[#allocation130_spill] sm:$0xff] %v6123_v6  ;;  %3421 = vmatprep.subr.bf16.mxu1 %v5509_v24 }
 0x299   :  { %7095 = vst [vmem:[#allocation131_spill] sm:$0xff] %v6126_v23  ;;  %v844_v38 = vpop.f32.mrb[6].mxu1 }
 0x29a   :  { %v6131_v59 = vadd.f32 %v844_v38, %v6101_v15  ;;  %1636 = vmatmul.mubr.f32.vlgmr.msra.gmra.mrb[34].mxu1 %v7029_v20  ;;  %v6134_v14 = vpop.f32.mrb[7].mxu1  ;;  %v731_v20 = vrot.slane %v6054_v18, %v730_v43 }
 0x29b   :  { %3423 = vmatpush1.bf16.msra.mxu1 %v5523_v57 }
 0x29c   :  { %7096 = vst [vmem:[#allocation132_spill] sm:$0xff] %v6131_v59  ;;  %3425 = vmatprep.subr.bf16.mxu1 %v5526_v61 }
 0x29f   :  { %3427 = vmatpush1.bf16.msra.mxu1 %v5543_v22 }
 0x2a0   :  { %3429 = vmatprep.subr.bf16.mxu1 %v5546_v1 }
 0x2a3   :  { %3431 = vmatpush1.bf16.msra.mxu1 %v5563_v26 }
 0x2a4   :  { %3433 = vmatprep.subr.bf16.mxu1 %v5566_v53 }
 0x2a7   :  { %3435 = vmatpush1.bf16.msra.mxu1 %v5583_v8 }
 0x2a8   :  { %3437 = vmatprep.subr.bf16.mxu1 %v5586_v11 }
 0x2ab   :  { %3439 = vmatpush1.bf16.msra.mxu1 %v5602_v48 }
 0x2ac   :  { %3441 = vmatprep.subr.bf16.mxu1 %v5606_v50 }
 0x2ad   :  { %v915_v38 = vpop.f32.mrb[8].mxu1 }
 0x2ae   :  { %v916_v59 = vadd.f32 %v915_v38, %v731_v20  ;;  %v917_v60 = vpop.f32.mrb[9].mxu1 }
 0x2af   :  { %v6150_v6 = vadd.f32 %v917_v60, %v735_v55  ;;  %3443 = vmatpush1.bf16.msra.mxu1 %v5621_v10 }
 0x2b0   :  { %v6154_v23 = vadd.f32 %v5641_v40, %v916_v59  ;;  %3445 = vmatprep.subr.bf16.mxu1 %v5624_v31 }
 0x2b1   :  { %7097 = vst [vmem:[#allocation133_spill] sm:$0xff] %v6150_v6  ;;  %v921_v29 = vpop.f32.mrb[10].mxu1 }
 0x2b2   :  { %v6157_v43 = vadd.f32 %v921_v29, %v731_v20  ;;  %v923_v35 = vpop.f32.mrb[11].mxu1 }
 0x2b3   :  { %v6159_v11 = vadd.f32 %v923_v35, %v735_v55  ;;  %3447 = vmatpush1.bf16.msra.mxu1 %v5639_v13 }
 0x2b4   :  { %7098 = vst [vmem:[#allocation134_spill] sm:$0xff] %v6157_v43  ;;  %3449 = vmatprep.subr.bf16.mxu1 %v5644_v19  ;;  %v750_v43 = vsub.s32 7, %v6029_v58 }
 0x2b5   :  { %7099 = vst [vmem:[#allocation135_spill] sm:$0xff] %v6159_v11  ;;  %v927_v38 = vpop.f32.mrb[12].mxu1 }
 0x2b6   :  { %v6163_v60 = vadd.f32 %v927_v38, %v731_v20  ;;  %v929_v6 = vpop.f32.mrb[13].mxu1 }
 0x2b7   :  { %v6165_v10 = vadd.f32 %v929_v6, %v735_v55  ;;  %3451 = vmatpush1.bf16.msra.mxu1 %v5659_v27  ;;  %v742_v6 = vsub.s32 5, %v6029_v58 }
 0x2b8   :  { %7100 = vst [vmem:[#allocation136_spill] sm:$0xff] %v6163_v60  ;;  %3453 = vmatprep.subr.bf16.mxu1 %v5662_v21 }
 0x2b9   :  { %7101 = vst [vmem:[#allocation137_spill] sm:$0xff] %v6165_v10  ;;  %v933_v40 = vpop.f32.mrb[14].mxu1 }
 0x2ba   :  { %v6169_v29 = vadd.f32 %v933_v40, %v731_v20  ;;  %v935_v59 = vpop.f32.mrb[15].mxu1  ;;  %v6182_v20 = vrot.slane %v6054_v18, %v742_v6 }
 0x2bb   :  { %v936_v35 = vadd.f32 %v935_v59, %v735_v55  ;;  %3455 = vmatpush1.bf16.msra.mxu1 %v5677_v0 }
 0x2bc   :  { %7102 = vst [vmem:[#allocation138_spill] sm:$0xff] %v6169_v29  ;;  %3457 = vmatprep.subr.bf16.mxu1 %v5680_v63 }
 0x2bd   :  { %v1716_v11 = vadd.f32 %v5706_v41, %v936_v35  ;;  %v738_v41 = vsub.s32 4, %v6029_v58 }
 0x2bf   :  { %3459 = vmatpush1.bf16.msra.mxu1 %v5695_v51  ;;  %v6194_v59 = vrot.slane %v6054_v18, %v738_v41 }
 0x2c0   :  { %3461 = vmatprep.subr.bf16.mxu1 %v5698_v39 }
 0x2c3   :  { %3463 = vmatpush1.bf16.msra.mxu1 %v5715_v7 }
 0x2c4   :  { %3465 = vmatprep.subr.bf16.mxu1 %v5718_v4 }
 0x2c7   :  { %3467 = vmatpush1.bf16.msra.mxu1 %v5733_v25 }
 0x2c8   :  { %3469 = vmatprep.subr.bf16.mxu1 %v5736_v49 }
 0x2cb   :  { %3471 = vmatpush1.bf16.msra.mxu1 %v5751_v5 }
 0x2cc   :  { %3473 = vmatprep.subr.bf16.mxu1 %v5754_v42 }
 0x2cd   :  { %v6187_v55 = vpop.f32.mrb[16].mxu1 }
 0x2ce   :  { %v1006_v38 = vpop.f32.mrb[17].mxu1 }
 0x2cf   :  { %v6190_v40 = vadd.f32 %v1006_v38, %v6182_v20  ;;  %3475 = vmatpush1.bf16.msra.mxu1 %v5769_v45 }
 0x2d0   :  { %3477 = vmatprep.subr.bf16.mxu1 %v5772_v33 }
 0x2d1   :  { %7103 = vst [vmem:[#allocation139_spill] sm:$0xff] %v6190_v40  ;;  %v1010_v35 = vpop.f32.mrb[18].mxu1 }
 0x2d2   :  { %v6198_v6 = vadd.f32 %v1010_v35, %v6194_v59  ;;  %v1012_v29 = vpop.f32.mrb[19].mxu1 }
 0x2d3   :  { %v6201_v60 = vadd.f32 %v1012_v29, %v6182_v20  ;;  %3479 = vmatpush1.bf16.msra.mxu1 %v5787_v28 }
 0x2d4   :  { %7104 = vst [vmem:[#allocation140_spill] sm:$0xff] %v6198_v6  ;;  %3481 = vmatprep.subr.bf16.mxu1 %v5790_v54  ;;  %v746_v6 = vsub.s32 6, %v6029_v58 }
 0x2d5   :  { %7105 = vst [vmem:[#allocation141_spill] sm:$0xff] %v6201_v60  ;;  %v1016_v38 = vpop.f32.mrb[20].mxu1 }
 0x2d6   :  { %v6206_v40 = vadd.f32 %v1016_v38, %v6194_v59  ;;  %v1018_v41 = vpop.f32.mrb[21].mxu1  ;;  %v747_v38 = vrot.slane %v6054_v18, %v746_v6 }
 0x2d7   :  { %v6209_v10 = vadd.f32 %v1018_v41, %v6182_v20  ;;  %3483 = vmatpush1.bf16.msra.mxu1 %v5805_v16 }
 0x2d8   :  { %7106 = vst [vmem:[#allocation142_spill] sm:$0xff] %v6206_v40  ;;  %3549 = vmatprep.subr.bf16.mxu1 %v5808_v12  ;;  %v751_v40 = vrot.slane %v6054_v18, %v750_v43 }
 0x2d9   :  { %7107 = vst [vmem:[#allocation143_spill] sm:$0xff] %v6209_v10  ;;  %v1022_v35 = vpop.f32.mrb[22].mxu1 }
 0x2da   :  { %v6214_v29 = vadd.f32 %v1022_v35, %v6194_v59  ;;  %v6216_v60 = vpop.f32.mrb[23].mxu1 }
 0x2dc   :  { %7108 = vst [vmem:[#allocation144_spill] sm:$0xff] %v6214_v29 }
 0x2ed   :  { %v1093_v41 = vpop.f32.mrb[24].mxu1 }
 0x2ee   :  { %v1094_v10 = vadd.f32 %v1093_v41, %v747_v38  ;;  %v1095_v54 = vpop.f32.mrb[25].mxu1 }
 0x2ef   :  { %v6222_v16 = vadd.f32 %v1095_v54, %v751_v40 }
 0x2f0   :  { %v1719_v12 = vadd.f32 %v5935_v30, %v1094_v10  ;;  %v2948_v10 = vmul.f32 -1.442695, %v6154_v23  ;;  %v827_v30 = vadd.f32 %v6086_v47, %v6101_v15 }
 0x2f1   :  { %7109 = vst [vmem:[#allocation145_spill] sm:$0xff] %v6222_v16  ;;  %v1099_v28 = vpop.f32.mrb[26].mxu1 }
 0x2f2   :  { %v6225_v35 = vadd.f32 %v1099_v28, %v747_v38  ;;  %v1101_v29 = vpop.f32.mrb[27].mxu1  ;;  %v2949_v28 = vmul.f32 -1.442695, %v1716_v11  ;;  %4228 = vpow2.f32 %v2948_v10 }
 0x2f3   :  { %v6227_v33 = vadd.f32 %v1101_v29, %v751_v40 }
 0x2f4   :  { %4230 = vpow2.f32 %v2949_v28 }
 0x2f5   :  { %7110 = vst [vmem:[#allocation146_spill] sm:$0xff] %v6227_v33  ;;  %v1105_v45 = vpop.f32.mrb[28].mxu1 }
 0x2f6   :  { %v6229_v42 = vadd.f32 %v1105_v45, %v747_v38  ;;  %v1107_v58 = vpop.f32.mrb[29].mxu1  ;;  %v847_v45 = vadd.f32 %v6134_v14, %v6072_v46 }
 0x2f7   :  { %v6231_v6 = vadd.f32 %v1107_v58, %v751_v40 }
 0x2f8   :  { %7111 = vst [vmem:[#allocation147_spill] sm:$0xff] %v6229_v42  ;;  %v7136_v42 = vld [vmem:[#allocation53_spill] sm:$0xff] }
 0x2f9   :  { %v1111_v18 = vpop.f32.mrb[30].mxu1 }
 0x2fa   :  { %v6233_v43 = vadd.f32 %v1111_v18, %v747_v38  ;;  %v1113_v41 = vpop.f32.mrb[31].mxu1 }
 0x2fb   :  { %v1114_v54 = vadd.f32 %v1113_v41, %v751_v40 }
 0x2fc   :  { %7112 = vst [vmem:[#allocation148_spill] sm:$0xff] %v6233_v43 }
 0x2fd   :  { %v1720_v16 = vadd.f32 %v5991_v32, %v1114_v54  ;;  %v4229_v32 = vpop.eup %4228 }
 0x2fe   :  { %v4231_v40 = vpop.eup %4230  ;;  %v1741_v23 = vadd.f32 1.0, %v4229_v32 }
 0x2ff   :  { %v1742_v11 = vadd.f32 1.0, %v4231_v40 }
 0x32d   :  { %v1495_v29 = vpop.f32.mrb[32].mxu1 }
 0x32e   :  { %v1713_v58 = vadd.f32 %v1495_v29, %v827_v30  ;;  %v1497_v33 = vpop.f32.mrb[33].mxu1 }
 0x32f   :  { %v1714_v38 = vadd.f32 %v1497_v33, %v847_v45 }
 0x330   :  { %v2946_v18 = vmul.f32 -1.442695, %v1713_v58 }
 0x331   :  { %v2947_v43 = vmul.f32 -1.442695, %v1714_v38 }
 0x332   :  { %4232 = vpow2.f32 %v2946_v18 }
 0x333   :  { %4234 = vpow2.f32 %v2947_v43 }
 0x334   :  { %4236 = vrcp.f32 %v1741_v23 }
 0x335   :  { %4238 = vrcp.f32 %v1742_v11 }
 0x336   :  { %4240 = vtanh.f32 %v1719_v12  ;;  %v1025_v12 = vadd.f32 %v6216_v60, %v6182_v20 }
 0x337   :  { %4242 = vtanh.f32 %v1720_v16  ;;  %v1005_v16 = vadd.f32 %v6187_v55, %v6194_v59 }
 0x33c   :  { %v4233_v41 = vpop.eup %4232 }
 0x33d   :  { %v4235_v54 = vpop.eup %4234  ;;  %v1739_v47 = vadd.f32 1.0, %v4233_v41 }
 0x33e   :  { %v1740_v15 = vadd.f32 1.0, %v4235_v54  ;;  %v4237_v46 = vpop.eup %4236 }
 0x33f   :  { %4244 = vrcp.f32 %v1739_v47  ;;  %v4239_v33 = vpop.eup %4238  ;;  %v1759_v30 = vmul.f32 0.0, %v4237_v46 }
 0x340   :  { %4246 = vrcp.f32 %v1740_v15  ;;  %v4241_v14 = vpop.eup %4240  ;;  %v1760_v29 = vmul.f32 0.0, %v4239_v33 }
 0x341   :  { %v4243_v10 = vpop.eup %4242 }
 0x349   :  { %v4245_v28 = vpop.eup %4244 }
 0x34a   :  { %v4247_v43 = vpop.eup %4246  ;;  %v1761_v45 = vmul.f32 %v4245_v28, %v4241_v14  ;;  %v7113_v28 = vld [vmem:[#allocation41_spill] sm:$0xff] }
 0x34b   :  { %v1762_v58 = vmul.f32 %v4247_v43, %v4243_v10  ;;  %v7114_v43 = vld [vmem:[#allocation42_spill] sm:$0xff] }
 0x34c   :  { %v6241_v38 = vadd.f32 %v1761_v45, %v1759_v30  ;;  %v7115_v30 = vld [vmem:[#allocation101_spill] sm:$0xff]  ;;  %v7116_v45 = vld [vmem:[#allocation43_spill] sm:$0xff] }
 0x34d   :  { %v6243_v18 = vadd.f32 %v1762_v58, %v1760_v29  ;;  %v7117_v29 = vld [vmem:[#allocation102_spill] sm:$0xff]  ;;  %v7118_v58 = vld [vmem:[#allocation44_spill] sm:$0xff] }
 0x36d   :  { %v1637_v32 = vpop.f32.mrb[34].mxu1 }
 0x36e   :  { %v1717_v40 = vadd.f32 %v1637_v32, %v1005_v16  ;;  %v1639_v23 = vpop.f32.mrb[35].mxu1  ;;  %v7119_v16 = vld [vmem:[#allocation103_spill] sm:$0xff]  ;;  %v7121_v32 = vld [vmem:[#allocation104_spill] sm:$0xff] }
 0x36f   :  { %v1718_v11 = vadd.f32 %v1639_v23, %v1025_v12  ;;  %v7120_v12 = vld [vmem:[#allocation45_spill] sm:$0xff] }
 0x370   :  { %v2950_v41 = vmul.f32 -1.442695, %v1717_v40  ;;  %v7122_v40 = vld [vmem:[#allocation46_spill] sm:$0xff]  ;;  %v7123_v23 = vld [vmem:[#allocation105_spill] sm:$0xff] }
 0x371   :  { %v2951_v54 = vmul.f32 -1.442695, %v1718_v11  ;;  %v7124_v11 = vld [vmem:[#allocation47_spill] sm:$0xff] }
 0x372   :  { %4248 = vpow2.f32 %v2950_v41  ;;  %v7125_v41 = vld [vmem:[#allocation106_spill] sm:$0xff] }
 0x373   :  { %4250 = vpow2.f32 %v2951_v54  ;;  %v7126_v54 = vld [vmem:[#allocation48_spill] sm:$0xff] }
 0x374   :  { %4252 = vtanh.f32 %v6243_v18 }
 0x37c   :  { %v4249_v47 = vpop.eup %4248 }
 0x37d   :  { %v4251_v15 = vpop.eup %4250  ;;  %v1743_v46 = vadd.f32 1.0, %v4249_v47  ;;  %v7127_v47 = vld [vmem:[#allocation107_spill] sm:$0xff] }
 0x37e   :  { %v1744_v33 = vadd.f32 1.0, %v4251_v15  ;;  %v4253_v55 = vpop.eup %4252  ;;  %v7128_v15 = vld [vmem:[#allocation49_spill] sm:$0xff] }
 0x37f   :  { %4254 = vrcp.f32 %v1743_v46  ;;  %v7129_v46 = vld [vmem:[#allocation108_spill] sm:$0xff] }
 0x380   :  { %4256 = vrcp.f32 %v1744_v33  ;;  %v7130_v33 = vld [vmem:[#allocation50_spill] sm:$0xff] }
 0x381   :  { %4258 = vtanh.f32 %v6241_v38 }
 0x389   :  { %v4255_v60 = vpop.eup %4254 }
 0x38a   :  { %v4257_v20 = vpop.eup %4256 }
 0x38b   :  { %v4259_v59 = vpop.eup %4258  ;;  %v1768_v14 = vmul.f32 %v4257_v20, %v4253_v55  ;;  %v7131_v55 = vld [vmem:[#allocation109_spill] sm:$0xff]  ;;  %v7133_v20 = vld [vmem:[#allocation110_spill] sm:$0xff] }
 0x38c   :  { %v6251_v10 = vmul.f32 %v4259_v59, %v4255_v60  ;;  %v7132_v60 = vld [vmem:[#allocation51_spill] sm:$0xff]  ;;  %v7134_v59 = vld [vmem:[#allocation52_spill] sm:$0xff] }
 0x38d   :  { %1833 = vmatprep.mubr.f32.mxu1 %v1768_v14  ;;  %1904 = vmatprep.mubr.f32.mxu0 %v1768_v14 }
 0x38e   :  { %1834 = vmatmul.mubr.f32.vlgmr.msra.gmra.mrb[36].mxu1 %v6251_v10  ;;  %1905 = vmatmul.mubr.f32.vlgmr.msra.gmra.mrb[84].mxu0 %v6251_v10 }
 0x38f   :  { %3551 = vmatpush1.bf16.msra.mxu1 %v5823_v2  ;;  %3615 = vmatpush1.bf16.msra.mxu0 %v5099_v17 }
 0x390   :  { %1975 = vmatprep.mubr.f32.mxu1 %v1768_v14  ;;  %2046 = vmatprep.mubr.f32.mxu0 %v1768_v14  ;;  %v7135_v14 = vld [vmem:[#allocation111_spill] sm:$0xff] }
 0x391   :  { %3553 = vmatprep.subr.bf16.mxu1 %v5826_v56  ;;  %3617 = vmatprep.subr.bf16.mxu0 %v5116_v44 }
 0x393   :  { %3555 = vmatpush1.bf16.msra.mxu1 %v5842_v52  ;;  %3619 = vmatpush1.bf16.msra.mxu0 %v5124_v36 }
 0x394   :  { %3557 = vmatprep.subr.bf16.mxu1 %v5846_v37  ;;  %3621 = vmatprep.subr.bf16.mxu0 %v7113_v28 }
 0x397   :  { %3559 = vmatpush1.bf16.msra.mxu1 %v5861_v34  ;;  %3623 = vmatpush1.bf16.msra.mxu0 %v7114_v43 }
 0x398   :  { %3561 = vmatprep.subr.bf16.mxu1 %v7115_v30  ;;  %3625 = vmatprep.subr.bf16.mxu0 %v7116_v45 }
 0x39b   :  { %3563 = vmatpush1.bf16.msra.mxu1 %v7117_v29  ;;  %3627 = vmatpush1.bf16.msra.mxu0 %v7118_v58 }
 0x39c   :  { %3565 = vmatprep.subr.bf16.mxu1 %v7119_v16  ;;  %3629 = vmatprep.subr.bf16.mxu0 %v7120_v12 }
 0x39f   :  { %3567 = vmatpush1.bf16.msra.mxu1 %v7121_v32  ;;  %3631 = vmatpush1.bf16.msra.mxu0 %v7122_v40 }
 0x3a0   :  { %3569 = vmatprep.subr.bf16.mxu1 %v7123_v23  ;;  %3633 = vmatprep.subr.bf16.mxu0 %v7124_v11 }
 0x3a3   :  { %3571 = vmatpush1.bf16.msra.mxu1 %v7125_v41  ;;  %3635 = vmatpush1.bf16.msra.mxu0 %v7126_v54  ;;  %v7137_v54 = vld [vmem:[#allocation112_spill] sm:$0xff] }
 0x3a4   :  { %3573 = vmatprep.subr.bf16.mxu1 %v7127_v47  ;;  %3637 = vmatprep.subr.bf16.mxu0 %v7128_v15  ;;  %v7138_v47 = vld [vmem:[#allocation54_spill] sm:$0xff]  ;;  %v7139_v15 = vld [vmem:[#allocation113_spill] sm:$0xff] }
 0x3a7   :  { %3575 = vmatpush1.bf16.msra.mxu1 %v7129_v46  ;;  %3639 = vmatpush1.bf16.msra.mxu0 %v7130_v33  ;;  %v7140_v46 = vld [vmem:[#allocation55_spill] sm:$0xff]  ;;  %v7141_v33 = vld [vmem:[#allocation114_spill] sm:$0xff] }
 0x3a8   :  { %3577 = vmatprep.subr.bf16.mxu1 %v7131_v55  ;;  %3641 = vmatprep.subr.bf16.mxu0 %v7132_v60  ;;  %v7142_v55 = vld [vmem:[#allocation56_spill] sm:$0xff]  ;;  %v7143_v60 = vld [vmem:[#allocation115_spill] sm:$0xff] }
 0x3ab   :  { %3579 = vmatpush1.bf16.msra.mxu1 %v7133_v20  ;;  %3643 = vmatpush1.bf16.msra.mxu0 %v7134_v59  ;;  %v7144_v20 = vld [vmem:[#allocation57_spill] sm:$0xff]  ;;  %v7145_v59 = vld [vmem:[#allocation116_spill] sm:$0xff] }
 0x3ac   :  { %3581 = vmatprep.subr.bf16.mxu1 %v7135_v14  ;;  %3645 = vmatprep.subr.bf16.mxu0 %v7136_v42  ;;  %v7146_v14 = vld [vmem:[#allocation58_spill] sm:$0xff]  ;;  %v7147_v42 = vld [vmem:[#allocation117_spill] sm:$0xff] }
 0x3af   :  { %3583 = vmatpush1.bf16.msra.mxu1 %v7137_v54  ;;  %3647 = vmatpush1.bf16.msra.mxu0 %v7138_v47  ;;  %v7148_v54 = vld [vmem:[#allocation59_spill] sm:$0xff]  ;;  %v7149_v47 = vld [vmem:[#allocation118_spill] sm:$0xff] }
 0x3b0   :  { %3585 = vmatprep.subr.bf16.mxu1 %v7139_v15  ;;  %3649 = vmatprep.subr.bf16.mxu0 %v7140_v46  ;;  %v7150_v15 = vld [vmem:[#allocation60_spill] sm:$0xff]  ;;  %v7151_v46 = vld [vmem:[#allocation119_spill] sm:$0xff] }
 0x3b3   :  { %3587 = vmatpush1.bf16.msra.mxu1 %v7141_v33  ;;  %3651 = vmatpush1.bf16.msra.mxu0 %v7142_v55  ;;  %v7152_v33 = vld [vmem:[#allocation61_spill] sm:$0xff]  ;;  %v7153_v55 = vld [vmem:[#allocation120_spill] sm:$0xff] }
 0x3b4   :  { %3589 = vmatprep.subr.bf16.mxu1 %v7143_v60  ;;  %3653 = vmatprep.subr.bf16.mxu0 %v7144_v20  ;;  %v7154_v60 = vld [vmem:[#allocation62_spill] sm:$0xff]  ;;  %v7155_v20 = vld [vmem:[#allocation121_spill] sm:$0xff] }
 0x3b7   :  { %3591 = vmatpush1.bf16.msra.mxu1 %v7145_v59  ;;  %3655 = vmatpush1.bf16.msra.mxu0 %v7146_v14  ;;  %v7156_v59 = vld [vmem:[#allocation63_spill] sm:$0xff]  ;;  %v7157_v14 = vld [vmem:[#allocation122_spill] sm:$0xff] }
 0x3b8   :  { %3593 = vmatprep.subr.bf16.mxu1 %v7147_v42  ;;  %3657 = vmatprep.subr.bf16.mxu0 %v7148_v54  ;;  %v7158_v42 = vld [vmem:[#allocation64_spill] sm:$0xff]  ;;  %v7159_v54 = vld [vmem:[#allocation123_spill] sm:$0xff] }
 0x3bb   :  { %3595 = vmatpush1.bf16.msra.mxu1 %v7149_v47  ;;  %3659 = vmatpush1.bf16.msra.mxu0 %v7150_v15  ;;  %v7160_v47 = vld [vmem:[#allocation65_spill] sm:$0xff] }
 0x3bc   :  { %3597 = vmatprep.subr.bf16.mxu1 %v7151_v46  ;;  %3661 = vmatprep.subr.bf16.mxu0 %v7152_v33  ;;  %v7161_v46 = vld [vmem:[#allocation66_spill] sm:$0xff] }
 0x3bf   :  { %3599 = vmatpush1.bf16.msra.mxu1 %v7153_v55  ;;  %3663 = vmatpush1.bf16.msra.mxu0 %v7154_v60  ;;  %v7162_v55 = vld [vmem:[#allocation67_spill] sm:$0xff] }
 0x3c0   :  { %3601 = vmatprep.subr.bf16.mxu1 %v7155_v20  ;;  %3665 = vmatprep.subr.bf16.mxu0 %v7156_v59  ;;  %v7163_v20 = vld [vmem:[#allocation68_spill] sm:$0xff] }
 0x3c3   :  { %3603 = vmatpush1.bf16.msra.mxu1 %v7157_v14  ;;  %3667 = vmatpush1.bf16.msra.mxu0 %v7158_v42  ;;  %v7164_v14 = vld [vmem:[#allocation8_spill] sm:$0xff] }
 0x3c4   :  { %3605 = vmatprep.subr.bf16.mxu1 %v7159_v54  ;;  %3669 = vmatprep.subr.bf16.mxu0 %v7160_v47 }
 0x3c7   :  { %3607 = vmatpush1.bf16.msra.mxu1 %v6098_v3  ;;  %3671 = vmatpush1.bf16.msra.mxu0 %v7161_v46  ;;  %v7165_v3 = vld [vmem:[#allocation9_spill] sm:$0xff] }
 0x3c8   :  { %3609 = vmatprep.subr.bf16.mxu1 %v6104_v9  ;;  %3673 = vmatprep.subr.bf16.mxu0 %v7162_v55  ;;  %v7166_v9 = vld [vmem:[#allocation10_spill] sm:$0xff] }
 0x3cb   :  { %3611 = vmatpush1.bf16.msra.mxu1 %v6119_v62  ;;  %3675 = vmatpush1.bf16.msra.mxu0 %v7163_v20  ;;  %v7167_v62 = vld [vmem:[#allocation11_spill] sm:$0xff] }
 0x3cc   :  { %3677 = vmatprep.subr.bf16.mxu1 %v5509_v24  ;;  %3741 = vmatprep.subr.bf16.mxu0 %v7164_v14  ;;  %v7168_v24 = vld [vmem:[#allocation12_spill] sm:$0xff]  ;;  %v7169_v14 = vld [vmem:[#allocation13_spill] sm:$0xff] }
 0x3ce   :  { %1976 = vmatmul.mubr.f32.vlgmr.msra.gmra.mrb[38].mxu1 %v6251_v10  ;;  %2047 = vmatmul.mubr.f32.vlgmr.msra.gmra.mrb[86].mxu0 %v6251_v10  ;;  %v7170_v10 = vld [vmem:[#allocation14_spill] sm:$0xff] }
 0x3cf   :  { %3679 = vmatpush1.bf16.msra.mxu1 %v5523_v57  ;;  %3743 = vmatpush1.bf16.msra.mxu0 %v7165_v3 }
 0x3d0   :  { %3681 = vmatprep.subr.bf16.mxu1 %v5526_v61  ;;  %3745 = vmatprep.subr.bf16.mxu0 %v7166_v9  ;;  %v7171_v61 = vld [vmem:[#allocation15_spill] sm:$0xff]  ;;  %v7172_v9 = vld [vmem:[#allocation76_spill] sm:$0xff] }
 0x3d3   :  { %3683 = vmatpush1.bf16.msra.mxu1 %v5543_v22  ;;  %3747 = vmatpush1.bf16.msra.mxu0 %v7167_v62  ;;  %v7173_v22 = vld [vmem:[#allocation16_spill] sm:$0xff] }
 0x3d4   :  { %3685 = vmatprep.subr.bf16.mxu1 %v5546_v1  ;;  %3749 = vmatprep.subr.bf16.mxu0 %v7168_v24  ;;  %v7174_v1 = vld [vmem:[#allocation17_spill] sm:$0xff] }
 0x3d7   :  { %3687 = vmatpush1.bf16.msra.mxu1 %v5563_v26  ;;  %3751 = vmatpush1.bf16.msra.mxu0 %v7169_v14  ;;  %v7175_v26 = vld [vmem:[#allocation18_spill] sm:$0xff]  ;;  %v7176_v14 = vld [vmem:[#allocation79_spill] sm:$0xff] }
 0x3d8   :  { %3689 = vmatprep.subr.bf16.mxu1 %v5566_v53  ;;  %3753 = vmatprep.subr.bf16.mxu0 %v7170_v10  ;;  %v7177_v53 = vld [vmem:[#allocation19_spill] sm:$0xff] }
 0x3db   :  { %3691 = vmatpush1.bf16.msra.mxu1 %v5583_v8  ;;  %3755 = vmatpush1.bf16.msra.mxu0 %v7171_v61  ;;  %v7178_v8 = vld [vmem:[#allocation20_spill] sm:$0xff] }
 0x3dc   :  { %3693 = vmatprep.subr.bf16.mxu1 %v7172_v9  ;;  %3757 = vmatprep.subr.bf16.mxu0 %v7173_v22  ;;  %v7179_v9 = vld [vmem:[#allocation21_spill] sm:$0xff] }
 0x3df   :  { %3695 = vmatpush1.bf16.msra.mxu1 %v5602_v48  ;;  %3759 = vmatpush1.bf16.msra.mxu0 %v7174_v1  ;;  %v7180_v48 = vld [vmem:[#allocation22_spill] sm:$0xff] }
 0x3e0   :  { %3697 = vmatprep.subr.bf16.mxu1 %v5606_v50  ;;  %3761 = vmatprep.subr.bf16.mxu0 %v7175_v26  ;;  %v7181_v50 = vld [vmem:[#allocation23_spill] sm:$0xff] }
 0x3e3   :  { %3699 = vmatpush1.bf16.msra.mxu1 %v7176_v14  ;;  %3763 = vmatpush1.bf16.msra.mxu0 %v7177_v53  ;;  %v7182_v14 = vld [vmem:[#allocation24_spill] sm:$0xff] }
 0x3e4   :  { %3701 = vmatprep.subr.bf16.mxu1 %v5624_v31  ;;  %3765 = vmatprep.subr.bf16.mxu0 %v7178_v8  ;;  %v7183_v31 = vld [vmem:[#allocation25_spill] sm:$0xff] }
 0x3e7   :  { %3703 = vmatpush1.bf16.msra.mxu1 %v5639_v13  ;;  %3767 = vmatpush1.bf16.msra.mxu0 %v7179_v9  ;;  %v7184_v13 = vld [vmem:[#allocation26_spill] sm:$0xff] }
 0x3e8   :  { %3705 = vmatprep.subr.bf16.mxu1 %v5644_v19  ;;  %3769 = vmatprep.subr.bf16.mxu0 %v7180_v48  ;;  %v7185_v19 = vld [vmem:[#allocation27_spill] sm:$0xff] }
 0x3eb   :  { %3707 = vmatpush1.bf16.msra.mxu1 %v5659_v27  ;;  %3771 = vmatpush1.bf16.msra.mxu0 %v7181_v50  ;;  %v7186_v27 = vld [vmem:[#allocation28_spill] sm:$0xff]  ;;  %v7209_v50 = vld [vmem:[#allocation137_spill] sm:$0xff] }
 0x3ec   :  { %3709 = vmatprep.subr.bf16.mxu1 %v5662_v21  ;;  %3773 = vmatprep.subr.bf16.mxu0 %v7182_v14  ;;  %v7187_v21 = vld [vmem:[#allocation29_spill] sm:$0xff]  ;;  %v7208_v14 = vld [vmem:[#allocation131_spill] sm:$0xff] }
 0x3ef   :  { %3711 = vmatpush1.bf16.msra.mxu1 %v5677_v0  ;;  %3775 = vmatpush1.bf16.msra.mxu0 %v7183_v31  ;;  %v7188_v0 = vld [vmem:[#allocation30_spill] sm:$0xff] }
 0x3f0   :  { %3713 = vmatprep.subr.bf16.mxu1 %v5680_v63  ;;  %3777 = vmatprep.subr.bf16.mxu0 %v7184_v13  ;;  %v7189_v63 = vld [vmem:[#allocation31_spill] sm:$0xff]  ;;  %v7207_v13 = vld [vmem:[#allocation134_spill] sm:$0xff] }
 0x3f3   :  { %3715 = vmatpush1.bf16.msra.mxu1 %v5695_v51  ;;  %3779 = vmatpush1.bf16.msra.mxu0 %v7185_v19  ;;  %v7190_v51 = vld [vmem:[#allocation32_spill] sm:$0xff]  ;;  %v7206_v19 = vld [vmem:[#allocation127_spill] sm:$0xff] }
 0x3f4   :  { %3717 = vmatprep.subr.bf16.mxu1 %v5698_v39  ;;  %3781 = vmatprep.subr.bf16.mxu0 %v7186_v27  ;;  %v7191_v39 = vld [vmem:[#allocation33_spill] sm:$0xff]  ;;  %v7192_v27 = vld [vmem:[#allocation94_spill] sm:$0xff] }
 0x3f7   :  { %3719 = vmatpush1.bf16.msra.mxu1 %v5715_v7  ;;  %3783 = vmatpush1.bf16.msra.mxu0 %v7187_v21  ;;  %v7193_v7 = vld [vmem:[#allocation34_spill] sm:$0xff]  ;;  %v7194_v21 = vld [vmem:[#allocation95_spill] sm:$0xff] }
 0x3f8   :  { %3721 = vmatprep.subr.bf16.mxu1 %v5718_v4  ;;  %3785 = vmatprep.subr.bf16.mxu0 %v7188_v0  ;;  %v7195_v4 = vld [vmem:[#allocation35_spill] sm:$0xff]  ;;  %v7196_v0 = vld [vmem:[#allocation96_spill] sm:$0xff] }
 0x3fb   :  { %3723 = vmatpush1.bf16.msra.mxu1 %v5733_v25  ;;  %3787 = vmatpush1.bf16.msra.mxu0 %v7189_v63  ;;  %v7197_v25 = vld [vmem:[#allocation36_spill] sm:$0xff]  ;;  %v7198_v63 = vld [vmem:[#allocation97_spill] sm:$0xff] }
 0x3fc   :  { %3725 = vmatprep.subr.bf16.mxu1 %v5736_v49  ;;  %3789 = vmatprep.subr.bf16.mxu0 %v7190_v51  ;;  %v7199_v49 = vld [vmem:[#allocation37_spill] sm:$0xff]  ;;  %v7200_v51 = vld [vmem:[#allocation98_spill] sm:$0xff] }
 0x3ff   :  { %3727 = vmatpush1.bf16.msra.mxu1 %v5751_v5  ;;  %3791 = vmatpush1.bf16.msra.mxu0 %v7191_v39  ;;  %v7201_v5 = vld [vmem:[#allocation38_spill] sm:$0xff]  ;;  %v7202_v39 = vld [vmem:[#allocation99_spill] sm:$0xff] }
 0x400   :  { %3729 = vmatprep.subr.bf16.mxu1 %v7192_v27  ;;  %3793 = vmatprep.subr.bf16.mxu0 %v7193_v7  ;;  %v7203_v27 = vld [vmem:[#allocation39_spill] sm:$0xff]  ;;  %v7204_v7 = vld [vmem:[#allocation100_spill] sm:$0xff] }
 0x403   :  { %3731 = vmatpush1.bf16.msra.mxu1 %v7194_v21  ;;  %3795 = vmatpush1.bf16.msra.mxu0 %v7195_v4  ;;  %v7205_v21 = vld [vmem:[#allocation40_spill] sm:$0xff] }
 0x404   :  { %3733 = vmatprep.subr.bf16.mxu1 %v7196_v0  ;;  %3797 = vmatprep.subr.bf16.mxu0 %v7197_v25 }
 0x407   :  { %3735 = vmatpush1.bf16.msra.mxu1 %v7198_v63  ;;  %3799 = vmatpush1.bf16.msra.mxu0 %v7199_v49 }
 0x408   :  { %3737 = vmatprep.subr.bf16.mxu1 %v7200_v51  ;;  %3801 = vmatprep.subr.bf16.mxu0 %v7201_v5 }
 0x40b   :  { %3739 = vmatpush1.bf16.msra.mxu1 %v7202_v39  ;;  %3803 = vmatpush1.bf16.msra.mxu0 %v7203_v27 }
 0x40c   :  { %3805 = vmatprep.subr.bf16.mxu1 %v7204_v7  ;;  %3869 = vmatprep.subr.bf16.mxu0 %v7205_v21 }
 0x461   :  { %v1835_v4 = vpop.f32.mrb[36].mxu1  ;;  %v1906_v0 = vpop.f32.mrb[84].mxu0 }
 0x462   :  { %v2053_v25 = vadd.f32 %v1835_v4, %v7206_v19  ;;  %v2055_v63 = vadd.f32 %v1906_v0, %v7207_v13  ;;  %v1837_v31 = vpop.f32.mrb[37].mxu1  ;;  %v1908_v49 = vpop.f32.mrb[85].mxu0 }
 0x463   :  { %v2054_v51 = vadd.f32 %v1837_v31, %v7208_v14  ;;  %v2056_v5 = vadd.f32 %v1908_v49, %v7209_v50 }
 0x464   :  { %v2952_v48 = vmul.f32 -1.442695, %v2053_v25  ;;  %v2954_v39 = vmul.f32 -1.442695, %v2055_v63  ;;  %v7210_v63 = vld [vmem:[#allocation140_spill] sm:$0xff] }
 0x465   :  { %v2953_v9 = vmul.f32 -1.442695, %v2054_v51  ;;  %v2955_v27 = vmul.f32 -1.442695, %v2056_v5 }
 0x466   :  { %4260 = vpow2.f32 %v2952_v48 }
 0x467   :  { %4262 = vpow2.f32 %v2954_v39 }
 0x468   :  { %4264 = vpow2.f32 %v2953_v9 }
 0x469   :  { %4266 = vpow2.f32 %v2955_v27  ;;  %v7211_v27 = vld [vmem:[#allocation143_spill] sm:$0xff] }
 0x470   :  { %v4261_v21 = vpop.eup %4260 }
 0x471   :  { %v4263_v7 = vpop.eup %4262  ;;  %v2079_v4 = vadd.f32 1.0, %v4261_v21 }
 0x472   :  { %v4265_v8 = vpop.eup %4264  ;;  %v2081_v13 = vadd.f32 1.0, %v4263_v7 }
 0x473   :  { %v4267_v19 = vpop.eup %4266  ;;  %v2080_v0 = vadd.f32 1.0, %v4265_v8  ;;  %4268 = vrcp.f32 %v2079_v4 }
 0x474   :  { %v2082_v53 = vadd.f32 1.0, %v4267_v19  ;;  %4270 = vrcp.f32 %v2081_v13 }
 0x475   :  { %4272 = vrcp.f32 %v2080_v0 }
 0x476   :  { %4274 = vrcp.f32 %v2082_v53 }
 0x47d   :  { %v4269_v7 = vpop.eup %4268 }
 0x47e   :  { %v4271_v9 = vpop.eup %4270 }
 0x47f   :  { %v4273_v14 = vpop.eup %4272 }
 0x480   :  { %v4275_v19 = vpop.eup %4274 }
 0x4a1   :  { %v1977_v31 = vpop.f32.mrb[38].mxu1  ;;  %v2048_v50 = vpop.f32.mrb[86].mxu0 }
 0x4a2   :  { %v2057_v51 = vadd.f32 %v1977_v31, %v7210_v63  ;;  %v2059_v48 = vadd.f32 %v2048_v50, %v6225_v35  ;;  %v1979_v39 = vpop.f32.mrb[39].mxu1  ;;  %v2050_v25 = vpop.f32.mrb[87].mxu0  ;;  %v2099_v35 = vmul.f32 %v4271_v9, %v6241_v38  ;;  %v2100_v31 = vmul.f32 %v4275_v19, %v6243_v18  ;;  %v7215_v9 = vld [vmem:[#allocation108_spill] sm:$0xff]  ;;  %v7217_v19 = vld [vmem:[#allocation109_spill] sm:$0xff] }
 0x4a3   :  { %v2058_v49 = vadd.f32 %v1979_v39, %v7211_v27  ;;  %v2060_v5 = vadd.f32 %v2050_v25, %v6231_v6 }
 0x4a4   :  { %v2956_v21 = vmul.f32 -1.442695, %v2057_v51  ;;  %4276 = vtanh.f32 %v2059_v48 }
 0x4a5   :  { %v2957_v8 = vmul.f32 -1.442695, %v2058_v49  ;;  %4278 = vtanh.f32 %v2060_v5 }
 0x4a6   :  { %4280 = vpow2.f32 %v2956_v21  ;;  %v7212_v21 = vld [vmem:[#allocation48_spill] sm:$0xff] }
 0x4a7   :  { %4282 = vpow2.f32 %v2957_v8  ;;  %v7213_v8 = vld [vmem:[#allocation107_spill] sm:$0xff] }
 0x4ae   :  { %v4277_v4 = vpop.eup %4276 }
 0x4af   :  { %v4279_v13 = vpop.eup %4278  ;;  %v2101_v0 = vmul.f32 %v4277_v4, %v4269_v7  ;;  %v7214_v7 = vld [vmem:[#allocation49_spill] sm:$0xff]  ;;  %v7218_v4 = vld [vmem:[#allocation51_spill] sm:$0xff] }
 0x4b0   :  { %v4281_v53 = vpop.eup %4280  ;;  %v2102_v50 = vmul.f32 %v4279_v13, %v4273_v14  ;;  %v7216_v14 = vld [vmem:[#allocation50_spill] sm:$0xff] }
 0x4b1   :  { %v4283_v6 = vpop.eup %4282  ;;  %v2083_v63 = vadd.f32 1.0, %v4281_v53  ;;  %v6395_v51 = vadd.f32 %v2101_v0, %v2099_v35  ;;  %v7219_v13 = vld [vmem:[#allocation110_spill] sm:$0xff]  ;;  %v7220_v35 = vld [vmem:[#allocation52_spill] sm:$0xff]  ;;  %v7221_v0 = vld [vmem:[#allocation111_spill] sm:$0xff] }
 0x4b2   :  { %v2084_v48 = vadd.f32 1.0, %v4283_v6  ;;  %v6397_v39 = vadd.f32 %v2102_v50, %v2100_v31  ;;  %v7222_v53 = vld [vmem:[#allocation53_spill] sm:$0xff]  ;;  %v7223_v31 = vld [vmem:[#allocation112_spill] sm:$0xff]  ;;  %v7224_v50 = vld [vmem:[#allocation54_spill] sm:$0xff] }
 0x4b3   :  { %4284 = vrcp.f32 %v2083_v63  ;;  %v7225_v6 = vld [vmem:[#allocation113_spill] sm:$0xff]  ;;  %v7226_v63 = vld [vmem:[#allocation55_spill] sm:$0xff] }
 0x4b4   :  { %4286 = vtanh.f32 %v6395_v51 }
 0x4b5   :  { %4288 = vrcp.f32 %v2084_v48  ;;  %v7227_v48 = vld [vmem:[#allocation114_spill] sm:$0xff] }
 0x4b6   :  { %4290 = vtanh.f32 %v6397_v39 }
 0x4bd   :  { %v4285_v25 = vpop.eup %4284 }
 0x4be   :  { %v4287_v38 = vpop.eup %4286 }
 0x4bf   :  { %v4289_v27 = vpop.eup %4288  ;;  %v6401_v18 = vmul.f32 %v4287_v38, %v4285_v25  ;;  %v7228_v25 = vld [vmem:[#allocation56_spill] sm:$0xff]  ;;  %v7229_v38 = vld [vmem:[#allocation115_spill] sm:$0xff] }
 0x4c0   :  { %v4291_v49 = vpop.eup %4290 }
 0x4c1   :  { %v2108_v5 = vmul.f32 %v4291_v49, %v4289_v27  ;;  %v7230_v27 = vld [vmem:[#allocation57_spill] sm:$0xff]  ;;  %v7231_v49 = vld [vmem:[#allocation116_spill] sm:$0xff] }
 0x4c3   :  { %2173 = vmatprep.mubr.f32.mxu1 %v2108_v5  ;;  %2244 = vmatprep.mubr.f32.mxu0 %v2108_v5 }
 0x4c4   :  { %2174 = vmatmul.mubr.f32.vlgmr.msra.gmra.mrb[40].mxu1 %v6401_v18  ;;  %2245 = vmatmul.mubr.f32.vlgmr.msra.gmra.mrb[88].mxu0 %v6401_v18 }
 0x4c5   :  { %3807 = vmatpush1.bf16.msra.mxu1 %v5823_v2  ;;  %3871 = vmatpush1.bf16.msra.mxu0 %v5099_v17 }
 0x4c6   :  { %2315 = vmatprep.mubr.f32.mxu1 %v2108_v5  ;;  %2386 = vmatprep.mubr.f32.mxu0 %v2108_v5  ;;  %v7232_v5 = vld [vmem:[#allocation58_spill] sm:$0xff] }
 0x4c7   :  { %3809 = vmatprep.subr.bf16.mxu1 %v5826_v56  ;;  %3873 = vmatprep.subr.bf16.mxu0 %v5116_v44 }
 0x4c9   :  { %3811 = vmatpush1.bf16.msra.mxu1 %v5842_v52  ;;  %3875 = vmatpush1.bf16.msra.mxu0 %v5124_v36 }
 0x4ca   :  { %3813 = vmatprep.subr.bf16.mxu1 %v5846_v37  ;;  %3877 = vmatprep.subr.bf16.mxu0 %v7113_v28 }
 0x4cd   :  { %3815 = vmatpush1.bf16.msra.mxu1 %v5861_v34  ;;  %3879 = vmatpush1.bf16.msra.mxu0 %v7114_v43 }
 0x4ce   :  { %3817 = vmatprep.subr.bf16.mxu1 %v7115_v30  ;;  %3881 = vmatprep.subr.bf16.mxu0 %v7116_v45 }
 0x4d1   :  { %3819 = vmatpush1.bf16.msra.mxu1 %v7117_v29  ;;  %3883 = vmatpush1.bf16.msra.mxu0 %v7118_v58 }
 0x4d2   :  { %3821 = vmatprep.subr.bf16.mxu1 %v7119_v16  ;;  %3885 = vmatprep.subr.bf16.mxu0 %v7120_v12 }
 0x4d5   :  { %3823 = vmatpush1.bf16.msra.mxu1 %v7121_v32  ;;  %3887 = vmatpush1.bf16.msra.mxu0 %v7122_v40 }
 0x4d6   :  { %3825 = vmatprep.subr.bf16.mxu1 %v7123_v23  ;;  %3889 = vmatprep.subr.bf16.mxu0 %v7124_v11 }
 0x4d9   :  { %3827 = vmatpush1.bf16.msra.mxu1 %v7125_v41  ;;  %3891 = vmatpush1.bf16.msra.mxu0 %v7212_v21 }
 0x4da   :  { %3829 = vmatprep.subr.bf16.mxu1 %v7213_v8  ;;  %3893 = vmatprep.subr.bf16.mxu0 %v7214_v7 }
 0x4dd   :  { %3831 = vmatpush1.bf16.msra.mxu1 %v7215_v9  ;;  %3895 = vmatpush1.bf16.msra.mxu0 %v7216_v14 }
 0x4de   :  { %3833 = vmatprep.subr.bf16.mxu1 %v7217_v19  ;;  %3897 = vmatprep.subr.bf16.mxu0 %v7218_v4 }
 0x4e1   :  { %3835 = vmatpush1.bf16.msra.mxu1 %v7219_v13  ;;  %3899 = vmatpush1.bf16.msra.mxu0 %v7220_v35 }
 0x4e2   :  { %3837 = vmatprep.subr.bf16.mxu1 %v7221_v0  ;;  %3901 = vmatprep.subr.bf16.mxu0 %v7222_v53  ;;  %v7233_v53 = vld [vmem:[#allocation117_spill] sm:$0xff] }
 0x4e5   :  { %3839 = vmatpush1.bf16.msra.mxu1 %v7223_v31  ;;  %3903 = vmatpush1.bf16.msra.mxu0 %v7224_v50  ;;  %v7234_v31 = vld [vmem:[#allocation59_spill] sm:$0xff]  ;;  %v7235_v50 = vld [vmem:[#allocation118_spill] sm:$0xff] }
 0x4e6   :  { %3841 = vmatprep.subr.bf16.mxu1 %v7225_v6  ;;  %3905 = vmatprep.subr.bf16.mxu0 %v7226_v63  ;;  %v7236_v63 = vld [vmem:[#allocation119_spill] sm:$0xff] }
 0x4e9   :  { %3843 = vmatpush1.bf16.msra.mxu1 %v7227_v48  ;;  %3907 = vmatpush1.bf16.msra.mxu0 %v7228_v25  ;;  %v7237_v25 = vld [vmem:[#allocation120_spill] sm:$0xff] }
 0x4ea   :  { %3845 = vmatprep.subr.bf16.mxu1 %v7229_v38  ;;  %3909 = vmatprep.subr.bf16.mxu0 %v7230_v27  ;;  %v7238_v27 = vld [vmem:[#allocation121_spill] sm:$0xff] }
 0x4ed   :  { %3847 = vmatpush1.bf16.msra.mxu1 %v7231_v49  ;;  %3911 = vmatpush1.bf16.msra.mxu0 %v7232_v5  ;;  %v7239_v5 = vld [vmem:[#allocation122_spill] sm:$0xff] }
 0x4ee   :  { %3849 = vmatprep.subr.bf16.mxu1 %v7233_v53  ;;  %3913 = vmatprep.subr.bf16.mxu0 %v7234_v31 }
 0x4f1   :  { %3851 = vmatpush1.bf16.msra.mxu1 %v7235_v50  ;;  %3915 = vmatpush1.bf16.msra.mxu0 %v7150_v15  ;;  %v7240_v15 = vld [vmem:[#allocation125_spill] sm:$0xff] }
 0x4f2   :  { %3853 = vmatprep.subr.bf16.mxu1 %v7236_v63  ;;  %3917 = vmatprep.subr.bf16.mxu0 %v7152_v33  ;;  %v7241_v33 = vld [vmem:[#allocation126_spill] sm:$0xff] }
 0x4f5   :  { %3855 = vmatpush1.bf16.msra.mxu1 %v7237_v25  ;;  %3919 = vmatpush1.bf16.msra.mxu0 %v7154_v60  ;;  %v7242_v60 = vld [vmem:[#allocation129_spill] sm:$0xff] }
 0x4f6   :  { %3857 = vmatprep.subr.bf16.mxu1 %v7238_v27  ;;  %3921 = vmatprep.subr.bf16.mxu0 %v7156_v59  ;;  %v7243_v59 = vld [vmem:[#allocation69_spill] sm:$0xff] }
 0x4f9   :  { %3859 = vmatpush1.bf16.msra.mxu1 %v7239_v5  ;;  %3923 = vmatpush1.bf16.msra.mxu0 %v7158_v42  ;;  %v7244_v5 = vld [vmem:[#allocation8_spill] sm:$0xff] }
 0x4fa   :  { %3861 = vmatprep.subr.bf16.mxu1 %v7159_v54  ;;  %3925 = vmatprep.subr.bf16.mxu0 %v7160_v47 }
 0x4fd   :  { %3863 = vmatpush1.bf16.msra.mxu1 %v7240_v15  ;;  %3927 = vmatpush1.bf16.msra.mxu0 %v7161_v46  ;;  %v7245_v46 = vld [vmem:[#allocation70_spill] sm:$0xff] }
 0x4fe   :  { %3865 = vmatprep.subr.bf16.mxu1 %v7241_v33  ;;  %3929 = vmatprep.subr.bf16.mxu0 %v7162_v55  ;;  %v7246_v33 = vld [vmem:[#allocation10_spill] sm:$0xff]  ;;  %v7247_v55 = vld [vmem:[#allocation71_spill] sm:$0xff] }
 0x501   :  { %3867 = vmatpush1.bf16.msra.mxu1 %v7242_v60  ;;  %3931 = vmatpush1.bf16.msra.mxu0 %v7163_v20  ;;  %v7248_v20 = vld [vmem:[#allocation72_spill] sm:$0xff] }
 0x502   :  { %3933 = vmatprep.subr.bf16.mxu1 %v7243_v59  ;;  %3997 = vmatprep.subr.bf16.mxu0 %v7244_v5  ;;  %v7249_v59 = vld [vmem:[#allocation73_spill] sm:$0xff] }
 0x503   :  { %v7250_v5 = vld [vmem:[#allocation13_spill] sm:$0xff] }
 0x504   :  { %2316 = vmatmul.mubr.f32.vlgmr.msra.gmra.mrb[42].mxu1 %v6401_v18  ;;  %2387 = vmatmul.mubr.f32.vlgmr.msra.gmra.mrb[90].mxu0 %v6401_v18  ;;  %v7251_v18 = vld [vmem:[#allocation74_spill] sm:$0xff] }
 0x505   :  { %3935 = vmatpush1.bf16.msra.mxu1 %v5523_v57  ;;  %3999 = vmatpush1.bf16.msra.mxu0 %v7165_v3  ;;  %v7252_v57 = vld [vmem:[#allocation75_spill] sm:$0xff]  ;;  %v7253_v3 = vld [vmem:[#allocation76_spill] sm:$0xff] }
 0x506   :  { %3937 = vmatprep.subr.bf16.mxu1 %v7245_v46  ;;  %4001 = vmatprep.subr.bf16.mxu0 %v7246_v33  ;;  %v7256_v46 = vld [vmem:[#allocation79_spill] sm:$0xff] }
 0x507   :  { %v7257_v33 = vld [vmem:[#allocation19_spill] sm:$0xff] }
 0x509   :  { %3939 = vmatpush1.bf16.msra.mxu1 %v7247_v55  ;;  %4003 = vmatpush1.bf16.msra.mxu0 %v7167_v62  ;;  %v7254_v62 = vld [vmem:[#allocation77_spill] sm:$0xff]  ;;  %v7258_v55 = vld [vmem:[#allocation80_spill] sm:$0xff] }
 0x50a   :  { %3941 = vmatprep.subr.bf16.mxu1 %v7248_v20  ;;  %4005 = vmatprep.subr.bf16.mxu0 %v7168_v24  ;;  %v7255_v24 = vld [vmem:[#allocation78_spill] sm:$0xff]  ;;  %v7259_v20 = vld [vmem:[#allocation20_spill] sm:$0xff] }
 0x50d   :  { %3943 = vmatpush1.bf16.msra.mxu1 %v7249_v59  ;;  %4007 = vmatpush1.bf16.msra.mxu0 %v7250_v5  ;;  %v7263_v59 = vld [vmem:[#allocation22_spill] sm:$0xff]  ;;  %v7265_v5 = vld [vmem:[#allocation23_spill] sm:$0xff] }
 0x50e   :  { %3945 = vmatprep.subr.bf16.mxu1 %v7251_v18  ;;  %4009 = vmatprep.subr.bf16.mxu0 %v7170_v10  ;;  %v7261_v10 = vld [vmem:[#allocation21_spill] sm:$0xff]  ;;  %v7267_v18 = vld [vmem:[#allocation24_spill] sm:$0xff] }
 0x511   :  { %3947 = vmatpush1.bf16.msra.mxu1 %v7252_v57  ;;  %4011 = vmatpush1.bf16.msra.mxu0 %v7171_v61  ;;  %v7260_v61 = vld [vmem:[#allocation81_spill] sm:$0xff] }
 0x512   :  { %3949 = vmatprep.subr.bf16.mxu1 %v7253_v3  ;;  %4013 = vmatprep.subr.bf16.mxu0 %v7173_v22  ;;  %v7262_v22 = vld [vmem:[#allocation82_spill] sm:$0xff]  ;;  %v7268_v57 = vld [vmem:[#allocation85_spill] sm:$0xff] }
 0x513   :  { %v7269_v3 = vld [vmem:[#allocation25_spill] sm:$0xff] }
 0x515   :  { %3951 = vmatpush1.bf16.msra.mxu1 %v7254_v62  ;;  %4015 = vmatpush1.bf16.msra.mxu0 %v7174_v1  ;;  %v7264_v1 = vld [vmem:[#allocation83_spill] sm:$0xff]  ;;  %v7270_v62 = vld [vmem:[#allocation86_spill] sm:$0xff] }
 0x516   :  { %3953 = vmatprep.subr.bf16.mxu1 %v7255_v24  ;;  %4017 = vmatprep.subr.bf16.mxu0 %v7175_v26  ;;  %v7266_v26 = vld [vmem:[#allocation84_spill] sm:$0xff]  ;;  %v7271_v24 = vld [vmem:[#allocation26_spill] sm:$0xff] }
 0x519   :  { %3955 = vmatpush1.bf16.msra.mxu1 %v7256_v46  ;;  %4019 = vmatpush1.bf16.msra.mxu0 %v7257_v33  ;;  %v7272_v46 = vld [vmem:[#allocation87_spill] sm:$0xff] }
 0x51a   :  { %3957 = vmatprep.subr.bf16.mxu1 %v7258_v55  ;;  %4021 = vmatprep.subr.bf16.mxu0 %v7259_v20  ;;  %v7273_v33 = vld [vmem:[#allocation27_spill] sm:$0xff]  ;;  %v7274_v55 = vld [vmem:[#allocation88_spill] sm:$0xff] }
 0x51b   :  { %v7275_v20 = vld [vmem:[#allocation28_spill] sm:$0xff] }
 0x51d   :  { %3959 = vmatpush1.bf16.msra.mxu1 %v7260_v61  ;;  %4023 = vmatpush1.bf16.msra.mxu0 %v7261_v10  ;;  %v7276_v61 = vld [vmem:[#allocation89_spill] sm:$0xff] }
 0x51e   :  { %3961 = vmatprep.subr.bf16.mxu1 %v7262_v22  ;;  %4025 = vmatprep.subr.bf16.mxu0 %v7263_v59  ;;  %v7277_v10 = vld [vmem:[#allocation29_spill] sm:$0xff]  ;;  %v7278_v22 = vld [vmem:[#allocation90_spill] sm:$0xff] }
 0x51f   :  { %v7279_v59 = vld [vmem:[#allocation30_spill] sm:$0xff] }
 0x521   :  { %3963 = vmatpush1.bf16.msra.mxu1 %v7264_v1  ;;  %4027 = vmatpush1.bf16.msra.mxu0 %v7265_v5  ;;  %v7280_v1 = vld [vmem:[#allocation91_spill] sm:$0xff] }
 0x522   :  { %3965 = vmatprep.subr.bf16.mxu1 %v7266_v26  ;;  %4029 = vmatprep.subr.bf16.mxu0 %v7267_v18  ;;  %v7281_v5 = vld [vmem:[#allocation31_spill] sm:$0xff]  ;;  %v7282_v26 = vld [vmem:[#allocation92_spill] sm:$0xff] }
 0x523   :  { %v7283_v18 = vld [vmem:[#allocation32_spill] sm:$0xff] }
 0x525   :  { %3967 = vmatpush1.bf16.msra.mxu1 %v7268_v57  ;;  %4031 = vmatpush1.bf16.msra.mxu0 %v7269_v3  ;;  %v7284_v57 = vld [vmem:[#allocation93_spill] sm:$0xff] }
 0x526   :  { %3969 = vmatprep.subr.bf16.mxu1 %v7270_v62  ;;  %4033 = vmatprep.subr.bf16.mxu0 %v7271_v24  ;;  %v7285_v3 = vld [vmem:[#allocation33_spill] sm:$0xff]  ;;  %v7286_v62 = vld [vmem:[#allocation94_spill] sm:$0xff] }
 0x527   :  { %v7287_v24 = vld [vmem:[#allocation34_spill] sm:$0xff] }
 0x529   :  { %3971 = vmatpush1.bf16.msra.mxu1 %v7272_v46  ;;  %4035 = vmatpush1.bf16.msra.mxu0 %v7273_v33  ;;  %v7288_v46 = vld [vmem:[#allocation95_spill] sm:$0xff] }
 0x52a   :  { %3973 = vmatprep.subr.bf16.mxu1 %v7274_v55  ;;  %4037 = vmatprep.subr.bf16.mxu0 %v7275_v20  ;;  %v7289_v33 = vld [vmem:[#allocation35_spill] sm:$0xff]  ;;  %v7290_v55 = vld [vmem:[#allocation96_spill] sm:$0xff] }
 0x52b   :  { %v7291_v20 = vld [vmem:[#allocation36_spill] sm:$0xff] }
 0x52d   :  { %3975 = vmatpush1.bf16.msra.mxu1 %v7276_v61  ;;  %4039 = vmatpush1.bf16.msra.mxu0 %v7277_v10  ;;  %v7292_v61 = vld [vmem:[#allocation97_spill] sm:$0xff] }
 0x52e   :  { %3977 = vmatprep.subr.bf16.mxu1 %v7278_v22  ;;  %4041 = vmatprep.subr.bf16.mxu0 %v7279_v59  ;;  %v7293_v10 = vld [vmem:[#allocation37_spill] sm:$0xff]  ;;  %v7294_v22 = vld [vmem:[#allocation98_spill] sm:$0xff] }
 0x52f   :  { %v7295_v59 = vld [vmem:[#allocation38_spill] sm:$0xff] }
 0x531   :  { %3979 = vmatpush1.bf16.msra.mxu1 %v7280_v1  ;;  %4043 = vmatpush1.bf16.msra.mxu0 %v7281_v5  ;;  %v7296_v1 = vld [vmem:[#allocation99_spill] sm:$0xff] }
 0x532   :  { %3981 = vmatprep.subr.bf16.mxu1 %v7282_v26  ;;  %4045 = vmatprep.subr.bf16.mxu0 %v7283_v18  ;;  %v7297_v5 = vld [vmem:[#allocation39_spill] sm:$0xff]  ;;  %v7298_v26 = vld [vmem:[#allocation100_spill] sm:$0xff] }
 0x533   :  { %v7299_v18 = vld [vmem:[#allocation40_spill] sm:$0xff] }
 0x535   :  { %3983 = vmatpush1.bf16.msra.mxu1 %v7284_v57  ;;  %4047 = vmatpush1.bf16.msra.mxu0 %v7285_v3 }
 0x536   :  { %3985 = vmatprep.subr.bf16.mxu1 %v7286_v62  ;;  %4049 = vmatprep.subr.bf16.mxu0 %v7287_v24  ;;  %v7300_v62 = vld [vmem:[#allocation130_spill] sm:$0xff] }
 0x539   :  { %3987 = vmatpush1.bf16.msra.mxu1 %v7288_v46  ;;  %4051 = vmatpush1.bf16.msra.mxu0 %v7289_v33  ;;  %v7301_v46 = vld [vmem:[#allocation136_spill] sm:$0xff] }
 0x53a   :  { %3989 = vmatprep.subr.bf16.mxu1 %v7290_v55  ;;  %4053 = vmatprep.subr.bf16.mxu0 %v7291_v20 }
 0x53d   :  { %3991 = vmatpush1.bf16.msra.mxu1 %v7292_v61  ;;  %4055 = vmatpush1.bf16.msra.mxu0 %v7293_v10  ;;  %v7302_v61 = vld [vmem:[#allocation128_spill] sm:$0xff] }
 0x53e   :  { %3993 = vmatprep.subr.bf16.mxu1 %v7294_v22  ;;  %4057 = vmatprep.subr.bf16.mxu0 %v7295_v59  ;;  %v7303_v22 = vld [vmem:[#allocation135_spill] sm:$0xff] }
 0x541   :  { %3995 = vmatpush1.bf16.msra.mxu1 %v7296_v1  ;;  %4059 = vmatpush1.bf16.msra.mxu0 %v7297_v5 }
 0x542   :  { %4061 = vmatprep.subr.bf16.mxu1 %v7298_v26  ;;  %4125 = vmatprep.subr.bf16.mxu0 %v7299_v18 }
 0x597   :  { %v2175_v57 = vpop.f32.mrb[40].mxu1  ;;  %v2246_v3 = vpop.f32.mrb[88].mxu0 }
 0x598   :  { %v2393_v24 = vadd.f32 %v2175_v57, %v7300_v62  ;;  %v2395_v33 = vadd.f32 %v2246_v3, %v7301_v46  ;;  %v2177_v55 = vpop.f32.mrb[41].mxu1  ;;  %v2248_v20 = vpop.f32.mrb[89].mxu0 }
 0x599   :  { %v2394_v10 = vadd.f32 %v2177_v55, %v7302_v61  ;;  %v2396_v59 = vadd.f32 %v2248_v20, %v7303_v22  ;;  %v7305_v61 = vld [vmem:[#allocation147_spill] sm:$0xff]  ;;  %v7306_v22 = vld [vmem:[#allocation141_spill] sm:$0xff] }
 0x59a   :  { %v2958_v60 = vmul.f32 -1.442695, %v2393_v24  ;;  %v2960_v1 = vmul.f32 -1.442695, %v2395_v33  ;;  %v7304_v24 = vld [vmem:[#allocation142_spill] sm:$0xff] }
 0x59b   :  { %v2959_v15 = vmul.f32 -1.442695, %v2394_v10  ;;  %v2961_v5 = vmul.f32 -1.442695, %v2396_v59 }
 0x59c   :  { %4292 = vpow2.f32 %v2958_v60 }
 0x59d   :  { %4294 = vpow2.f32 %v2960_v1  ;;  %v7307_v1 = vld [vmem:[#allocation146_spill] sm:$0xff] }
 0x59e   :  { %4296 = vpow2.f32 %v2959_v15 }
 0x59f   :  { %4298 = vpow2.f32 %v2961_v5 }
 0x5a6   :  { %v4293_v26 = vpop.eup %4292 }
 0x5a7   :  { %v4295_v18 = vpop.eup %4294  ;;  %v2419_v62 = vadd.f32 1.0, %v4293_v26 }
 0x5a8   :  { %v4297_v47 = vpop.eup %4296  ;;  %v2421_v3 = vadd.f32 1.0, %v4295_v18 }
 0x5a9   :  { %v4299_v57 = vpop.eup %4298  ;;  %v2420_v46 = vadd.f32 1.0, %v4297_v47  ;;  %4300 = vrcp.f32 %v2419_v62 }
 0x5aa   :  { %v2422_v54 = vadd.f32 1.0, %v4299_v57  ;;  %4302 = vrcp.f32 %v2421_v3 }
 0x5ab   :  { %4304 = vrcp.f32 %v2420_v46 }
 0x5ac   :  { %4306 = vrcp.f32 %v2422_v54 }
 0x5b3   :  { %v4301_v18 = vpop.eup %4300 }
 0x5b4   :  { %v4303_v57 = vpop.eup %4302 }
 0x5b5   :  { %v4305_v62 = vpop.eup %4304 }
 0x5b6   :  { %v4307_v3 = vpop.eup %4306 }
 0x5d7   :  { %v2317_v55 = vpop.f32.mrb[42].mxu1  ;;  %v2388_v20 = vpop.f32.mrb[90].mxu0 }
 0x5d8   :  { %v2397_v33 = vadd.f32 %v2317_v55, %v7304_v24  ;;  %v2399_v60 = vadd.f32 %v2388_v20, %v7305_v61  ;;  %v2319_v10 = vpop.f32.mrb[43].mxu1  ;;  %v2390_v15 = vpop.f32.mrb[91].mxu0  ;;  %v2439_v20 = vmul.f32 %v4303_v57, %v6395_v51  ;;  %v2440_v61 = vmul.f32 %v4307_v3, %v6397_v39  ;;  %v2814_v3 = vld [vmem:[%s6737_s6 + $0xc8] sm:$0xff] }
 0x5d9   :  { %v2398_v59 = vadd.f32 %v2319_v10, %v7306_v22  ;;  %v2400_v5 = vadd.f32 %v2390_v15, %v7307_v1 }
 0x5da   :  { %v2962_v26 = vmul.f32 -1.442695, %v2397_v33  ;;  %4308 = vtanh.f32 %v2399_v60 }
 0x5db   :  { %v2963_v47 = vmul.f32 -1.442695, %v2398_v59  ;;  %4310 = vtanh.f32 %v2400_v5 }
 0x5dc   :  { %4312 = vpow2.f32 %v2962_v26 }
 0x5dd   :  { %4314 = vpow2.f32 %v2963_v47 }
 0x5e4   :  { %v4309_v46 = vpop.eup %4308 }
 0x5e5   :  { %v4311_v55 = vpop.eup %4310  ;;  %v2441_v24 = vmul.f32 %v4309_v46, %v4301_v18  ;;  %v2796_v18 = vld [vmem:[%s6737_s6 + $0x38] sm:$0xff] }
 0x5e6   :  { %v4313_v54 = vpop.eup %4312  ;;  %v2442_v10 = vmul.f32 %v4311_v55, %v4305_v62  ;;  %v2813_v62 = vld [vmem:[%s6737_s6 + $0xc0] sm:$0xff] }
 0x5e7   :  { %v4315_v15 = vpop.eup %4314  ;;  %v2423_v33 = vadd.f32 1.0, %v4313_v54  ;;  %v6545_v60 = vadd.f32 %v2441_v24, %v2439_v20  ;;  %v4204_v46 = vpack.c.bf16 %v2814_v3, %v2813_v62  ;;  %v2797_v55 = vld [vmem:[%s6737_s6 + $0x40] sm:$0xff]  ;;  %v2798_v20 = vld [vmem:[%s6737_s6 + $0x48] sm:$0xff]  ;;  %v2815_v54 = vld [vmem:[%s6737_s6 + $0xd0] sm:$0xff] }
 0x5e8   :  { %v2424_v22 = vadd.f32 1.0, %v4315_v15  ;;  %v6547_v59 = vadd.f32 %v2442_v10, %v2440_v61  ;;  %v4206_v24 = vpack.c.bf16 %v2798_v20, %v2797_v55  ;;  %v2816_v61 = vld [vmem:[%s6737_s6 + $0xd8] sm:$0xff]  ;;  %v2799_v15 = vld [vmem:[%s6737_s6 + $0x50] sm:$0xff] }
 0x5e9   :  { %4316 = vrcp.f32 %v2423_v33  ;;  %v4208_v10 = vpack.c.bf16 %v2816_v61, %v2815_v54  ;;  %v2800_v33 = vld [vmem:[%s6737_s6 + $0x58] sm:$0xff] }
 0x5ea   :  { %4318 = vtanh.f32 %v6545_v60 }
 0x5eb   :  { %4320 = vrcp.f32 %v2424_v22  ;;  %v2817_v22 = vld [vmem:[%s6737_s6 + $0xe0] sm:$0xff] }
 0x5ec   :  { %4322 = vtanh.f32 %v6547_v59 }
 0x5f3   :  { %v4317_v1 = vpop.eup %4316 }
 0x5f4   :  { %v4319_v51 = vpop.eup %4318 }
 0x5f5   :  { %v4321_v5 = vpop.eup %4320  ;;  %v6551_v39 = vmul.f32 %v4319_v51, %v4317_v1  ;;  %v4210_v1 = vpack.c.bf16 %v2800_v33, %v2799_v15  ;;  %v2818_v51 = vld [vmem:[%s6737_s6 + $0xe8] sm:$0xff] }
 0x5f6   :  { %v4323_v26 = vpop.eup %4322 }
 0x5f7   :  { %v2448_v47 = vmul.f32 %v4323_v26, %v4321_v5  ;;  %v2801_v5 = vld [vmem:[%s6737_s6 + $0x60] sm:$0xff]  ;;  %v2802_v26 = vld [vmem:[%s6737_s6 + $0x68] sm:$0xff] }
 0x5f9   :  { %2513 = vmatprep.mubr.f32.mxu1 %v2448_v47  ;;  %2584 = vmatprep.mubr.f32.mxu0 %v2448_v47 }
 0x5fa   :  { %2514 = vmatmul.mubr.f32.vlgmr.msra.gmra.mrb[44].mxu1 %v6551_v39  ;;  %2585 = vmatmul.mubr.f32.vlgmr.msra.gmra.mrb[92].mxu0 %v6551_v39 }
 0x5fb   :  { %4063 = vmatpush1.bf16.msra.mxu1 %v5823_v2  ;;  %4127 = vmatpush1.bf16.msra.mxu0 %v5099_v17  ;;  %v7308_v17 = vld [vmem:[#allocation53_spill] sm:$0xff]  ;;  %v7311_v2 = vld [vmem:[#allocation55_spill] sm:$0xff] }
 0x5fc   :  { %2655 = vmatprep.mubr.f32.mxu1 %v2448_v47  ;;  %2726 = vmatprep.mubr.f32.mxu0 %v2448_v47  ;;  %v4212_v47 = vpack.c.bf16 %v2818_v51, %v2817_v22 }
 0x5fd   :  { %4065 = vmatprep.subr.bf16.mxu1 %v5826_v56  ;;  %4129 = vmatprep.subr.bf16.mxu0 %v5116_v44  ;;  %v7309_v44 = vld [vmem:[#allocation112_spill] sm:$0xff] }
 0x5fe   :  { %v7312_v56 = vld [vmem:[#allocation56_spill] sm:$0xff] }
 0x5ff   :  { %4067 = vmatpush1.bf16.msra.mxu1 %v5842_v52  ;;  %4131 = vmatpush1.bf16.msra.mxu0 %v5124_v36  ;;  %v7310_v36 = vld [vmem:[#allocation54_spill] sm:$0xff]  ;;  %v7313_v52 = vld [vmem:[#allocation57_spill] sm:$0xff] }
 0x600   :  { %4069 = vmatprep.subr.bf16.mxu1 %v5846_v37  ;;  %4133 = vmatprep.subr.bf16.mxu0 %v7113_v28  ;;  %v7314_v37 = vld [vmem:[#allocation58_spill] sm:$0xff]  ;;  %v7316_v28 = vld [vmem:[#allocation61_spill] sm:$0xff] }
 0x603   :  { %4071 = vmatpush1.bf16.msra.mxu1 %v5861_v34  ;;  %4135 = vmatpush1.bf16.msra.mxu0 %v7114_v43  ;;  %v7315_v34 = vld [vmem:[#allocation60_spill] sm:$0xff]  ;;  %v7317_v43 = vld [vmem:[#allocation62_spill] sm:$0xff] }
 0x604   :  { %4073 = vmatprep.subr.bf16.mxu1 %v7115_v30  ;;  %4137 = vmatprep.subr.bf16.mxu0 %v7116_v45  ;;  %v7318_v30 = vld [vmem:[#allocation63_spill] sm:$0xff]  ;;  %v7319_v45 = vld [vmem:[#allocation122_spill] sm:$0xff] }
 0x607   :  { %4075 = vmatpush1.bf16.msra.mxu1 %v7117_v29  ;;  %4139 = vmatpush1.bf16.msra.mxu0 %v7118_v58  ;;  %v7320_v29 = vld [vmem:[#allocation123_spill] sm:$0xff]  ;;  %v7321_v58 = vld [vmem:[#allocation65_spill] sm:$0xff] }
 0x608   :  { %4077 = vmatprep.subr.bf16.mxu1 %v7119_v16  ;;  %4141 = vmatprep.subr.bf16.mxu0 %v7120_v12  ;;  %v7322_v16 = vld [vmem:[#allocation125_spill] sm:$0xff]  ;;  %v7323_v12 = vld [vmem:[#allocation66_spill] sm:$0xff] }
 0x60b   :  { %4079 = vmatpush1.bf16.msra.mxu1 %v7121_v32  ;;  %4143 = vmatpush1.bf16.msra.mxu0 %v7122_v40  ;;  %v7324_v32 = vld [vmem:[#allocation126_spill] sm:$0xff]  ;;  %v7325_v40 = vld [vmem:[#allocation67_spill] sm:$0xff] }
 0x60c   :  { %4081 = vmatprep.subr.bf16.mxu1 %v7123_v23  ;;  %4145 = vmatprep.subr.bf16.mxu0 %v7124_v11  ;;  %v7326_v23 = vld [vmem:[#allocation129_spill] sm:$0xff]  ;;  %v7327_v11 = vld [vmem:[#allocation68_spill] sm:$0xff] }
 0x60f   :  { %4083 = vmatpush1.bf16.msra.mxu1 %v7125_v41  ;;  %4147 = vmatpush1.bf16.msra.mxu0 %v7212_v21  ;;  %v2806_v41 = vld [vmem:[%s6737_s6 + $0x88] sm:$0xff] }
 0x610   :  { %4085 = vmatprep.subr.bf16.mxu1 %v7213_v8  ;;  %4149 = vmatprep.subr.bf16.mxu0 %v7214_v7  ;;  %v2789_v8 = vld [vmem:[%s6737_s6] sm:$0xff]  ;;  %v2790_v7 = vld [vmem:[%s6737_s6 + $0x8] sm:$0xff] }
 0x613   :  { %4087 = vmatpush1.bf16.msra.mxu1 %v7215_v9  ;;  %4151 = vmatpush1.bf16.msra.mxu0 %v7216_v14  ;;  %v4190_v9 = vpack.c.bf16 %v2790_v7, %v2789_v8  ;;  %v2807_v14 = vld [vmem:[%s6737_s6 + $0x90] sm:$0xff] }
 0x614   :  { %4089 = vmatprep.subr.bf16.mxu1 %v7217_v19  ;;  %4153 = vmatprep.subr.bf16.mxu0 %v7218_v4  ;;  %v2808_v19 = vld [vmem:[%s6737_s6 + $0x98] sm:$0xff] }
 0x615   :  { %v4192_v4 = vpack.c.bf16 %v2808_v19, %v2807_v14 }
 0x617   :  { %4091 = vmatpush1.bf16.msra.mxu1 %v7219_v13  ;;  %4155 = vmatpush1.bf16.msra.mxu0 %v7220_v35  ;;  %v2791_v13 = vld [vmem:[%s6737_s6 + $0x10] sm:$0xff]  ;;  %v2792_v35 = vld [vmem:[%s6737_s6 + $0x18] sm:$0xff] }
 0x618   :  { %4093 = vmatprep.subr.bf16.mxu1 %v7221_v0  ;;  %4157 = vmatprep.subr.bf16.mxu0 %v7308_v17  ;;  %v4194_v0 = vpack.c.bf16 %v2792_v35, %v2791_v13  ;;  %v2820_v17 = vld [vmem:[%s6737_s6 + $0xf8] sm:$0xff] }
 0x61b   :  { %4095 = vmatpush1.bf16.msra.mxu1 %v7309_v44  ;;  %4159 = vmatpush1.bf16.msra.mxu0 %v7310_v36  ;;  %v4214_v44 = vpack.c.bf16 %v2802_v26, %v2801_v5 }
 0x61c   :  { %4097 = vmatprep.subr.bf16.mxu1 %v7225_v6  ;;  %4161 = vmatprep.subr.bf16.mxu0 %v7311_v2  ;;  %v2793_v6 = vld [vmem:[%s6737_s6 + $0x20] sm:$0xff]  ;;  %v2803_v2 = vld [vmem:[%s6737_s6 + $0x70] sm:$0xff] }
 0x61f   :  { %4099 = vmatpush1.bf16.msra.mxu1 %v7227_v48  ;;  %4163 = vmatpush1.bf16.msra.mxu0 %v7312_v56  ;;  %v2804_v56 = vld [vmem:[%s6737_s6 + $0x78] sm:$0xff] }
 0x620   :  { %4101 = vmatprep.subr.bf16.mxu1 %v7229_v38  ;;  %4165 = vmatprep.subr.bf16.mxu0 %v7313_v52  ;;  %v2812_v38 = vld [vmem:[%s6737_s6 + $0xb8] sm:$0xff]  ;;  %v4218_v52 = vpack.c.bf16 %v2804_v56, %v2803_v2 }
 0x623   :  { %4103 = vmatpush1.bf16.msra.mxu1 %v7231_v49  ;;  %4167 = vmatpush1.bf16.msra.mxu0 %v7314_v37  ;;  %v2795_v49 = vld [vmem:[%s6737_s6 + $0x30] sm:$0xff] }
 0x624   :  { %4105 = vmatprep.subr.bf16.mxu1 %v7233_v53  ;;  %4169 = vmatprep.subr.bf16.mxu0 %v7234_v31  ;;  %v2809_v53 = vld [vmem:[%s6737_s6 + $0xa0] sm:$0xff]  ;;  %v2810_v31 = vld [vmem:[%s6737_s6 + $0xa8] sm:$0xff]  ;;  %v4202_v57 = vpack.c.bf16 %v2796_v18, %v2795_v49 }
 0x627   :  { %4107 = vmatpush1.bf16.msra.mxu1 %v7235_v50  ;;  %4171 = vmatpush1.bf16.msra.mxu0 %v7315_v34  ;;  %v4196_v50 = vpack.c.bf16 %v2810_v31, %v2809_v53  ;;  %v7332_v53 = vld [vmem:[#allocation144_spill] sm:$0xff] }
 0x628   :  { %4109 = vmatprep.subr.bf16.mxu1 %v7236_v63  ;;  %4173 = vmatprep.subr.bf16.mxu0 %v7316_v28  ;;  %v2794_v63 = vld [vmem:[%s6737_s6 + $0x28] sm:$0xff]  ;;  %v7328_v28 = vld [vmem:[#allocation132_spill] sm:$0xff] }
 0x629   :  { %v4198_v48 = vpack.c.bf16 %v2794_v63, %v2793_v6 }
 0x62b   :  { %4111 = vmatpush1.bf16.msra.mxu1 %v7237_v25  ;;  %4175 = vmatpush1.bf16.msra.mxu0 %v7317_v43  ;;  %v2811_v25 = vld [vmem:[%s6737_s6 + $0xb0] sm:$0xff] }
 0x62c   :  { %4113 = vmatprep.subr.bf16.mxu1 %v7238_v27  ;;  %4177 = vmatprep.subr.bf16.mxu0 %v7318_v30  ;;  %v4200_v27 = vpack.c.bf16 %v2812_v38, %v2811_v25  ;;  %v7329_v30 = vld [vmem:[#allocation138_spill] sm:$0xff]  ;;  %v7334_v25 = vld [vmem:[#allocation139_spill] sm:$0xff] }
 0x62f   :  { %4115 = vmatpush1.bf16.msra.mxu1 %v7319_v45  ;;  %4179 = vmatpush1.bf16.msra.mxu0 %v7158_v42  ;;  %v2805_v42 = vld [vmem:[%s6737_s6 + $0x80] sm:$0xff] }
 0x630   :  { %4117 = vmatprep.subr.bf16.mxu1 %v7320_v29  ;;  %4181 = vmatprep.subr.bf16.mxu0 %v7321_v58  ;;  %v4188_v21 = vpack.c.bf16 %v2806_v41, %v2805_v42 }
 0x633   :  { %4119 = vmatpush1.bf16.msra.mxu1 %v7322_v16  ;;  %4183 = vmatpush1.bf16.msra.mxu0 %v7323_v12  ;;  %v7330_v16 = vld [vmem:[#allocation124_spill] sm:$0xff] }
 0x634   :  { %4121 = vmatprep.subr.bf16.mxu1 %v7324_v32  ;;  %4185 = vmatprep.subr.bf16.mxu0 %v7325_v40  ;;  %v7331_v32 = vld [vmem:[#allocation133_spill] sm:$0xff] }
 0x637   :  { %4123 = vmatpush1.bf16.msra.mxu1 %v7326_v23  ;;  %4187 = vmatpush1.bf16.msra.mxu0 %v7327_v11 }
 0x638   :  { %4189 = vmatprep.subr.bf16.mxu1 %v4188_v21 }
 0x63a   :  { %2656 = vmatmul.mubr.f32.vlgmr.msra.gmra.mrb[46].mxu1 %v6551_v39  ;;  %2727 = vmatmul.mubr.f32.vlgmr.msra.gmra.mrb[94].mxu0 %v6551_v39  ;;  %v2819_v39 = vld [vmem:[%s6737_s6 + $0xf0] sm:$0xff] }
 0x63b   :  { %4191 = vmatpush3.bf16.msra.mxu1 %v4190_v9  ;;  %v4216_v36 = vpack.c.bf16 %v2820_v17, %v2819_v39 }
 0x63c   :  { %4193 = vmatprep.subr.bf16.mxu1 %v4192_v4 }
 0x63f   :  { %4195 = vmatpush3.bf16.msra.mxu1 %v4194_v0 }
 0x640   :  { %4197 = vmatprep.subr.bf16.mxu1 %v4196_v50  ;;  %v7333_v50 = vld [vmem:[#allocation148_spill] sm:$0xff] }
 0x643   :  { %4199 = vmatpush3.bf16.msra.mxu1 %v4198_v48 }
 0x644   :  { %4201 = vmatprep.subr.bf16.mxu1 %v4200_v27  ;;  %v7335_v27 = vld [vmem:[#allocation145_spill] sm:$0xff] }
 0x647   :  { %4203 = vmatpush3.bf16.msra.mxu1 %v4202_v57 }
 0x648   :  { %4205 = vmatprep.subr.bf16.mxu1 %v4204_v46 }
 0x64b   :  { %4207 = vmatpush3.bf16.msra.mxu1 %v4206_v24 }
 0x64c   :  { %4209 = vmatprep.subr.bf16.mxu1 %v4208_v10 }
 0x64f   :  { %4211 = vmatpush3.bf16.msra.mxu1 %v4210_v1 }
 0x650   :  { %4213 = vmatprep.subr.bf16.mxu1 %v4212_v47 }
 0x653   :  { %4215 = vmatpush3.bf16.msra.mxu1 %v4214_v44 }
 0x654   :  { %4217 = vmatprep.subr.bf16.mxu1 %v4216_v36 }
 0x657   :  { %4219 = vmatpush3.bf16.msra.mxu1 %v4218_v52 }
 0x6cd   :  { %v2515_v37 = vpop.f32.mrb[44].mxu1  ;;  %v2586_v34 = vpop.f32.mrb[92].mxu0 }
 0x6ce   :  { %v2733_v43 = vadd.f32 %v2515_v37, %v7328_v28  ;;  %v2735_v45 = vadd.f32 %v2586_v34, %v7329_v30  ;;  %v2517_v29 = vpop.f32.mrb[45].mxu1  ;;  %v2588_v58 = vpop.f32.mrb[93].mxu0 }
 0x6cf   :  { %v2734_v12 = vadd.f32 %v2517_v29, %v7330_v16  ;;  %v2736_v40 = vadd.f32 %v2588_v58, %v7331_v32 }
 0x6d0   :  { %v2964_v23 = vmul.f32 -1.442695, %v2733_v43  ;;  %v2966_v11 = vmul.f32 -1.442695, %v2735_v45 }
 0x6d1   :  { %v2965_v42 = vmul.f32 -1.442695, %v2734_v12  ;;  %v2967_v41 = vmul.f32 -1.442695, %v2736_v40 }
 0x6d2   :  { %4324 = vpow2.f32 %v2964_v23 }
 0x6d3   :  { %4326 = vpow2.f32 %v2966_v11 }
 0x6d4   :  { %4328 = vpow2.f32 %v2965_v42 }
 0x6d5   :  { %4330 = vpow2.f32 %v2967_v41 }
 0x6dc   :  { %v4325_v21 = vpop.eup %4324 }
 0x6dd   :  { %v4327_v8 = vpop.eup %4326  ;;  %v2759_v14 = vadd.f32 1.0, %v4325_v21 }
 0x6de   :  { %v4329_v7 = vpop.eup %4328  ;;  %v2761_v19 = vadd.f32 1.0, %v4327_v8 }
 0x6df   :  { %v4331_v9 = vpop.eup %4330  ;;  %v2760_v4 = vadd.f32 1.0, %v4329_v7  ;;  %4332 = vrcp.f32 %v2759_v14 }
 0x6e0   :  { %v2762_v13 = vadd.f32 1.0, %v4331_v9  ;;  %4334 = vrcp.f32 %v2761_v19 }
 0x6e1   :  { %4336 = vrcp.f32 %v2760_v4 }
 0x6e2   :  { %4338 = vrcp.f32 %v2762_v13 }
 0x6e9   :  { %v4333_v62 = vpop.eup %4332 }
 0x6ea   :  { %v4335_v3 = vpop.eup %4334 }
 0x6eb   :  { %v4337_v46 = vpop.eup %4336  ;;  %v2779_v54 = vmul.f32 %v4335_v3, %v6545_v60 }
 0x6ec   :  { %v4339_v55 = vpop.eup %4338 }
 0x6ed   :  { %v2780_v15 = vmul.f32 %v4339_v55, %v6547_v59  ;;  %v2970_v59 = vld [vmem:[%s6738_s7] ss:$0 sm:$0xff] }
 0x70d   :  { %v2657_v35 = vpop.f32.mrb[46].mxu1  ;;  %v2728_v0 = vpop.f32.mrb[94].mxu0 }
 0x70e   :  { %v2737_v31 = vadd.f32 %v2657_v35, %v7332_v53  ;;  %v2739_v6 = vadd.f32 %v2728_v0, %v7333_v50  ;;  %v2659_v63 = vpop.f32.mrb[47].mxu1  ;;  %v2730_v48 = vpop.f32.mrb[95].mxu0 }
 0x70f   :  { %v2738_v38 = vadd.f32 %v2659_v63, %v7334_v25  ;;  %v2740_v49 = vadd.f32 %v2730_v48, %v7335_v27 }
 0x710   :  { %v2968_v18 = vmul.f32 -1.442695, %v2737_v31  ;;  %4340 = vtanh.f32 %v2739_v6 }
 0x711   :  { %v2969_v57 = vmul.f32 -1.442695, %v2738_v38  ;;  %4342 = vtanh.f32 %v2740_v49 }
 0x712   :  { %4344 = vpow2.f32 %v2968_v18 }
 0x713   :  { %4346 = vpow2.f32 %v2969_v57 }
 0x71a   :  { %v4341_v20 = vpop.eup %4340 }
 0x71b   :  { %v4343_v24 = vpop.eup %4342  ;;  %v2781_v61 = vmul.f32 %v4341_v20, %v4333_v62 }
 0x71c   :  { %v4345_v10 = vpop.eup %4344  ;;  %v2782_v33 = vmul.f32 %v4343_v24, %v4337_v46 }
 0x71d   :  { %v4347_v22 = vpop.eup %4346  ;;  %v2763_v1 = vadd.f32 1.0, %v4345_v10  ;;  %v2783_v51 = vadd.f32 %v2781_v61, %v2779_v54 }
 0x71e   :  { %v2764_v5 = vadd.f32 1.0, %v4347_v22  ;;  %v2784_v26 = vadd.f32 %v2782_v33, %v2780_v15 }
 0x71f   :  { %4348 = vrcp.f32 %v2763_v1 }
 0x720   :  { %4350 = vtanh.f32 %v2783_v51 }
 0x721   :  { %4352 = vrcp.f32 %v2764_v5 }
 0x722   :  { %4354 = vtanh.f32 %v2784_v26 }
 0x729   :  { %v4349_v47 = vpop.eup %4348 }
 0x72a   :  { %v4351_v39 = vpop.eup %4350 }
 0x72b   :  { %v4353_v17 = vpop.eup %4352  ;;  %v2787_v44 = vmul.f32 %v4351_v39, %v4349_v47 }
 0x72c   :  { %v4355_v36 = vpop.eup %4354 }
 0x72d   :  { %v2788_v60 = vmul.f32 %v4355_v36, %v4353_v17 }
 0x72f   :  { %2892 = vmatprep.mubr.f32.mxu1 %v2788_v60 }
 0x730   :  { %2893 = vmatmul.mubr.f32.vlgmr.msra.gmra.mrb[48].mxu1 %v2787_v44 }
 0x803   :  { %v3003_v2 = vpop.f32.mrb[48].mxu1 }
 0x804   :  { %v3004_v56 = vpop.f32.mrb[49].mxu1 }
 0x805   :  { %v3005_v52 = vadd.f32 %v3004_v56, %v3003_v2 }
 0x807   :  { %v2895_v37 = vadd.f32 %v3005_v52, %v2970_v59 }
 0x809   :  { %2898 = vst [vmem:[%s6739_s8] sm:$0xff] %v2895_v37 }
 0x80a   :  { %2903 = vsyncpa [#allocation3], 1 }
 0x80b   :  { %2904 = vsyncpa [#allocation5], 1 }

</bundles_post_ra>
